<compile_context>
chip_gen: v5e
topology: v5e:2x2
jax: 0.10.0
libtpu: 0.0.40
codegen_flags: <defaults>
</compile_context>

<pallas_src>
import numpy as np

import jax
import jax.numpy as jnp
from jax import lax
from jax.experimental import pallas as pl
from jax.experimental.pallas import tpu as pltpu


# ----------------------------------------------------------------------------
# Fused UpsampleBlock kernel body
# ----------------------------------------------------------------------------
def _make_fused_kernel(H, Hs, W, b_tile, has_down):
    """Builds the fused kernel (static shapes baked in via closure)."""
    M = b_tile * H   # matmul M dim: B_TILE images stacked along rows

    def kernel(*refs):
        if has_down:
            (skip_ref, up_ref, uh_ref, uw_ref, bws_ref, bs_ref,
             bw1_ref, b1_ref, bwd_ref, bd_ref, bw2_ref, b2_ref, out_ref) = refs
        else:
            (skip_ref, up_ref, uh_ref, uw_ref, bws_ref, bs_ref,
             bw1_ref, b1_ref, bw2_ref, b2_ref, out_ref) = refs

        # Per-image row-boundary masks (only needed when >1 image is stacked).
        if b_tile > 1:
            row = lax.broadcasted_iota(jnp.int32, (M, 1), 0) % H
            first_row = row == 0          # row 0    of every image in the slab
            last_row = row == H - 1       # row H-1  of every image in the slab

        def conv3x3(x_val, bw_ref, b_ref, relu):
            """3x3 SAME conv of a batch-stacked lane-dense slab.

            x_val : (M, W*Cin) f32/bf16 activation slab.
            bw_ref: (3, W*Cin, W*Cout) banded bf16 weights (dx taps + SAME
                    padding along W folded into the band).
            b_ref : (1, W*Cout) f32 bias.
            SAME padding along H is done in-register: the dy=1 term uses x_val
            directly, dy=0 / dy=2 use x_val shifted by one row with the
            per-image boundary rows zeroed.  Returns f32 (M, W*Cout).
            """
            if relu:
                x_val = jnp.maximum(x_val, 0.0)
            xb = x_val.astype(jnp.bfloat16)                      # MXU operand
            zrow = jnp.zeros((1, xb.shape[1]), jnp.bfloat16)
            x_prev = jnp.concatenate([zrow, xb[:-1, :]], axis=0)  # x[i-1]
            x_next = jnp.concatenate([xb[1:, :], zrow], axis=0)   # x[i+1]
            if b_tile > 1:
                x_prev = jnp.where(first_row, 0.0, x_prev)  # zero across image seams
                x_next = jnp.where(last_row, 0.0, x_next)
            acc = jnp.dot(x_prev, bw_ref[0], preferred_element_type=jnp.float32)
            acc = acc + jnp.dot(xb, bw_ref[1], preferred_element_type=jnp.float32)
            acc = acc + jnp.dot(x_next, bw_ref[2], preferred_element_type=jnp.float32)
            return acc + b_ref[...]                              # f32 (M, W*Cout)

        skip = skip_ref[...]                                     # (M, W*skip_c) bf16
        u = up_ref[...]                                          # (b*Hs, Ws*up_c) bf16

        # Bilinear 2x upsample (align_corners=False) as two constant matmuls:
        # block-diag (M, b*Hs) H-matrix, then (Ws*up_c, W*up_c) W-matrix.
        up2 = jnp.dot(uh_ref[...], u, preferred_element_type=jnp.float32)
        up2 = jnp.dot(up2.astype(jnp.bfloat16), uw_ref[...],
                      preferred_element_type=jnp.float32)        # (M, W*up_c) f32

        # x = skip_conv(skip_f) + interpolate(up_f)
        x = conv3x3(skip, bws_ref, bs_ref, relu=False) + up2

        # ResBlock(up_c -> out_c): out = down(x) + conv2(relu(conv1(relu(x))))
        r = conv3x3(x, bw1_ref, b1_ref, relu=True)
        xd = conv3x3(x, bwd_ref, bd_ref, relu=False) if has_down else x
        out = conv3x3(r, bw2_ref, b2_ref, relu=True) + xd

        out_ref[...] = out.astype(out_ref.dtype)                 # (M, W*out_c)

    return kernel


# ----------------------------------------------------------------------------
# One-time parameter repacking (outside jit): banded bf16 weights, lane-dense
# f32 biases, constant bf16 bilinear-upsample matrices.
# ----------------------------------------------------------------------------
def _upsample_matrix(out_size, in_size):
    """1-D bilinear interpolation matrix (align_corners=False), shape (out, in)."""
    m = np.zeros((out_size, in_size), np.float32)
    scale = in_size / out_size
    for o in range(out_size):
        src = (o + 0.5) * scale - 0.5
        src = min(max(src, 0.0), in_size - 1)
        lo = int(np.floor(src))
        hi = min(lo + 1, in_size - 1)
        frac = src - lo
        m[o, lo] += 1.0 - frac
        m[o, hi] += frac
    return m


def _band_conv_weight(w_hwio, W):
    """(3, 3, Cin, Cout) HWIO -> (3, W*Cin, W*Cout) banded matrices.

    band[dy, jin*Cin + ci, jout*Cout + co] = w[dy, jin - jout + 1, ci, co]
    (zero outside the 3-tap band).  A lane-dense image row (W*Cin lanes) times
    band[dy] performs all dx taps of kernel-row dy plus SAME padding along W.
    """
    w = np.asarray(w_hwio, np.float32)
    _, _, cin, cout = w.shape
    band = np.zeros((3, W * cin, W * cout), np.float32)
    for dy in range(3):
        for jout in range(W):
            for dx in range(3):
                jin = jout + dx - 1
                if 0 <= jin < W:
                    band[dy, jin * cin:(jin + 1) * cin,
                         jout * cout:(jout + 1) * cout] = w[dy, dx]
    return band


def choose_batch_tile(N, H, target_rows=256):
    """Largest batch tile B with B*H <= target_rows (v6e/v7x MXU height),
    preferring to keep >= 2 grid steps so both v7x TensorCores get work."""
    divisors = [b for b in range(1, N + 1) if N % b == 0 and b * H <= target_rows]
    if not divisors:
        return 1
    two_step = [b for b in divisors if N // b >= 2]
    return max(two_step) if two_step else max(divisors)


def prepare_params(params, H, W, Hs, Ws, b_tile):
    up_c = int(np.asarray(params["w_skip"]).shape[-1])
    wdt = jnp.bfloat16   # MXU-native operand dtype; accumulation stays f32

    def bias_flat(b):    # biases stay f32: added after f32 accumulation
        return jnp.asarray(np.tile(np.asarray(b, np.float32), W)[None, :])

    uh = _upsample_matrix(H, Hs)                                   # (H, Hs)
    uh_big = np.kron(np.eye(b_tile, dtype=np.float32), uh)         # (b*H, b*Hs)
    uw = np.kron(_upsample_matrix(W, Ws).T,
                 np.eye(up_c, dtype=np.float32))                   # (Ws*up_c, W*up_c)

    prep = {
        "uh": jnp.asarray(uh_big, wdt),
        "uw": jnp.asarray(uw, wdt),
        "bw_skip": jnp.asarray(_band_conv_weight(params["w_skip"], W), wdt),
        "b_skip": bias_flat(params["b_skip"]),
        "bw1": jnp.asarray(_band_conv_weight(params["w1"], W), wdt),
        "b1": bias_flat(params["b1"]),
        "bw2": jnp.asarray(_band_conv_weight(params["w2"], W), wdt),
        "b2": bias_flat(params["b2"]),
    }
    if params.get("w_down") is not None:
        prep["bw_down"] = jnp.asarray(_band_conv_weight(params["w_down"], W), wdt)
        prep["b_down"] = bias_flat(params["b_down"])
    return prep


# ----------------------------------------------------------------------------
# Forward: NCHW in / NCHW out, single fused pallas_call
# ----------------------------------------------------------------------------
def upsample_block_forward(skip_f_nchw, up_f_nchw, prep, *, b_tile,
                           single_buffer_consts=True):
    N, skip_c, H, W = skip_f_nchw.shape
    _, up_c, Hs, Ws = up_f_nchw.shape
    out_c = prep["b2"].shape[-1] // W
    has_down = "bw_down" in prep
    assert N % b_tile == 0, (N, b_tile)
    grid_n = N // b_tile

    # NCHW -> lane-dense, batch-flattened (N*H, W*C) bf16 slabs (layout
    # plumbing + cast in XLA; halves the activation HBM->VMEM DMA).
    skip = jnp.transpose(skip_f_nchw, (0, 2, 3, 1)).reshape(N * H, W * skip_c)
    up = jnp.transpose(up_f_nchw, (0, 2, 3, 1)).reshape(N * Hs, Ws * up_c)
    skip = skip.astype(jnp.bfloat16)
    up = up.astype(jnp.bfloat16)

    kernel = _make_fused_kernel(H, Hs, W, b_tile, has_down)

    def const_spec(a):
        # Grid-invariant operand: whole array as one block; single-buffered
        # (default double-buffering only wastes VMEM on never-changing blocks —
        # matters most under v7x's 64 MiB VMEM).
        idx = (lambda n: (0, 0)) if a.ndim == 2 else (lambda n: (0, 0, 0))
        if single_buffer_consts:
            return pl.BlockSpec(a.shape, idx, pipeline_mode=pl.Buffered(1))
        return pl.BlockSpec(a.shape, idx)

    in_specs = [
        pl.BlockSpec((b_tile * H, W * skip_c), lambda n: (n, 0)),
        pl.BlockSpec((b_tile * Hs, Ws * up_c), lambda n: (n, 0)),
        const_spec(prep["uh"]), const_spec(prep["uw"]),
        const_spec(prep["bw_skip"]), const_spec(prep["b_skip"]),
        const_spec(prep["bw1"]), const_spec(prep["b1"]),
    ]
    args = [skip, up, prep["uh"], prep["uw"],
            prep["bw_skip"], prep["b_skip"], prep["bw1"], prep["b1"]]
    if has_down:
        in_specs += [const_spec(prep["bw_down"]), const_spec(prep["b_down"])]
        args += [prep["bw_down"], prep["b_down"]]
    in_specs += [const_spec(prep["bw2"]), const_spec(prep["b2"])]
    args += [prep["bw2"], prep["b2"]]

    out_flat = pl.pallas_call(
        kernel,
        out_shape=jax.ShapeDtypeStruct((N * H, W * out_c), jnp.float32),
        grid=(grid_n,),   # batch-tile axis; "parallel" -> shards across v7x's 2 TCs
        in_specs=in_specs,
        out_specs=pl.BlockSpec((b_tile * H, W * out_c), lambda n: (n, 0)),
        compiler_params=pltpu.CompilerParams(
            dimension_semantics=("parallel",)),
    )(*args)

    # TODO(synk): for production-size H/W, add a W-tile grid axis with a
    # 1-column halo folded into a per-tile band (keeps K near the MXU width,
    # bounds the O(W^2) banded-weight VMEM growth) and set vmem_limit_bytes
    # explicitly for v7x's 64 MiB VMEM.  At these small shapes everything fits.
    return jnp.transpose(out_flat.reshape(N, H, W, out_c), (0, 3, 1, 2))


# ----------------------------------------------------------------------------
# Pure-JAX reference (independent formulation, for verification)
# ----------------------------------------------------------------------------
def bilinear_upsample_2x(x):
    """x: (N, H, W, C) -> (N, 2H, 2W, C), align_corners=False."""
    N, H, W, C = x.shape

    def src_index(out_size, in_size):
        o = jnp.arange(out_size, dtype=jnp.float32)
        src = (o + 0.5) * (in_size / out_size) - 0.5
        src = jnp.clip(src, 0.0, float(in_size - 1))
        lo = jnp.floor(src).astype(jnp.int32)
        hi = jnp.minimum(lo + 1, in_size - 1)
        frac = src - lo.astype(jnp.float32)
        return lo, hi, frac

    hl, hh, hf = src_index(2 * H, H)
    wl, wh, wf = src_index(2 * W, W)
    xh = (x[:, hl, :, :] * (1.0 - hf)[None, :, None, None]
          + x[:, hh, :, :] * hf[None, :, None, None])
    return (xh[:, :, wl, :] * (1.0 - wf)[None, None, :, None]
            + xh[:, :, wh, :] * wf[None, None, :, None])


def _conv_ref(x_nhwc, w, b):
    y = lax.conv_general_dilated(
        x_nhwc, w, window_strides=(1, 1), padding="SAME",
        dimension_numbers=("NHWC", "HWIO", "NHWC"),
        precision=lax.Precision.HIGHEST)
    return y + b[None, None, None, :]


def upsample_block_ref(skip_f_nchw, up_f_nchw, params):
    skip = jnp.transpose(skip_f_nchw, (0, 2, 3, 1))
    up = jnp.transpose(up_f_nchw, (0, 2, 3, 1))
    x = _conv_ref(skip, params["w_skip"], params["b_skip"]) + bilinear_upsample_2x(up)
    r = _conv_ref(jnp.maximum(x, 0.0), params["w1"], params["b1"])
    r = _conv_ref(jnp.maximum(r, 0.0), params["w2"], params["b2"])
    if params.get("w_down") is not None:
        x = _conv_ref(x, params["w_down"], params["b_down"])
    return jnp.transpose(x + r, (0, 3, 1, 2))


# ----------------------------------------------------------------------------
if __name__ == "__main__":
    key = jax.random.PRNGKey(0)
    ks = jax.random.split(key, 12)

    # Small shapes consistent with the module (batch 4 so the batch-stacked
    # grid actually has 2 images per step and 2 parallel grid steps).
    N = 4
    skip_c, up_c, out_c = 4, 8, 16
    H = W = 16          # spatial size of skip_f (and of the output)
    Hs = Ws = 8         # spatial size of up_f; scale_factor=2 -> 16x16

    skip_f = jax.random.normal(ks[0], (N, skip_c, H, W), jnp.float32)
    up_f = jax.random.normal(ks[1], (N, up_c, Hs, Ws), jnp.float32)

    def winit(k, cin, cout):
        return 0.1 * jax.random.normal(k, (3, 3, cin, cout), jnp.float32)

    def binit(k, cout):
        return 0.1 * jax.random.normal(k, (cout,), jnp.float32)

    params = {
        "w_skip": winit(ks[2], skip_c, up_c), "b_skip": binit(ks[3], up_c),
        "w1": winit(ks[4], up_c, out_c),      "b1": binit(ks[5], out_c),
        "w2": winit(ks[6], out_c, out_c),     "b2": binit(ks[7], out_c),
        # up_c != out_c -> ResBlock has a downsample conv
        "w_down": winit(ks[8], up_c, out_c),  "b_down": binit(ks[9], out_c),
    }

    b_tile = choose_batch_tile(N, H)               # -> 2 here: grid=2, M=32
    prep = prepare_params(params, H, W, Hs, Ws, b_tile)   # one-time repack

    fwd = jax.jit(upsample_block_forward,
                  static_argnames=("b_tile", "single_buffer_consts"))
    try:
        out = jax.block_until_ready(fwd(skip_f, up_f, prep, b_tile=b_tile))
    except Exception:
        # Fallback: if this jax build rejects Buffered(1) on pallas_call
        # inputs, retry with default double-buffered constant operands.
        out = jax.block_until_ready(
            fwd(skip_f, up_f, prep, b_tile=b_tile, single_buffer_consts=False))

    ref = jax.block_until_ready(upsample_block_ref(skip_f, up_f, params))

    assert out.shape == (N, out_c, H, W), out.shape
    # bf16 MXU operands (with f32 accumulation) vs. the HIGHEST-precision f32
    # XLA reference conv -> slightly loose tolerance.
    np.testing.assert_allclose(np.asarray(out), np.asarray(ref),
                               rtol=3e-2, atol=3e-2)
    print("KERNEL_OK")
</pallas_src>

<mosaic_0001>
module attributes {stable_mosaic.version = 11 : i64} {
  func.func @kernel(%arg0: i32, %arg1: memref<32x64xbf16, #tpu.memory_space<vmem>>, %arg2: memref<16x64xbf16, #tpu.memory_space<vmem>>, %arg3: memref<32x16xbf16, #tpu.memory_space<vmem>>, %arg4: memref<64x128xbf16, #tpu.memory_space<vmem>>, %arg5: memref<3x64x128xbf16, #tpu.memory_space<vmem>>, %arg6: memref<1x128xf32, #tpu.memory_space<vmem>>, %arg7: memref<3x128x256xbf16, #tpu.memory_space<vmem>>, %arg8: memref<1x256xf32, #tpu.memory_space<vmem>>, %arg9: memref<3x128x256xbf16, #tpu.memory_space<vmem>>, %arg10: memref<1x256xf32, #tpu.memory_space<vmem>>, %arg11: memref<3x256x256xbf16, #tpu.memory_space<vmem>>, %arg12: memref<1x256xf32, #tpu.memory_space<vmem>>, %arg13: memref<32x256xf32, #tpu.memory_space<vmem>>) attributes {dimension_semantics = [#tpu.dimension_semantics<parallel>], iteration_bounds = array<i64: 2>, scalar_prefetch = 0 : i64, scratch_operands = 0 : i64, tpu.core_type = #tpu.core_type<tc>, window_params = [{transform_indices = @transform_0, window_bounds = array<i64: 32, 64>}, {transform_indices = @transform_1, window_bounds = array<i64: 16, 64>}, {pipeline_mode = #tpu.pipeline_mode<synchronous>, transform_indices = @transform_2, window_bounds = array<i64: 32, 16>}, {pipeline_mode = #tpu.pipeline_mode<synchronous>, transform_indices = @transform_3, window_bounds = array<i64: 64, 128>}, {pipeline_mode = #tpu.pipeline_mode<synchronous>, transform_indices = @transform_4, window_bounds = array<i64: 3, 64, 128>}, {pipeline_mode = #tpu.pipeline_mode<synchronous>, transform_indices = @transform_5, window_bounds = array<i64: 1, 128>}, {pipeline_mode = #tpu.pipeline_mode<synchronous>, transform_indices = @transform_6, window_bounds = array<i64: 3, 128, 256>}, {pipeline_mode = #tpu.pipeline_mode<synchronous>, transform_indices = @transform_7, window_bounds = array<i64: 1, 256>}, {pipeline_mode = #tpu.pipeline_mode<synchronous>, transform_indices = @transform_8, window_bounds = array<i64: 3, 128, 256>}, {pipeline_mode = #tpu.pipeline_mode<synchronous>, transform_indices = @transform_9, window_bounds = array<i64: 1, 256>}, {pipeline_mode = #tpu.pipeline_mode<synchronous>, transform_indices = @transform_10, window_bounds = array<i64: 3, 256, 256>}, {pipeline_mode = #tpu.pipeline_mode<synchronous>, transform_indices = @transform_11, window_bounds = array<i64: 1, 256>}, {transform_indices = @transform_12, window_bounds = array<i64: 32, 256>}]} {
    %0 = tpu.iota {dimensions = array<i32: 0>} : vector<32x1xi32>
    %c16_i32 = arith.constant 16 : i32
    %c0_i32 = arith.constant 0 : i32
    %1 = arith.cmpi eq, %c16_i32, %c0_i32 : i32
    %c1_i32 = arith.constant 1 : i32
    %2 = arith.select %1, %c1_i32, %c16_i32 : i32
    %3 = vector.broadcast %2 : i32 to vector<32x1xi32>
    %4 = arith.remsi %0, %3 : vector<32x1xi32>
    %c0_i32_0 = arith.constant 0 : i32
    %5 = vector.broadcast %c0_i32_0 : i32 to vector<32x1xi32>
    %6 = arith.cmpi ne, %4, %5 : vector<32x1xi32>
    %c0_i32_1 = arith.constant 0 : i32
    %7 = vector.broadcast %c0_i32_1 : i32 to vector<32x1xi32>
    %8 = arith.cmpi slt, %4, %7 : vector<32x1xi32>
    %c0_i32_2 = arith.constant 0 : i32
    %9 = arith.cmpi slt, %2, %c0_i32_2 : i32
    %10 = vector.broadcast %9 : i1 to vector<32x1xi1>
    %11 = vector.broadcast %10 : vector<32x1xi1> to vector<32x1xi1>
    %12 = arith.xori %8, %11 : vector<32x1xi1>
    %13 = arith.andi %12, %6 : vector<32x1xi1>
    %14 = vector.broadcast %2 : i32 to vector<32x1xi32>
    %15 = arith.addi %4, %14 : vector<32x1xi32>
    %16 = arith.select %13, %15, %4 : vector<32x1xi1>, vector<32x1xi32>
    %c0_i32_3 = arith.constant 0 : i32
    %17 = vector.broadcast %c0_i32_3 : i32 to vector<32x1xi32>
    %18 = arith.cmpi eq, %16, %17 : vector<32x1xi32>
    %c15_i32 = arith.constant 15 : i32
    %19 = vector.broadcast %c15_i32 : i32 to vector<32x1xi32>
    %20 = arith.cmpi eq, %16, %19 : vector<32x1xi32>
    %c0 = arith.constant 0 : index
    %c0_4 = arith.constant 0 : index
    %21 = vector.load %arg1[%c0, %c0_4] : memref<32x64xbf16, #tpu.memory_space<vmem>>, vector<32x64xbf16>
    %c0_5 = arith.constant 0 : index
    %c0_6 = arith.constant 0 : index
    %22 = vector.load %arg2[%c0_5, %c0_6] : memref<16x64xbf16, #tpu.memory_space<vmem>>, vector<16x64xbf16>
    %c0_7 = arith.constant 0 : index
    %c0_8 = arith.constant 0 : index
    %23 = vector.load %arg3[%c0_7, %c0_8] : memref<32x16xbf16, #tpu.memory_space<vmem>>, vector<32x16xbf16>
    %cst = arith.constant dense<0.000000e+00> : vector<32x64xf32>
    %24 = tpu.matmul %23, %22, %cst {dimension_numbers = #tpu.dot_dimension_numbers<[1], [0], [0], [1], [0, 0, 1, 1], [], []>} : vector<32x16xbf16>, vector<16x64xbf16>, vector<32x64xf32> -> vector<32x64xf32>
    %25 = arith.truncf %24 : vector<32x64xf32> to vector<32x64xbf16>
    %c0_9 = arith.constant 0 : index
    %c0_10 = arith.constant 0 : index
    %26 = vector.load %arg4[%c0_9, %c0_10] : memref<64x128xbf16, #tpu.memory_space<vmem>>, vector<64x128xbf16>
    %cst_11 = arith.constant dense<0.000000e+00> : vector<32x128xf32>
    %27 = tpu.matmul %25, %26, %cst_11 {dimension_numbers = #tpu.dot_dimension_numbers<[1], [0], [0], [1], [0, 0, 1, 1], [], []>} : vector<32x64xbf16>, vector<64x128xbf16>, vector<32x128xf32> -> vector<32x128xf32>
    %cst_12 = arith.constant 0.000000e+00 : bf16
    %28 = vector.broadcast %cst_12 : bf16 to vector<1x64xbf16>
    %29 = vector.extract_strided_slice %21 {offsets = [0, 0], sizes = [31, 64], strides = [1, 1]} : vector<32x64xbf16> to vector<31x64xbf16>
    %30 = tpu.concatenate %28, %29 in 0 : vector<1x64xbf16>, vector<31x64xbf16> -> vector<32x64xbf16>
    %31 = vector.extract_strided_slice %21 {offsets = [1, 0], sizes = [31, 64], strides = [1, 1]} : vector<32x64xbf16> to vector<31x64xbf16>
    %32 = tpu.concatenate %31, %28 in 0 : vector<31x64xbf16>, vector<1x64xbf16> -> vector<32x64xbf16>
    %cst_13 = arith.constant 0.000000e+00 : f32
    %33 = arith.truncf %cst_13 : f32 to bf16
    %34 = vector.shape_cast %18 : vector<32x1xi1> to vector<32x1xi1>
    %35 = vector.broadcast %34 : vector<32x1xi1> to vector<32x64xi1>
    %36 = vector.broadcast %33 : bf16 to vector<32x64xbf16>
    %37 = arith.select %35, %36, %30 : vector<32x64xi1>, vector<32x64xbf16>
    %cst_14 = arith.constant 0.000000e+00 : f32
    %38 = arith.truncf %cst_14 : f32 to bf16
    %39 = vector.shape_cast %20 : vector<32x1xi1> to vector<32x1xi1>
    %40 = vector.broadcast %39 : vector<32x1xi1> to vector<32x64xi1>
    %41 = vector.broadcast %38 : bf16 to vector<32x64xbf16>
    %42 = arith.select %40, %41, %32 : vector<32x64xi1>, vector<32x64xbf16>
    %c0_15 = arith.constant 0 : index
    %c0_16 = arith.constant 0 : index
    %c0_17 = arith.constant 0 : index
    %43 = vector.load %arg5[%c0_15, %c0_16, %c0_17] : memref<3x64x128xbf16, #tpu.memory_space<vmem>>, vector<1x64x128xbf16>
    %44 = vector.shape_cast %43 : vector<1x64x128xbf16> to vector<64x128xbf16>
    %cst_18 = arith.constant dense<0.000000e+00> : vector<32x128xf32>
    %45 = tpu.matmul %37, %44, %cst_18 {dimension_numbers = #tpu.dot_dimension_numbers<[1], [0], [0], [1], [0, 0, 1, 1], [], []>} : vector<32x64xbf16>, vector<64x128xbf16>, vector<32x128xf32> -> vector<32x128xf32>
    %c1 = arith.constant 1 : index
    %c0_19 = arith.constant 0 : index
    %c0_20 = arith.constant 0 : index
    %46 = vector.load %arg5[%c1, %c0_19, %c0_20] : memref<3x64x128xbf16, #tpu.memory_space<vmem>>, vector<1x64x128xbf16>
    %47 = vector.shape_cast %46 : vector<1x64x128xbf16> to vector<64x128xbf16>
    %cst_21 = arith.constant dense<0.000000e+00> : vector<32x128xf32>
    %48 = tpu.matmul %21, %47, %cst_21 {dimension_numbers = #tpu.dot_dimension_numbers<[1], [0], [0], [1], [0, 0, 1, 1], [], []>} : vector<32x64xbf16>, vector<64x128xbf16>, vector<32x128xf32> -> vector<32x128xf32>
    %49 = arith.addf %45, %48 : vector<32x128xf32>
    %c2 = arith.constant 2 : index
    %c0_22 = arith.constant 0 : index
    %c0_23 = arith.constant 0 : index
    %50 = vector.load %arg5[%c2, %c0_22, %c0_23] : memref<3x64x128xbf16, #tpu.memory_space<vmem>>, vector<1x64x128xbf16>
    %51 = vector.shape_cast %50 : vector<1x64x128xbf16> to vector<64x128xbf16>
    %cst_24 = arith.constant dense<0.000000e+00> : vector<32x128xf32>
    %52 = tpu.matmul %42, %51, %cst_24 {dimension_numbers = #tpu.dot_dimension_numbers<[1], [0], [0], [1], [0, 0, 1, 1], [], []>} : vector<32x64xbf16>, vector<64x128xbf16>, vector<32x128xf32> -> vector<32x128xf32>
    %53 = arith.addf %49, %52 : vector<32x128xf32>
    %c0_25 = arith.constant 0 : index
    %c0_26 = arith.constant 0 : index
    %54 = vector.load %arg6[%c0_25, %c0_26] : memref<1x128xf32, #tpu.memory_space<vmem>>, vector<1x128xf32>
    %55 = vector.broadcast %54 : vector<1x128xf32> to vector<32x128xf32>
    %56 = arith.addf %53, %55 : vector<32x128xf32>
    %57 = arith.addf %56, %27 : vector<32x128xf32>
    %cst_27 = arith.constant 0.000000e+00 : f32
    %58 = vector.broadcast %cst_27 : f32 to vector<32x128xf32>
    %59 = arith.maximumf %57, %58 : vector<32x128xf32>
    %60 = arith.truncf %59 : vector<32x128xf32> to vector<32x128xbf16>
    %cst_28 = arith.constant 0.000000e+00 : bf16
    %61 = vector.broadcast %cst_28 : bf16 to vector<1x128xbf16>
    %62 = vector.extract_strided_slice %60 {offsets = [0, 0], sizes = [31, 128], strides = [1, 1]} : vector<32x128xbf16> to vector<31x128xbf16>
    %63 = tpu.concatenate %61, %62 in 0 : vector<1x128xbf16>, vector<31x128xbf16> -> vector<32x128xbf16>
    %64 = vector.extract_strided_slice %60 {offsets = [1, 0], sizes = [31, 128], strides = [1, 1]} : vector<32x128xbf16> to vector<31x128xbf16>
    %65 = tpu.concatenate %64, %61 in 0 : vector<31x128xbf16>, vector<1x128xbf16> -> vector<32x128xbf16>
    %cst_29 = arith.constant 0.000000e+00 : f32
    %66 = arith.truncf %cst_29 : f32 to bf16
    %67 = vector.shape_cast %18 : vector<32x1xi1> to vector<32x1xi1>
    %68 = vector.broadcast %67 : vector<32x1xi1> to vector<32x128xi1>
    %69 = vector.broadcast %66 : bf16 to vector<32x128xbf16>
    %70 = arith.select %68, %69, %63 : vector<32x128xi1>, vector<32x128xbf16>
    %cst_30 = arith.constant 0.000000e+00 : f32
    %71 = arith.truncf %cst_30 : f32 to bf16
    %72 = vector.shape_cast %20 : vector<32x1xi1> to vector<32x1xi1>
    %73 = vector.broadcast %72 : vector<32x1xi1> to vector<32x128xi1>
    %74 = vector.broadcast %71 : bf16 to vector<32x128xbf16>
    %75 = arith.select %73, %74, %65 : vector<32x128xi1>, vector<32x128xbf16>
    %c0_31 = arith.constant 0 : index
    %c0_32 = arith.constant 0 : index
    %c0_33 = arith.constant 0 : index
    %76 = vector.load %arg7[%c0_31, %c0_32, %c0_33] : memref<3x128x256xbf16, #tpu.memory_space<vmem>>, vector<1x128x256xbf16>
    %77 = vector.shape_cast %76 : vector<1x128x256xbf16> to vector<128x256xbf16>
    %cst_34 = arith.constant dense<0.000000e+00> : vector<32x256xf32>
    %78 = tpu.matmul %70, %77, %cst_34 {dimension_numbers = #tpu.dot_dimension_numbers<[1], [0], [0], [1], [0, 0, 1, 1], [], []>} : vector<32x128xbf16>, vector<128x256xbf16>, vector<32x256xf32> -> vector<32x256xf32>
    %c1_35 = arith.constant 1 : index
    %c0_36 = arith.constant 0 : index
    %c0_37 = arith.constant 0 : index
    %79 = vector.load %arg7[%c1_35, %c0_36, %c0_37] : memref<3x128x256xbf16, #tpu.memory_space<vmem>>, vector<1x128x256xbf16>
    %80 = vector.shape_cast %79 : vector<1x128x256xbf16> to vector<128x256xbf16>
    %cst_38 = arith.constant dense<0.000000e+00> : vector<32x256xf32>
    %81 = tpu.matmul %60, %80, %cst_38 {dimension_numbers = #tpu.dot_dimension_numbers<[1], [0], [0], [1], [0, 0, 1, 1], [], []>} : vector<32x128xbf16>, vector<128x256xbf16>, vector<32x256xf32> -> vector<32x256xf32>
    %82 = arith.addf %78, %81 : vector<32x256xf32>
    %c2_39 = arith.constant 2 : index
    %c0_40 = arith.constant 0 : index
    %c0_41 = arith.constant 0 : index
    %83 = vector.load %arg7[%c2_39, %c0_40, %c0_41] : memref<3x128x256xbf16, #tpu.memory_space<vmem>>, vector<1x128x256xbf16>
    %84 = vector.shape_cast %83 : vector<1x128x256xbf16> to vector<128x256xbf16>
    %cst_42 = arith.constant dense<0.000000e+00> : vector<32x256xf32>
    %85 = tpu.matmul %75, %84, %cst_42 {dimension_numbers = #tpu.dot_dimension_numbers<[1], [0], [0], [1], [0, 0, 1, 1], [], []>} : vector<32x128xbf16>, vector<128x256xbf16>, vector<32x256xf32> -> vector<32x256xf32>
    %86 = arith.addf %82, %85 : vector<32x256xf32>
    %c0_43 = arith.constant 0 : index
    %c0_44 = arith.constant 0 : index
    %87 = vector.load %arg8[%c0_43, %c0_44] : memref<1x256xf32, #tpu.memory_space<vmem>>, vector<1x256xf32>
    %88 = vector.broadcast %87 : vector<1x256xf32> to vector<32x256xf32>
    %89 = arith.addf %86, %88 : vector<32x256xf32>
    %90 = arith.truncf %57 : vector<32x128xf32> to vector<32x128xbf16>
    %cst_45 = arith.constant 0.000000e+00 : bf16
    %91 = vector.broadcast %cst_45 : bf16 to vector<1x128xbf16>
    %92 = vector.extract_strided_slice %90 {offsets = [0, 0], sizes = [31, 128], strides = [1, 1]} : vector<32x128xbf16> to vector<31x128xbf16>
    %93 = tpu.concatenate %91, %92 in 0 : vector<1x128xbf16>, vector<31x128xbf16> -> vector<32x128xbf16>
    %94 = vector.extract_strided_slice %90 {offsets = [1, 0], sizes = [31, 128], strides = [1, 1]} : vector<32x128xbf16> to vector<31x128xbf16>
    %95 = tpu.concatenate %94, %91 in 0 : vector<31x128xbf16>, vector<1x128xbf16> -> vector<32x128xbf16>
    %cst_46 = arith.constant 0.000000e+00 : f32
    %96 = arith.truncf %cst_46 : f32 to bf16
    %97 = vector.shape_cast %18 : vector<32x1xi1> to vector<32x1xi1>
    %98 = vector.broadcast %97 : vector<32x1xi1> to vector<32x128xi1>
    %99 = vector.broadcast %96 : bf16 to vector<32x128xbf16>
    %100 = arith.select %98, %99, %93 : vector<32x128xi1>, vector<32x128xbf16>
    %cst_47 = arith.constant 0.000000e+00 : f32
    %101 = arith.truncf %cst_47 : f32 to bf16
    %102 = vector.shape_cast %20 : vector<32x1xi1> to vector<32x1xi1>
    %103 = vector.broadcast %102 : vector<32x1xi1> to vector<32x128xi1>
    %104 = vector.broadcast %101 : bf16 to vector<32x128xbf16>
    %105 = arith.select %103, %104, %95 : vector<32x128xi1>, vector<32x128xbf16>
    %c0_48 = arith.constant 0 : index
    %c0_49 = arith.constant 0 : index
    %c0_50 = arith.constant 0 : index
    %106 = vector.load %arg9[%c0_48, %c0_49, %c0_50] : memref<3x128x256xbf16, #tpu.memory_space<vmem>>, vector<1x128x256xbf16>
    %107 = vector.shape_cast %106 : vector<1x128x256xbf16> to vector<128x256xbf16>
    %cst_51 = arith.constant dense<0.000000e+00> : vector<32x256xf32>
    %108 = tpu.matmul %100, %107, %cst_51 {dimension_numbers = #tpu.dot_dimension_numbers<[1], [0], [0], [1], [0, 0, 1, 1], [], []>} : vector<32x128xbf16>, vector<128x256xbf16>, vector<32x256xf32> -> vector<32x256xf32>
    %c1_52 = arith.constant 1 : index
    %c0_53 = arith.constant 0 : index
    %c0_54 = arith.constant 0 : index
    %109 = vector.load %arg9[%c1_52, %c0_53, %c0_54] : memref<3x128x256xbf16, #tpu.memory_space<vmem>>, vector<1x128x256xbf16>
    %110 = vector.shape_cast %109 : vector<1x128x256xbf16> to vector<128x256xbf16>
    %cst_55 = arith.constant dense<0.000000e+00> : vector<32x256xf32>
    %111 = tpu.matmul %90, %110, %cst_55 {dimension_numbers = #tpu.dot_dimension_numbers<[1], [0], [0], [1], [0, 0, 1, 1], [], []>} : vector<32x128xbf16>, vector<128x256xbf16>, vector<32x256xf32> -> vector<32x256xf32>
    %112 = arith.addf %108, %111 : vector<32x256xf32>
    %c2_56 = arith.constant 2 : index
    %c0_57 = arith.constant 0 : index
    %c0_58 = arith.constant 0 : index
    %113 = vector.load %arg9[%c2_56, %c0_57, %c0_58] : memref<3x128x256xbf16, #tpu.memory_space<vmem>>, vector<1x128x256xbf16>
    %114 = vector.shape_cast %113 : vector<1x128x256xbf16> to vector<128x256xbf16>
    %cst_59 = arith.constant dense<0.000000e+00> : vector<32x256xf32>
    %115 = tpu.matmul %105, %114, %cst_59 {dimension_numbers = #tpu.dot_dimension_numbers<[1], [0], [0], [1], [0, 0, 1, 1], [], []>} : vector<32x128xbf16>, vector<128x256xbf16>, vector<32x256xf32> -> vector<32x256xf32>
    %116 = arith.addf %112, %115 : vector<32x256xf32>
    %c0_60 = arith.constant 0 : index
    %c0_61 = arith.constant 0 : index
    %117 = vector.load %arg10[%c0_60, %c0_61] : memref<1x256xf32, #tpu.memory_space<vmem>>, vector<1x256xf32>
    %118 = vector.broadcast %117 : vector<1x256xf32> to vector<32x256xf32>
    %119 = arith.addf %116, %118 : vector<32x256xf32>
    %cst_62 = arith.constant 0.000000e+00 : f32
    %120 = vector.broadcast %cst_62 : f32 to vector<32x256xf32>
    %121 = arith.maximumf %89, %120 : vector<32x256xf32>
    %122 = arith.truncf %121 : vector<32x256xf32> to vector<32x256xbf16>
    %cst_63 = arith.constant 0.000000e+00 : bf16
    %123 = vector.broadcast %cst_63 : bf16 to vector<1x256xbf16>
    %124 = vector.extract_strided_slice %122 {offsets = [0, 0], sizes = [31, 256], strides = [1, 1]} : vector<32x256xbf16> to vector<31x256xbf16>
    %125 = tpu.concatenate %123, %124 in 0 : vector<1x256xbf16>, vector<31x256xbf16> -> vector<32x256xbf16>
    %126 = vector.extract_strided_slice %122 {offsets = [1, 0], sizes = [31, 256], strides = [1, 1]} : vector<32x256xbf16> to vector<31x256xbf16>
    %127 = tpu.concatenate %126, %123 in 0 : vector<31x256xbf16>, vector<1x256xbf16> -> vector<32x256xbf16>
    %cst_64 = arith.constant 0.000000e+00 : f32
    %128 = arith.truncf %cst_64 : f32 to bf16
    %129 = vector.shape_cast %18 : vector<32x1xi1> to vector<32x1xi1>
    %130 = vector.broadcast %129 : vector<32x1xi1> to vector<32x256xi1>
    %131 = vector.broadcast %128 : bf16 to vector<32x256xbf16>
    %132 = arith.select %130, %131, %125 : vector<32x256xi1>, vector<32x256xbf16>
    %cst_65 = arith.constant 0.000000e+00 : f32
    %133 = arith.truncf %cst_65 : f32 to bf16
    %134 = vector.shape_cast %20 : vector<32x1xi1> to vector<32x1xi1>
    %135 = vector.broadcast %134 : vector<32x1xi1> to vector<32x256xi1>
    %136 = vector.broadcast %133 : bf16 to vector<32x256xbf16>
    %137 = arith.select %135, %136, %127 : vector<32x256xi1>, vector<32x256xbf16>
    %c0_66 = arith.constant 0 : index
    %c0_67 = arith.constant 0 : index
    %c0_68 = arith.constant 0 : index
    %138 = vector.load %arg11[%c0_66, %c0_67, %c0_68] : memref<3x256x256xbf16, #tpu.memory_space<vmem>>, vector<1x256x256xbf16>
    %139 = vector.shape_cast %138 : vector<1x256x256xbf16> to vector<256x256xbf16>
    %cst_69 = arith.constant dense<0.000000e+00> : vector<32x256xf32>
    %140 = tpu.matmul %132, %139, %cst_69 {dimension_numbers = #tpu.dot_dimension_numbers<[1], [0], [0], [1], [0, 0, 1, 1], [], []>} : vector<32x256xbf16>, vector<256x256xbf16>, vector<32x256xf32> -> vector<32x256xf32>
    %c1_70 = arith.constant 1 : index
    %c0_71 = arith.constant 0 : index
    %c0_72 = arith.constant 0 : index
    %141 = vector.load %arg11[%c1_70, %c0_71, %c0_72] : memref<3x256x256xbf16, #tpu.memory_space<vmem>>, vector<1x256x256xbf16>
    %142 = vector.shape_cast %141 : vector<1x256x256xbf16> to vector<256x256xbf16>
    %cst_73 = arith.constant dense<0.000000e+00> : vector<32x256xf32>
    %143 = tpu.matmul %122, %142, %cst_73 {dimension_numbers = #tpu.dot_dimension_numbers<[1], [0], [0], [1], [0, 0, 1, 1], [], []>} : vector<32x256xbf16>, vector<256x256xbf16>, vector<32x256xf32> -> vector<32x256xf32>
    %144 = arith.addf %140, %143 : vector<32x256xf32>
    %c2_74 = arith.constant 2 : index
    %c0_75 = arith.constant 0 : index
    %c0_76 = arith.constant 0 : index
    %145 = vector.load %arg11[%c2_74, %c0_75, %c0_76] : memref<3x256x256xbf16, #tpu.memory_space<vmem>>, vector<1x256x256xbf16>
    %146 = vector.shape_cast %145 : vector<1x256x256xbf16> to vector<256x256xbf16>
    %cst_77 = arith.constant dense<0.000000e+00> : vector<32x256xf32>
    %147 = tpu.matmul %137, %146, %cst_77 {dimension_numbers = #tpu.dot_dimension_numbers<[1], [0], [0], [1], [0, 0, 1, 1], [], []>} : vector<32x256xbf16>, vector<256x256xbf16>, vector<32x256xf32> -> vector<32x256xf32>
    %148 = arith.addf %144, %147 : vector<32x256xf32>
    %c0_78 = arith.constant 0 : index
    %c0_79 = arith.constant 0 : index
    %149 = vector.load %arg12[%c0_78, %c0_79] : memref<1x256xf32, #tpu.memory_space<vmem>>, vector<1x256xf32>
    %150 = vector.broadcast %149 : vector<1x256xf32> to vector<32x256xf32>
    %151 = arith.addf %148, %150 : vector<32x256xf32>
    %152 = arith.addf %151, %119 : vector<32x256xf32>
    %c0_80 = arith.constant 0 : index
    %c0_81 = arith.constant 0 : index
    %153 = vector.load %arg13[%c0_80, %c0_81] : memref<32x256xf32, #tpu.memory_space<vmem>>, vector<32x256xf32>
    tpu.vector_store %arg13[%c0_80, %c0_81], %152 {strides = array<i32>} : memref<32x256xf32, #tpu.memory_space<vmem>>, vector<32x256xf32>,
    return
  }
  func.func @transform_0(%arg0: i32) -> (i32, i32) {
    %c0_i32 = arith.constant 0 : i32
    %c0_i32_0 = arith.constant 0 : i32
    return %arg0, %c0_i32 : i32, i32
  }
  func.func @transform_1(%arg0: i32) -> (i32, i32) {
    %c0_i32 = arith.constant 0 : i32
    %c0_i32_0 = arith.constant 0 : i32
    return %arg0, %c0_i32 : i32, i32
  }
  func.func @transform_2(%arg0: i32) -> (i32, i32) {
    %c0_i32 = arith.constant 0 : i32
    %c0_i32_0 = arith.constant 0 : i32
    %c0_i32_1 = arith.constant 0 : i32
    return %c0_i32, %c0_i32_0 : i32, i32
  }
  func.func @transform_3(%arg0: i32) -> (i32, i32) {
    %c0_i32 = arith.constant 0 : i32
    %c0_i32_0 = arith.constant 0 : i32
    %c0_i32_1 = arith.constant 0 : i32
    return %c0_i32, %c0_i32_0 : i32, i32
  }
  func.func @transform_4(%arg0: i32) -> (i32, i32, i32) {
    %c0_i32 = arith.constant 0 : i32
    %c0_i32_0 = arith.constant 0 : i32
    %c0_i32_1 = arith.constant 0 : i32
    %c0_i32_2 = arith.constant 0 : i32
    return %c0_i32, %c0_i32_0, %c0_i32_1 : i32, i32, i32
  }
  func.func @transform_5(%arg0: i32) -> (i32, i32) {
    %c0_i32 = arith.constant 0 : i32
    %c0_i32_0 = arith.constant 0 : i32
    %c0_i32_1 = arith.constant 0 : i32
    return %c0_i32, %c0_i32_0 : i32, i32
  }
  func.func @transform_6(%arg0: i32) -> (i32, i32, i32) {
    %c0_i32 = arith.constant 0 : i32
    %c0_i32_0 = arith.constant 0 : i32
    %c0_i32_1 = arith.constant 0 : i32
    %c0_i32_2 = arith.constant 0 : i32
    return %c0_i32, %c0_i32_0, %c0_i32_1 : i32, i32, i32
  }
  func.func @transform_7(%arg0: i32) -> (i32, i32) {
    %c0_i32 = arith.constant 0 : i32
    %c0_i32_0 = arith.constant 0 : i32
    %c0_i32_1 = arith.constant 0 : i32
    return %c0_i32, %c0_i32_0 : i32, i32
  }
  func.func @transform_8(%arg0: i32) -> (i32, i32, i32) {
    %c0_i32 = arith.constant 0 : i32
    %c0_i32_0 = arith.constant 0 : i32
    %c0_i32_1 = arith.constant 0 : i32
    %c0_i32_2 = arith.constant 0 : i32
    return %c0_i32, %c0_i32_0, %c0_i32_1 : i32, i32, i32
  }
  func.func @transform_9(%arg0: i32) -> (i32, i32) {
    %c0_i32 = arith.constant 0 : i32
    %c0_i32_0 = arith.constant 0 : i32
    %c0_i32_1 = arith.constant 0 : i32
    return %c0_i32, %c0_i32_0 : i32, i32
  }
  func.func @transform_10(%arg0: i32) -> (i32, i32, i32) {
    %c0_i32 = arith.constant 0 : i32
    %c0_i32_0 = arith.constant 0 : i32
    %c0_i32_1 = arith.constant 0 : i32
    %c0_i32_2 = arith.constant 0 : i32
    return %c0_i32, %c0_i32_0, %c0_i32_1 : i32, i32, i32
  }
  func.func @transform_11(%arg0: i32) -> (i32, i32) {
    %c0_i32 = arith.constant 0 : i32
    %c0_i32_0 = arith.constant 0 : i32
    %c0_i32_1 = arith.constant 0 : i32
    return %c0_i32, %c0_i32_0 : i32, i32
  }
  func.func @transform_12(%arg0: i32) -> (i32, i32) {
    %c0_i32 = arith.constant 0 : i32
    %c0_i32_0 = arith.constant 0 : i32
    return %arg0, %c0_i32 : i32, i32
  }
}

module attributes {stable_mosaic.version = 11 : i64} {
  func.func @kernel(%arg0: i32, %arg1: memref<32x64xbf16, #tpu.memory_space<vmem>>, %arg2: memref<16x64xbf16, #tpu.memory_space<vmem>>, %arg3: memref<32x16xbf16, #tpu.memory_space<vmem>>, %arg4: memref<64x128xbf16, #tpu.memory_space<vmem>>, %arg5: memref<3x64x128xbf16, #tpu.memory_space<vmem>>, %arg6: memref<1x128xf32, #tpu.memory_space<vmem>>, %arg7: memref<3x128x256xbf16, #tpu.memory_space<vmem>>, %arg8: memref<1x256xf32, #tpu.memory_space<vmem>>, %arg9: memref<3x128x256xbf16, #tpu.memory_space<vmem>>, %arg10: memref<1x256xf32, #tpu.memory_space<vmem>>, %arg11: memref<3x256x256xbf16, #tpu.memory_space<vmem>>, %arg12: memref<1x256xf32, #tpu.memory_space<vmem>>, %arg13: memref<32x256xf32, #tpu.memory_space<vmem>>) attributes {dimension_semantics = [#tpu.dimension_semantics<parallel>], iteration_bounds = array<i64: 2>, scalar_prefetch = 0 : i64, scratch_operands = 0 : i64, tpu.core_type = #tpu.core_type<tc>, window_params = [{transform_indices = @transform_0, window_bounds = array<i64: 32, 64>}, {transform_indices = @transform_1, window_bounds = array<i64: 16, 64>}, {pipeline_mode = #tpu.pipeline_mode<synchronous>, transform_indices = @transform_2, window_bounds = array<i64: 32, 16>}, {pipeline_mode = #tpu.pipeline_mode<synchronous>, transform_indices = @transform_3, window_bounds = array<i64: 64, 128>}, {pipeline_mode = #tpu.pipeline_mode<synchronous>, transform_indices = @transform_4, window_bounds = array<i64: 3, 64, 128>}, {pipeline_mode = #tpu.pipeline_mode<synchronous>, transform_indices = @transform_5, window_bounds = array<i64: 1, 128>}, {pipeline_mode = #tpu.pipeline_mode<synchronous>, transform_indices = @transform_6, window_bounds = array<i64: 3, 128, 256>}, {pipeline_mode = #tpu.pipeline_mode<synchronous>, transform_indices = @transform_7, window_bounds = array<i64: 1, 256>}, {pipeline_mode = #tpu.pipeline_mode<synchronous>, transform_indices = @transform_8, window_bounds = array<i64: 3, 128, 256>}, {pipeline_mode = #tpu.pipeline_mode<synchronous>, transform_indices = @transform_9, window_bounds = array<i64: 1, 256>}, {pipeline_mode = #tpu.pipeline_mode<synchronous>, transform_indices = @transform_10, window_bounds = array<i64: 3, 256, 256>}, {pipeline_mode = #tpu.pipeline_mode<synchronous>, transform_indices = @transform_11, window_bounds = array<i64: 1, 256>}, {transform_indices = @transform_12, window_bounds = array<i64: 32, 256>}]} {
    %0 = tpu.iota {dimensions = array<i32: 0>} : vector<32x1xi32>
    %c16_i32 = arith.constant 16 : i32
    %c0_i32 = arith.constant 0 : i32
    %1 = arith.cmpi eq, %c16_i32, %c0_i32 : i32
    %c1_i32 = arith.constant 1 : i32
    %2 = arith.select %1, %c1_i32, %c16_i32 : i32
    %3 = vector.broadcast %2 : i32 to vector<32x1xi32>
    %4 = arith.remsi %0, %3 : vector<32x1xi32>
    %c0_i32_0 = arith.constant 0 : i32
    %5 = vector.broadcast %c0_i32_0 : i32 to vector<32x1xi32>
    %6 = arith.cmpi ne, %4, %5 : vector<32x1xi32>
    %c0_i32_1 = arith.constant 0 : i32
    %7 = vector.broadcast %c0_i32_1 : i32 to vector<32x1xi32>
    %8 = arith.cmpi slt, %4, %7 : vector<32x1xi32>
    %c0_i32_2 = arith.constant 0 : i32
    %9 = arith.cmpi slt, %2, %c0_i32_2 : i32
    %10 = vector.broadcast %9 : i1 to vector<32x1xi1>
    %11 = vector.broadcast %10 : vector<32x1xi1> to vector<32x1xi1>
    %12 = arith.xori %8, %11 : vector<32x1xi1>
    %13 = arith.andi %12, %6 : vector<32x1xi1>
    %14 = vector.broadcast %2 : i32 to vector<32x1xi32>
    %15 = arith.addi %4, %14 : vector<32x1xi32>
    %16 = arith.select %13, %15, %4 : vector<32x1xi1>, vector<32x1xi32>
    %c0_i32_3 = arith.constant 0 : i32
    %17 = vector.broadcast %c0_i32_3 : i32 to vector<32x1xi32>
    %18 = arith.cmpi eq, %16, %17 : vector<32x1xi32>
    %c15_i32 = arith.constant 15 : i32
    %19 = vector.broadcast %c15_i32 : i32 to vector<32x1xi32>
    %20 = arith.cmpi eq, %16, %19 : vector<32x1xi32>
    %c0 = arith.constant 0 : index
    %c0_4 = arith.constant 0 : index
    %21 = vector.load %arg1[%c0, %c0_4] : memref<32x64xbf16, #tpu.memory_space<vmem>>, vector<32x64xbf16>
    %c0_5 = arith.constant 0 : index
    %c0_6 = arith.constant 0 : index
    %22 = vector.load %arg2[%c0_5, %c0_6] : memref<16x64xbf16, #tpu.memory_space<vmem>>, vector<16x64xbf16>
    %c0_7 = arith.constant 0 : index
    %c0_8 = arith.constant 0 : index
    %23 = vector.load %arg3[%c0_7, %c0_8] : memref<32x16xbf16, #tpu.memory_space<vmem>>, vector<32x16xbf16>
    %cst = arith.constant dense<0.000000e+00> : vector<32x64xf32>
    %24 = tpu.matmul %23, %22, %cst {dimension_numbers = #tpu.dot_dimension_numbers<[1], [0], [0], [1], [0, 0, 1, 1], [], []>} : vector<32x16xbf16>, vector<16x64xbf16>, vector<32x64xf32> -> vector<32x64xf32>
    %25 = arith.truncf %24 : vector<32x64xf32> to vector<32x64xbf16>
    %c0_9 = arith.constant 0 : index
    %c0_10 = arith.constant 0 : index
    %26 = vector.load %arg4[%c0_9, %c0_10] : memref<64x128xbf16, #tpu.memory_space<vmem>>, vector<64x128xbf16>
    %cst_11 = arith.constant dense<0.000000e+00> : vector<32x128xf32>
    %27 = tpu.matmul %25, %26, %cst_11 {dimension_numbers = #tpu.dot_dimension_numbers<[1], [0], [0], [1], [0, 0, 1, 1], [], []>} : vector<32x64xbf16>, vector<64x128xbf16>, vector<32x128xf32> -> vector<32x128xf32>
    %cst_12 = arith.constant 0.000000e+00 : bf16
    %28 = vector.broadcast %cst_12 : bf16 to vector<1x64xbf16>
    %29 = vector.extract_strided_slice %21 {offsets = [0, 0], sizes = [31, 64], strides = [1, 1]} : vector<32x64xbf16> to vector<31x64xbf16>
    %30 = tpu.concatenate %28, %29 in 0 : vector<1x64xbf16>, vector<31x64xbf16> -> vector<32x64xbf16>
    %31 = vector.extract_strided_slice %21 {offsets = [1, 0], sizes = [31, 64], strides = [1, 1]} : vector<32x64xbf16> to vector<31x64xbf16>
    %32 = tpu.concatenate %31, %28 in 0 : vector<31x64xbf16>, vector<1x64xbf16> -> vector<32x64xbf16>
    %cst_13 = arith.constant 0.000000e+00 : f32
    %33 = arith.truncf %cst_13 : f32 to bf16
    %34 = vector.shape_cast %18 : vector<32x1xi1> to vector<32x1xi1>
    %35 = vector.broadcast %34 : vector<32x1xi1> to vector<32x64xi1>
    %36 = vector.broadcast %33 : bf16 to vector<32x64xbf16>
    %37 = arith.select %35, %36, %30 : vector<32x64xi1>, vector<32x64xbf16>
    %cst_14 = arith.constant 0.000000e+00 : f32
    %38 = arith.truncf %cst_14 : f32 to bf16
    %39 = vector.shape_cast %20 : vector<32x1xi1> to vector<32x1xi1>
    %40 = vector.broadcast %39 : vector<32x1xi1> to vector<32x64xi1>
    %41 = vector.broadcast %38 : bf16 to vector<32x64xbf16>
    %42 = arith.select %40, %41, %32 : vector<32x64xi1>, vector<32x64xbf16>
    %c0_15 = arith.constant 0 : index
    %c0_16 = arith.constant 0 : index
    %c0_17 = arith.constant 0 : index
    %43 = vector.load %arg5[%c0_15, %c0_16, %c0_17] : memref<3x64x128xbf16, #tpu.memory_space<vmem>>, vector<1x64x128xbf16>
    %44 = vector.shape_cast %43 : vector<1x64x128xbf16> to vector<64x128xbf16>
    %cst_18 = arith.constant dense<0.000000e+00> : vector<32x128xf32>
    %45 = tpu.matmul %37, %44, %cst_18 {dimension_numbers = #tpu.dot_dimension_numbers<[1], [0], [0], [1], [0, 0, 1, 1], [], []>} : vector<32x64xbf16>, vector<64x128xbf16>, vector<32x128xf32> -> vector<32x128xf32>
    %c1 = arith.constant 1 : index
    %c0_19 = arith.constant 0 : index
    %c0_20 = arith.constant 0 : index
    %46 = vector.load %arg5[%c1, %c0_19, %c0_20] : memref<3x64x128xbf16, #tpu.memory_space<vmem>>, vector<1x64x128xbf16>
    %47 = vector.shape_cast %46 : vector<1x64x128xbf16> to vector<64x128xbf16>
    %cst_21 = arith.constant dense<0.000000e+00> : vector<32x128xf32>
    %48 = tpu.matmul %21, %47, %cst_21 {dimension_numbers = #tpu.dot_dimension_numbers<[1], [0], [0], [1], [0, 0, 1, 1], [], []>} : vector<32x64xbf16>, vector<64x128xbf16>, vector<32x128xf32> -> vector<32x128xf32>
    %49 = arith.addf %45, %48 : vector<32x128xf32>
    %c2 = arith.constant 2 : index
    %c0_22 = arith.constant 0 : index
    %c0_23 = arith.constant 0 : index
    %50 = vector.load %arg5[%c2, %c0_22, %c0_23] : memref<3x64x128xbf16, #tpu.memory_space<vmem>>, vector<1x64x128xbf16>
    %51 = vector.shape_cast %50 : vector<1x64x128xbf16> to vector<64x128xbf16>
    %cst_24 = arith.constant dense<0.000000e+00> : vector<32x128xf32>
    %52 = tpu.matmul %42, %51, %cst_24 {dimension_numbers = #tpu.dot_dimension_numbers<[1], [0], [0], [1], [0, 0, 1, 1], [], []>} : vector<32x64xbf16>, vector<64x128xbf16>, vector<32x128xf32> -> vector<32x128xf32>
    %53 = arith.addf %49, %52 : vector<32x128xf32>
    %c0_25 = arith.constant 0 : index
    %c0_26 = arith.constant 0 : index
    %54 = vector.load %arg6[%c0_25, %c0_26] : memref<1x128xf32, #tpu.memory_space<vmem>>, vector<1x128xf32>
    %55 = vector.broadcast %54 : vector<1x128xf32> to vector<32x128xf32>
    %56 = arith.addf %53, %55 : vector<32x128xf32>
    %57 = arith.addf %56, %27 : vector<32x128xf32>
    %cst_27 = arith.constant 0.000000e+00 : f32
    %58 = vector.broadcast %cst_27 : f32 to vector<32x128xf32>
    %59 = arith.maximumf %57, %58 : vector<32x128xf32>
    %60 = arith.truncf %59 : vector<32x128xf32> to vector<32x128xbf16>
    %cst_28 = arith.constant 0.000000e+00 : bf16
    %61 = vector.broadcast %cst_28 : bf16 to vector<1x128xbf16>
    %62 = vector.extract_strided_slice %60 {offsets = [0, 0], sizes = [31, 128], strides = [1, 1]} : vector<32x128xbf16> to vector<31x128xbf16>
    %63 = tpu.concatenate %61, %62 in 0 : vector<1x128xbf16>, vector<31x128xbf16> -> vector<32x128xbf16>
    %64 = vector.extract_strided_slice %60 {offsets = [1, 0], sizes = [31, 128], strides = [1, 1]} : vector<32x128xbf16> to vector<31x128xbf16>
    %65 = tpu.concatenate %64, %61 in 0 : vector<31x128xbf16>, vector<1x128xbf16> -> vector<32x128xbf16>
    %cst_29 = arith.constant 0.000000e+00 : f32
    %66 = arith.truncf %cst_29 : f32 to bf16
    %67 = vector.shape_cast %18 : vector<32x1xi1> to vector<32x1xi1>
    %68 = vector.broadcast %67 : vector<32x1xi1> to vector<32x128xi1>
    %69 = vector.broadcast %66 : bf16 to vector<32x128xbf16>
    %70 = arith.select %68, %69, %63 : vector<32x128xi1>, vector<32x128xbf16>
    %cst_30 = arith.constant 0.000000e+00 : f32
    %71 = arith.truncf %cst_30 : f32 to bf16
    %72 = vector.shape_cast %20 : vector<32x1xi1> to vector<32x1xi1>
    %73 = vector.broadcast %72 : vector<32x1xi1> to vector<32x128xi1>
    %74 = vector.broadcast %71 : bf16 to vector<32x128xbf16>
    %75 = arith.select %73, %74, %65 : vector<32x128xi1>, vector<32x128xbf16>
    %c0_31 = arith.constant 0 : index
    %c0_32 = arith.constant 0 : index
    %c0_33 = arith.constant 0 : index
    %76 = vector.load %arg7[%c0_31, %c0_32, %c0_33] : memref<3x128x256xbf16, #tpu.memory_space<vmem>>, vector<1x128x256xbf16>
    %77 = vector.shape_cast %76 : vector<1x128x256xbf16> to vector<128x256xbf16>
    %cst_34 = arith.constant dense<0.000000e+00> : vector<32x256xf32>
    %78 = tpu.matmul %70, %77, %cst_34 {dimension_numbers = #tpu.dot_dimension_numbers<[1], [0], [0], [1], [0, 0, 1, 1], [], []>} : vector<32x128xbf16>, vector<128x256xbf16>, vector<32x256xf32> -> vector<32x256xf32>
    %c1_35 = arith.constant 1 : index
    %c0_36 = arith.constant 0 : index
    %c0_37 = arith.constant 0 : index
    %79 = vector.load %arg7[%c1_35, %c0_36, %c0_37] : memref<3x128x256xbf16, #tpu.memory_space<vmem>>, vector<1x128x256xbf16>
    %80 = vector.shape_cast %79 : vector<1x128x256xbf16> to vector<128x256xbf16>
    %cst_38 = arith.constant dense<0.000000e+00> : vector<32x256xf32>
    %81 = tpu.matmul %60, %80, %cst_38 {dimension_numbers = #tpu.dot_dimension_numbers<[1], [0], [0], [1], [0, 0, 1, 1], [], []>} : vector<32x128xbf16>, vector<128x256xbf16>, vector<32x256xf32> -> vector<32x256xf32>
    %82 = arith.addf %78, %81 : vector<32x256xf32>
    %c2_39 = arith.constant 2 : index
    %c0_40 = arith.constant 0 : index
    %c0_41 = arith.constant 0 : index
    %83 = vector.load %arg7[%c2_39, %c0_40, %c0_41] : memref<3x128x256xbf16, #tpu.memory_space<vmem>>, vector<1x128x256xbf16>
    %84 = vector.shape_cast %83 : vector<1x128x256xbf16> to vector<128x256xbf16>
    %cst_42 = arith.constant dense<0.000000e+00> : vector<32x256xf32>
    %85 = tpu.matmul %75, %84, %cst_42 {dimension_numbers = #tpu.dot_dimension_numbers<[1], [0], [0], [1], [0, 0, 1, 1], [], []>} : vector<32x128xbf16>, vector<128x256xbf16>, vector<32x256xf32> -> vector<32x256xf32>
    %86 = arith.addf %82, %85 : vector<32x256xf32>
    %c0_43 = arith.constant 0 : index
    %c0_44 = arith.constant 0 : index
    %87 = vector.load %arg8[%c0_43, %c0_44] : memref<1x256xf32, #tpu.memory_space<vmem>>, vector<1x256xf32>
    %88 = vector.broadcast %87 : vector<1x256xf32> to vector<32x256xf32>
    %89 = arith.addf %86, %88 : vector<32x256xf32>
    %90 = arith.truncf %57 : vector<32x128xf32> to vector<32x128xbf16>
    %cst_45 = arith.constant 0.000000e+00 : bf16
    %91 = vector.broadcast %cst_45 : bf16 to vector<1x128xbf16>
    %92 = vector.extract_strided_slice %90 {offsets = [0, 0], sizes = [31, 128], strides = [1, 1]} : vector<32x128xbf16> to vector<31x128xbf16>
    %93 = tpu.concatenate %91, %92 in 0 : vector<1x128xbf16>, vector<31x128xbf16> -> vector<32x128xbf16>
    %94 = vector.extract_strided_slice %90 {offsets = [1, 0], sizes = [31, 128], strides = [1, 1]} : vector<32x128xbf16> to vector<31x128xbf16>
    %95 = tpu.concatenate %94, %91 in 0 : vector<31x128xbf16>, vector<1x128xbf16> -> vector<32x128xbf16>
    %cst_46 = arith.constant 0.000000e+00 : f32
    %96 = arith.truncf %cst_46 : f32 to bf16
    %97 = vector.shape_cast %18 : vector<32x1xi1> to vector<32x1xi1>
    %98 = vector.broadcast %97 : vector<32x1xi1> to vector<32x128xi1>
    %99 = vector.broadcast %96 : bf16 to vector<32x128xbf16>
    %100 = arith.select %98, %99, %93 : vector<32x128xi1>, vector<32x128xbf16>
    %cst_47 = arith.constant 0.000000e+00 : f32
    %101 = arith.truncf %cst_47 : f32 to bf16
    %102 = vector.shape_cast %20 : vector<32x1xi1> to vector<32x1xi1>
    %103 = vector.broadcast %102 : vector<32x1xi1> to vector<32x128xi1>
    %104 = vector.broadcast %101 : bf16 to vector<32x128xbf16>
    %105 = arith.select %103, %104, %95 : vector<32x128xi1>, vector<32x128xbf16>
    %c0_48 = arith.constant 0 : index
    %c0_49 = arith.constant 0 : index
    %c0_50 = arith.constant 0 : index
    %106 = vector.load %arg9[%c0_48, %c0_49, %c0_50] : memref<3x128x256xbf16, #tpu.memory_space<vmem>>, vector<1x128x256xbf16>
    %107 = vector.shape_cast %106 : vector<1x128x256xbf16> to vector<128x256xbf16>
    %cst_51 = arith.constant dense<0.000000e+00> : vector<32x256xf32>
    %108 = tpu.matmul %100, %107, %cst_51 {dimension_numbers = #tpu.dot_dimension_numbers<[1], [0], [0], [1], [0, 0, 1, 1], [], []>} : vector<32x128xbf16>, vector<128x256xbf16>, vector<32x256xf32> -> vector<32x256xf32>
    %c1_52 = arith.constant 1 : index
    %c0_53 = arith.constant 0 : index
    %c0_54 = arith.constant 0 : index
    %109 = vector.load %arg9[%c1_52, %c0_53, %c0_54] : memref<3x128x256xbf16, #tpu.memory_space<vmem>>, vector<1x128x256xbf16>
    %110 = vector.shape_cast %109 : vector<1x128x256xbf16> to vector<128x256xbf16>
    %cst_55 = arith.constant dense<0.000000e+00> : vector<32x256xf32>
    %111 = tpu.matmul %90, %110, %cst_55 {dimension_numbers = #tpu.dot_dimension_numbers<[1], [0], [0], [1], [0, 0, 1, 1], [], []>} : vector<32x128xbf16>, vector<128x256xbf16>, vector<32x256xf32> -> vector<32x256xf32>
    %112 = arith.addf %108, %111 : vector<32x256xf32>
    %c2_56 = arith.constant 2 : index
    %c0_57 = arith.constant 0 : index
    %c0_58 = arith.constant 0 : index
    %113 = vector.load %arg9[%c2_56, %c0_57, %c0_58] : memref<3x128x256xbf16, #tpu.memory_space<vmem>>, vector<1x128x256xbf16>
    %114 = vector.shape_cast %113 : vector<1x128x256xbf16> to vector<128x256xbf16>
    %cst_59 = arith.constant dense<0.000000e+00> : vector<32x256xf32>
    %115 = tpu.matmul %105, %114, %cst_59 {dimension_numbers = #tpu.dot_dimension_numbers<[1], [0], [0], [1], [0, 0, 1, 1], [], []>} : vector<32x128xbf16>, vector<128x256xbf16>, vector<32x256xf32> -> vector<32x256xf32>
    %116 = arith.addf %112, %115 : vector<32x256xf32>
    %c0_60 = arith.constant 0 : index
    %c0_61 = arith.constant 0 : index
    %117 = vector.load %arg10[%c0_60, %c0_61] : memref<1x256xf32, #tpu.memory_space<vmem>>, vector<1x256xf32>
    %118 = vector.broadcast %117 : vector<1x256xf32> to vector<32x256xf32>
    %119 = arith.addf %116, %118 : vector<32x256xf32>
    %cst_62 = arith.constant 0.000000e+00 : f32
    %120 = vector.broadcast %cst_62 : f32 to vector<32x256xf32>
    %121 = arith.maximumf %89, %120 : vector<32x256xf32>
    %122 = arith.truncf %121 : vector<32x256xf32> to vector<32x256xbf16>
    %cst_63 = arith.constant 0.000000e+00 : bf16
    %123 = vector.broadcast %cst_63 : bf16 to vector<1x256xbf16>
    %124 = vector.extract_strided_slice %122 {offsets = [0, 0], sizes = [31, 256], strides = [1, 1]} : vector<32x256xbf16> to vector<31x256xbf16>
    %125 = tpu.concatenate %123, %124 in 0 : vector<1x256xbf16>, vector<31x256xbf16> -> vector<32x256xbf16>
    %126 = vector.extract_strided_slice %122 {offsets = [1, 0], sizes = [31, 256], strides = [1, 1]} : vector<32x256xbf16> to vector<31x256xbf16>
    %127 = tpu.concatenate %126, %123 in 0 : vector<31x256xbf16>, vector<1x256xbf16> -> vector<32x256xbf16>
    %cst_64 = arith.constant 0.000000e+00 : f32
    %128 = arith.truncf %cst_64 : f32 to bf16
    %129 = vector.shape_cast %18 : vector<32x1xi1> to vector<32x1xi1>
    %130 = vector.broadcast %129 : vector<32x1xi1> to vector<32x256xi1>
    %131 = vector.broadcast %128 : bf16 to vector<32x256xbf16>
    %132 = arith.select %130, %131, %125 : vector<32x256xi1>, vector<32x256xbf16>
    %cst_65 = arith.constant 0.000000e+00 : f32
    %133 = arith.truncf %cst_65 : f32 to bf16
    %134 = vector.shape_cast %20 : vector<32x1xi1> to vector<32x1xi1>
    %135 = vector.broadcast %134 : vector<32x1xi1> to vector<32x256xi1>
    %136 = vector.broadcast %133 : bf16 to vector<32x256xbf16>
    %137 = arith.select %135, %136, %127 : vector<32x256xi1>, vector<32x256xbf16>
    %c0_66 = arith.constant 0 : index
    %c0_67 = arith.constant 0 : index
    %c0_68 = arith.constant 0 : index
    %138 = vector.load %arg11[%c0_66, %c0_67, %c0_68] : memref<3x256x256xbf16, #tpu.memory_space<vmem>>, vector<1x256x256xbf16>
    %139 = vector.shape_cast %138 : vector<1x256x256xbf16> to vector<256x256xbf16>
    %cst_69 = arith.constant dense<0.000000e+00> : vector<32x256xf32>
    %140 = tpu.matmul %132, %139, %cst_69 {dimension_numbers = #tpu.dot_dimension_numbers<[1], [0], [0], [1], [0, 0, 1, 1], [], []>} : vector<32x256xbf16>, vector<256x256xbf16>, vector<32x256xf32> -> vector<32x256xf32>
    %c1_70 = arith.constant 1 : index
    %c0_71 = arith.constant 0 : index
    %c0_72 = arith.constant 0 : index
    %141 = vector.load %arg11[%c1_70, %c0_71, %c0_72] : memref<3x256x256xbf16, #tpu.memory_space<vmem>>, vector<1x256x256xbf16>
    %142 = vector.shape_cast %141 : vector<1x256x256xbf16> to vector<256x256xbf16>
    %cst_73 = arith.constant dense<0.000000e+00> : vector<32x256xf32>
    %143 = tpu.matmul %122, %142, %cst_73 {dimension_numbers = #tpu.dot_dimension_numbers<[1], [0], [0], [1], [0, 0, 1, 1], [], []>} : vector<32x256xbf16>, vector<256x256xbf16>, vector<32x256xf32> -> vector<32x256xf32>
    %144 = arith.addf %140, %143 : vector<32x256xf32>
    %c2_74 = arith.constant 2 : index
    %c0_75 = arith.constant 0 : index
    %c0_76 = arith.constant 0 : index
    %145 = vector.load %arg11[%c2_74, %c0_75, %c0_76] : memref<3x256x256xbf16, #tpu.memory_space<vmem>>, vector<1x256x256xbf16>
    %146 = vector.shape_cast %145 : vector<1x256x256xbf16> to vector<256x256xbf16>
    %cst_77 = arith.constant dense<0.000000e+00> : vector<32x256xf32>
    %147 = tpu.matmul %137, %146, %cst_77 {dimension_numbers = #tpu.dot_dimension_numbers<[1], [0], [0], [1], [0, 0, 1, 1], [], []>} : vector<32x256xbf16>, vector<256x256xbf16>, vector<32x256xf32> -> vector<32x256xf32>
    %148 = arith.addf %144, %147 : vector<32x256xf32>
    %c0_78 = arith.constant 0 : index
    %c0_79 = arith.constant 0 : index
    %149 = vector.load %arg12[%c0_78, %c0_79] : memref<1x256xf32, #tpu.memory_space<vmem>>, vector<1x256xf32>
    %150 = vector.broadcast %149 : vector<1x256xf32> to vector<32x256xf32>
    %151 = arith.addf %148, %150 : vector<32x256xf32>
    %152 = arith.addf %151, %119 : vector<32x256xf32>
    %c0_80 = arith.constant 0 : index
    %c0_81 = arith.constant 0 : index
    %153 = vector.load %arg13[%c0_80, %c0_81] : memref<32x256xf32, #tpu.memory_space<vmem>>, vector<32x256xf32>
    tpu.vector_store %arg13[%c0_80, %c0_81], %152 {strides = array<i32>} : memref<32x256xf32, #tpu.memory_space<vmem>>, vector<32x256xf32>,
    return
  }
  func.func @transform_0(%arg0: i32) -> (i32, i32) {
    %c0_i32 = arith.constant 0 : i32
    %c0_i32_0 = arith.constant 0 : i32
    return %arg0, %c0_i32 : i32, i32
  }
  func.func @transform_1(%arg0: i32) -> (i32, i32) {
    %c0_i32 = arith.constant 0 : i32
    %c0_i32_0 = arith.constant 0 : i32
    return %arg0, %c0_i32 : i32, i32
  }
  func.func @transform_2(%arg0: i32) -> (i32, i32) {
    %c0_i32 = arith.constant 0 : i32
    %c0_i32_0 = arith.constant 0 : i32
    %c0_i32_1 = arith.constant 0 : i32
    return %c0_i32, %c0_i32_0 : i32, i32
  }
  func.func @transform_3(%arg0: i32) -> (i32, i32) {
    %c0_i32 = arith.constant 0 : i32
    %c0_i32_0 = arith.constant 0 : i32
    %c0_i32_1 = arith.constant 0 : i32
    return %c0_i32, %c0_i32_0 : i32, i32
  }
  func.func @transform_4(%arg0: i32) -> (i32, i32, i32) {
    %c0_i32 = arith.constant 0 : i32
    %c0_i32_0 = arith.constant 0 : i32
    %c0_i32_1 = arith.constant 0 : i32
    %c0_i32_2 = arith.constant 0 : i32
    return %c0_i32, %c0_i32_0, %c0_i32_1 : i32, i32, i32
  }
  func.func @transform_5(%arg0: i32) -> (i32, i32) {
    %c0_i32 = arith.constant 0 : i32
    %c0_i32_0 = arith.constant 0 : i32
    %c0_i32_1 = arith.constant 0 : i32
    return %c0_i32, %c0_i32_0 : i32, i32
  }
  func.func @transform_6(%arg0: i32) -> (i32, i32, i32) {
    %c0_i32 = arith.constant 0 : i32
    %c0_i32_0 = arith.constant 0 : i32
    %c0_i32_1 = arith.constant 0 : i32
    %c0_i32_2 = arith.constant 0 : i32
    return %c0_i32, %c0_i32_0, %c0_i32_1 : i32, i32, i32
  }
  func.func @transform_7(%arg0: i32) -> (i32, i32) {
    %c0_i32 = arith.constant 0 : i32
    %c0_i32_0 = arith.constant 0 : i32
    %c0_i32_1 = arith.constant 0 : i32
    return %c0_i32, %c0_i32_0 : i32, i32
  }
  func.func @transform_8(%arg0: i32) -> (i32, i32, i32) {
    %c0_i32 = arith.constant 0 : i32
    %c0_i32_0 = arith.constant 0 : i32
    %c0_i32_1 = arith.constant 0 : i32
    %c0_i32_2 = arith.constant 0 : i32
    return %c0_i32, %c0_i32_0, %c0_i32_1 : i32, i32, i32
  }
  func.func @transform_9(%arg0: i32) -> (i32, i32) {
    %c0_i32 = arith.constant 0 : i32
    %c0_i32_0 = arith.constant 0 : i32
    %c0_i32_1 = arith.constant 0 : i32
    return %c0_i32, %c0_i32_0 : i32, i32
  }
  func.func @transform_10(%arg0: i32) -> (i32, i32, i32) {
    %c0_i32 = arith.constant 0 : i32
    %c0_i32_0 = arith.constant 0 : i32
    %c0_i32_1 = arith.constant 0 : i32
    %c0_i32_2 = arith.constant 0 : i32
    return %c0_i32, %c0_i32_0, %c0_i32_1 : i32, i32, i32
  }
  func.func @transform_11(%arg0: i32) -> (i32, i32) {
    %c0_i32 = arith.constant 0 : i32
    %c0_i32_0 = arith.constant 0 : i32
    %c0_i32_1 = arith.constant 0 : i32
    return %c0_i32, %c0_i32_0 : i32, i32
  }
  func.func @transform_12(%arg0: i32) -> (i32, i32) {
    %c0_i32 = arith.constant 0 : i32
    %c0_i32_0 = arith.constant 0 : i32
    return %arg0, %c0_i32 : i32, i32
  }
}

</mosaic_0001>

<bundles_post_ra>
// kernel: upsample_block_forward.1
= control target key start
LH: loop header
LB: loop body
LE: loop exit
PB: predicated region body
PF: predicated region fallthrough
CT: control target
= control target key end

     0   :  { %17 = vsyncpa [#allocation3], 0  ;;  %s4254_s21 = smov 0   ;;  %s5690_s0 = inlined_call_operand.vmem [shape: bf16[64,64], index: 0, kind: input, shape index: {}]   ;;  %s5691_s1 = inlined_call_operand.vmem [shape: bf16[32,64], index: 1, kind: input, shape index: {}]   ;;  %s5692_s2 = inlined_call_operand.vmem [shape: bf16[32,16], index: 2, kind: input, shape index: {}]   ;;  %s5693_s3 = inlined_call_operand.vmem [shape: bf16[64,128], index: 3, kind: input, shape index: {}]   ;;  %s5694_s4 = inlined_call_operand.vmem [shape: bf16[3,64,128], index: 4, kind: input, shape index: {}]   ;;  %s5695_s5 = inlined_call_operand.vmem [shape: f32[1,128], index: 5, kind: input, shape index: {}]   ;;  %s5696_s6 = inlined_call_operand.vmem [shape: bf16[3,128,256], index: 6, kind: input, shape index: {}]   ;;  %s5697_s7 = inlined_call_operand.vmem [shape: f32[1,256], index: 7, kind: input, shape index: {}]   ;;  %s5698_s8 = inlined_call_operand.hbm [shape: bf16[3,128,256], index: 8, kind: input, shape index: {}]   ;;  %s5699_s9 = inlined_call_operand.vmem [shape: f32[1,256], index: 9, kind: input, shape index: {}]   ;;  %s5700_s10 = inlined_call_operand.vmem [shape: bf16[3,256,256], index: 10, kind: input, shape index: {}]   ;;  %s5701_s11 = inlined_call_operand.vmem [shape: f32[1,256], index: 11, kind: input, shape index: {}]   ;;  %s5702_s12 = inlined_call_operand.vmem [shape: f32[64,256], index: 12, kind: output, shape index: {}]  }
   0x1 LB: > { %s345_s24 = sshll.u32 %s5698_s8, 4  ;;  %s2905_s25 = sadd.s32 4294967295, %s4182_s21   ;;  %s4182_s21 = sphi %s4254_s21, %s23_s21   ;;  %s346_s24 = int_to_ptr.hbm [resolvable:$true] %s345_s24 }
   0x2   : > { %p2907_p0 = scmp.ge.s32.totalorder %s4182_s21, 1  ;;  %p316_p1 = scmp.lt.s32.totalorder %s4182_s21, 3 }
   0x3   : > { %p4126_p2 = scmp.eq.s32.totalorder %s2905_s25, 0  ;;  %s4184_s26 = smov [#allocation2]  }
   0x4   : > { %p317_p3 = pnand %p2907_p0, %p316_p1  ;;  %s347_s27 = sshll.u32 %s4184_s26, 4  ;;  %s348_s27 = int_to_ptr.vmem [resolvable:$true] %s347_s27 }
   0x5   : > { %s4185_s28 = smov 128   ;;  %s4186_s29 = smov 8  }
   0x6   : > { %p4122_p4 = pneg %p317_p3  ;;  %390 = sbr.rel (%p317_p3) target bundleno = 716 (0x2cc), region = 68 }
   0x8   : > { %p4123_p5 = pnand %p4126_p2, %p4122_p4 }
   0xa   : > { %4125 = dma.hbm_to_vmem [thread:$0]  (!%p4123_p5), %s346_s24, 6144, %s348_s27, [#allocation3], %s4185_s28, %s4185_s28, %s4186_s29  }
   0xb   : > { %4177 = dma.done.wait (%p4126_p2), [#allocation3], 6144  }
   0xc   : > { %4179 = vsyncadd (%p4126_p2), [#allocation3], 4294961152  ;;  %s2914_s30 = sshll.u32 %s2905_s25, 1  ;;  %s2912_s13 = sshll.u32 %s2905_s25, 2  ;;  %v461_v0 = vlaneseq  ;;  %vm4187_vm0 = vmmov 0   ;;  %v4188_v4 = vmov 0  }
   0xd   : > { %p446_p6 = scmp.lt.s32.totalorder %s2914_s30, 3  ;;  %p440_p7 = scmp.lt.s32.totalorder %s2912_s13, 7  ;;  %vm685_vm1 = vmpackc.low %vm4187_vm0, %vm4187_vm0  ;;  %v3907_v8 = vld [vmem:[%s5692_s2] sm:$0xff]  ;;  %v3908_v9 = vld [vmem:[%s5692_s2 + $0x8] sm:$0xff]  ;;  %vm548_vm2 = vcmask 130048   ;;  %v4316_v21 = vunpack.c.h.b16 %v4188_v4  ;;  %vm662_vm7 = vcmask 1040384   ;;  %v4335_v30 = vunpack.c.l.b16 %v4188_v4 }
   0xe   : > { %v4265_v1 = vshrl.u32 %v461_v0, 7  ;;  %v689_v5 = vsel %vm685_vm1, 65537, %v4188_v4  ;;  %v3920_v10 = vld [vmem:[%s5694_s4 + $0x38] sm:$0xff]  ;;  %v3919_v14 = vld [vmem:[%s5694_s4 + $0x30] sm:$0xff]  ;;  %vm644_vm5 = vsmask.f32 256 }
   0xf   : > { %s5720_s30 = smov (!%p446_p6, %s2914_s30), 3  ;;  %s5722_s13 = smov (!%p440_p7, %s2912_s13), 7  ;;  %v3916_v11 = vld [vmem:[%s5694_s4 + $0x18] sm:$0xff]  ;;  %v693_v12 = vunpack.c.l.b16 %v689_v5  ;;  %801 = vmatpush.bf16.msra.mxu2 %v3920_v10  ;;  %v3915_v15 = vld [vmem:[%s5694_s4 + $0x10] sm:$0xff]  ;;  %v3918_v27 = vld [vmem:[%s5694_s4 + $0x28] sm:$0xff]  ;;  %vm608_vm0 = vcmask 523264  }
  0x10   : > { %v463_v2 = vadd.s32 8, %v4265_v1  ;;  %s2915_s14 = sshll.u32 %s5720_s30, 2  ;;  %v470_v3 = vand.u32 15, %v4265_v1  ;;  %s2913_s18 = sshll.u32 %s5722_s13, 2  ;;  %850 = vmatpush.bf16.msra.mxu3 %v3916_v11  ;;  %v3924_v16 = vld [vmem:[%s5694_s4 + $0x58] sm:$0xff]  ;;  %v3923_v23 = vld [vmem:[%s5694_s4 + $0x50] sm:$0xff]  ;;  %vm4344_vm9 = vmand %vm662_vm7, %vm644_vm5 }
  0x11   : > { %s449_s17 = scalar_lea.vmem %s5691_s1, %s2915_s14  ;;  %s443_s30 = scalar_lea.vmem %s5690_s0, %s2913_s18  ;;  %v4313_v20 = vunpack.i.l.s16 %v693_v12  ;;  %v3912_v22 = vld [vmem:[%s5693_s3 + $0x18] sm:$0xff]  ;;  %v3914_v28 = vld [vmem:[%s5694_s4 + $0x8] sm:$0xff]  ;;  %v3911_v34 = vld [vmem:[%s5693_s3 + $0x10] sm:$0xff]  ;;  %vm665_vm13 = vsmask.f32 7424  ;;  %v464_v53 = vadd.s32 16, %v4265_v1 }
  0x12   : > { %v477_v6 = vand.u32 15, %v463_v2  ;;  %v3906_v7 = vld [vmem:[%s449_s17] sm:$0xff]  ;;  %vm4291_vm3 = vcmp.eq.s32.totalorder %v470_v3, 0  ;;  %v4308_v19 = vld [vmem:[%s443_s30 + $0x8] sm:$0xff]  ;;  %v465_v60 = vadd.s32 24, %v4265_v1  ;;  %s3903_s19 = sshll.u32 %s5722_s13, 4 }
  0x13   : > { %562 = vmatpush.bf16.msra.mxu0 %v3906_v7  ;;  %4117 = vmatpush.bf16.msra.mxu1 %v3906_v7  ;;  %v3904_v18 = vld [vmem:[%s443_s30] sm:$0xff]  ;;  %vm684_vm6 = vmpackc.low %vm4291_vm3, %vm4291_vm3  ;;  %v656_v35 = vshll.u32 %v4308_v19, 16  ;;  %vm703_vm10 = vcmp.ne.s32.totalorder %v4313_v20, %v4316_v21  ;;  %v3922_v40 = vld [vmem:[%s5694_s4 + $0x48] sm:$0xff]  ;;  %vm740_vm14 = vcmp.ne.s32.totalorder %v4313_v20, %v4335_v30  ;;  %v484_v54 = vand.u32 15, %v464_v53  ;;  %s5638_s22 = scalar_lea.vmem %s5702_s12, %s3903_s19 }
  0x14   : > { %vm4304_vm4 = vcmp.eq.s32.totalorder %v477_v6, 15  ;;  %v646_v24 = vshrl.u32 %v3904_v18, 16  ;;  %v649_v25 = vshll.u32 %v3904_v18, 16  ;;  %v688_v26 = vsel %vm684_vm6, 65537, %v4188_v4  ;;  %802 = vmatpush.bf16.msra.mxu2 %v3919_v14  ;;  %851 = vmatpush.bf16.msra.mxu3 %v3915_v15  ;;  %v3917_v42 = vld [vmem:[%s5694_s4 + $0x20] sm:$0xff]  ;;  %v3910_v57 = vld [vmem:[%s5693_s3 + $0x8] sm:$0xff] }
  0x15   : > { %vm723_vm8 = vmpackc.low %vm4304_vm4, %vm4304_vm4  ;;  %v692_v29 = vunpack.c.l.b16 %v688_v26  ;;  %v3913_v43 = vld [vmem:[%s5694_s4] sm:$0xff]  ;;  %v668_v47 = vrot.slane %v656_v35, 1  ;;  %v653_v55 = vshrl.u32 %v4308_v19, 16  ;;  %v491_v0 = vand.u32 15, %v465_v60  ;;  %v3955_v12 = vld [vmem:[%s5696_s6 + $0xf4] sm:$0xf] }
  0x16   : > { %2931 = vmatmul.msk.bf16.vlgmr.msra.gmra.mxu0 %vm548_vm2, %v3907_v8  ;;  %2932 = vmatmul.msk.bf16.vlgmr.msra.gmra.mxu1 %vm548_vm2, %v3908_v9  ;;  %v727_v31 = vsel %vm723_vm8, 65537, %v4188_v4  ;;  %v648_v32 = vrot.slane %v646_v24, 7  ;;  %v666_v33 = vrot.slane %v649_v25, 1  ;;  %v3921_v49 = vld [vmem:[%s5694_s4 + $0x40] sm:$0xff]  ;;  %vm516_vm2 = vcmp.eq.s32.totalorder %v484_v54, 0 }
  0x17   : > { %908 = vmatpush.bf16.msrb.mxu0 %v3924_v16  ;;  %619 = vmatpush.bf16.msrb.mxu1 %v3912_v22  ;;  %v731_v36 = vunpack.c.l.b16 %v727_v31  ;;  %v2959_v38 = vunpack.i.l.s16 %v692_v29  ;;  %vm686_vm3 = vmpackc.low %vm516_vm2, %vm516_vm2  ;;  %v655_v59 = vrot.slane %v653_v55, 7  ;;  %v3909_v61 = vld [vmem:[%s5693_s3] sm:$0xff]  ;;  %vm521_vm7 = vcmp.eq.s32.totalorder %v491_v0, 15  ;;  %v3113_v13 = vld [vmem:[%s5696_s6 + $0xf8] sm:$0xf0] }
  0x18   : > { %v651_v39 = vor.u32 %v649_v25, %v648_v32  ;;  %803 = vmatpush.bf16.msra.mxu2 %v3918_v27  ;;  %852 = vmatpush.bf16.msra.mxu3 %v3914_v28  ;;  %v667_v46 = vor.u32 %v666_v33, %v646_v24  ;;  %v690_v56 = vsel %vm686_vm3, 65537, %v4188_v4  ;;  %vm725_vm8 = vmpackc.low %vm521_vm7, %vm521_vm7  ;;  %v670_v8 = vor.u32 %v668_v47, %v653_v55  ;;  %v3111_v14 = vld [vmem:[%s5696_s6 + $0xf0] sm:$0xf]  ;;  %v3956_v16 = vld [vmem:[%s5696_s6 + $0xf4] sm:$0xf0] }
  0x19   : > { %v2964_v41 = vunpack.i.l.s16 %v731_v36  ;;  %vm702_vm11 = vcmp.ne.s32.totalorder %v2959_v38, %v4335_v30  ;;  %v694_v58 = vunpack.c.l.b16 %v690_v56  ;;  %v658_v63 = vor.u32 %v656_v35, %v655_v59  ;;  %v3953_v17 = vld [vmem:[%s5696_s6 + $0xe4] sm:$0xf]  ;;  %v3103_v20 = vld [vmem:[%s5696_s6 + $0xe0] sm:$0xf]  ;;  %v3097_v24 = vld [vmem:[%s5696_s6 + $0xd8] sm:$0xf0] }
  0x1a   : > { %v664_v44 = vsel %vm4344_vm9, 0, %v651_v39  ;;  %vm4365_vm12 = vmpackc.low %vm703_vm10, %vm702_vm11  ;;  %v669_v50 = vsel %vm665_vm13, %v667_v46, %v668_v47  ;;  %v729_v5 = vsel %vm725_vm8, 65537, %v4188_v4  ;;  %vm673_vm11 = vcmask 1047552   ;;  %v3175_v26 = vld [vmem:[%s5696_s6 + $0x70] sm:$0xf] }
  0x1b   : > { %909 = vmatpush.bf16.msrb.mxu0 %v3923_v23  ;;  %620 = vmatpush.bf16.msrb.mxu1 %v3911_v34  ;;  %vm741_vm15 = vcmp.ne.s32.totalorder %v2964_v41, %v4316_v21  ;;  %v712_v48 = vsel %vm4365_vm12, 0, %v664_v44  ;;  %v2961_v62 = vunpack.i.l.s16 %v694_v58  ;;  %v659_v2 = vsel %vm644_vm5, %v648_v32, %v658_v63  ;;  %v3951_v23 = vld [vmem:[%s5696_s6 + $0xd4] sm:$0xf]  ;;  %v3940_v27 = vld [vmem:[%s5696_s6 + $0x74] sm:$0xf0] }
  0x1c   : > { %804 = vmatpush.bf16.msra.mxu2 %v3917_v42  ;;  %853 = vmatpush.bf16.msra.mxu3 %v3913_v43  ;;  %vm4381_vm1 = vmpackc.low %vm741_vm15, %vm740_vm14  ;;  %v733_v6 = vunpack.c.l.b16 %v729_v5  ;;  %v3116_v15 = vor.u32 %v3955_v12, %v3113_v13  ;;  %v3939_v28 = vld [vmem:[%s5696_s6 + $0x74] sm:$0xf]  ;;  %v3952_v31 = vld [vmem:[%s5696_s6 + $0xd4] sm:$0xf0]  ;;  %v3176_v32 = vor.u32 %v3940_v27, %v3175_v26  ;;  %v3100_v35 = vor.u32 %v3951_v23, %v3097_v24 }
  0x1d   : > { %v750_v52 = vsel %vm4381_vm1, 0, %v669_v50  ;;  %vm709_vm4 = vcmp.ne.s32.totalorder %v2961_v62, %v4335_v30  ;;  %vm4416_vm15 = vmand %vm673_vm11, %vm665_vm13  ;;  %v3095_v30 = vld [vmem:[%s5696_s6 + $0xd0] sm:$0xf]  ;;  %v3177_v33 = vld [vmem:[%s5696_s6 + $0x78] sm:$0xf0] }
  0x1e   : > { %vm4407_vm6 = vmpackc.low %vm703_vm10, %vm709_vm4  ;;  %v2966_v7 = vunpack.i.l.s16 %v733_v6  ;;  %v675_v10 = vsel %vm4416_vm15, %v670_v8, 0  ;;  %v3180_v34 = vor.u32 %v3939_v28, %v3177_v33  ;;  %v3096_v36 = vor.u32 %v3952_v31, %v3095_v30  ;;  %v3949_v38 = vld [vmem:[%s5696_s6 + $0xc4] sm:$0xf]  ;;  %v3089_v39 = vld [vmem:[%s5696_s6 + $0xc8] sm:$0xf0] }
  0x1f   : > { %910 = vmatpush.bf16.msrb.mxu0 %v3922_v40  ;;  %2991 = vmatmul.msk.bf16.vlgmr.msra.gmra.mxu2 %vm608_vm0, %v3904_v18  ;;  %v713_v1 = vsel %vm4407_vm6, 0, %v659_v2  ;;  %v3105_v18 = vld [vmem:[%s5696_s6 + $0xe8] sm:$0xf0]  ;;  %v3092_v40 = vor.u32 %v3949_v38, %v3089_v39  ;;  %v3087_v47 = vld [vmem:[%s5696_s6 + $0xc0] sm:$0xf] }
  0x20   : > { %3009 = vmatmul.msk.bf16.vlgmr.msra.gmra.mxu3 %vm608_vm0, %v712_v48  ;;  %621 = vmatpush.bf16.msrb.mxu1 %v3910_v57  ;;  %vm748_vm10 = vcmp.ne.s32.totalorder %v2966_v7, %v4316_v21  ;;  %v3954_v21 = vld [vmem:[%s5696_s6 + $0xe4] sm:$0xf0]  ;;  %v3108_v22 = vor.u32 %v3953_v17, %v3105_v18  ;;  %v3167_v50 = vld [vmem:[%s5696_s6 + $0x60] sm:$0xf]  ;;  %v3937_v53 = vld [vmem:[%s5696_s6 + $0x64] sm:$0xf] }
  0x21   : > { %vm4426_vm2 = vmpackc.low %vm748_vm10, %vm740_vm14  ;;  %1121 = vmatpush.bf16.msrb.mxu2 %v3116_v15  ;;  %v3104_v25 = vor.u32 %v3954_v21, %v3103_v20  ;;  %1220 = vmatpush.bf16.msrb.mxu3 %v3176_v32  ;;  %v3950_v48 = vld [vmem:[%s5696_s6 + $0xc4] sm:$0xf0]  ;;  %v3169_v55 = vld [vmem:[%s5696_s6 + $0x68] sm:$0xf0] }
  0x22   : > { %v751_v4 = vsel %vm4426_vm2, 0, %v675_v10  ;;  %v3172_v56 = vor.u32 %v3937_v53, %v3169_v55  ;;  %v3947_v57 = vld [vmem:[%s5696_s6 + $0xb4] sm:$0xf]  ;;  %v3081_v58 = vld [vmem:[%s5696_s6 + $0xb8] sm:$0xf0] }
  0x23   : > { %911 = vmatpush.bf16.msrb.mxu0 %v3921_v49  ;;  %v3088_v49 = vor.u32 %v3950_v48, %v3087_v47  ;;  %v3079_v59 = vld [vmem:[%s5696_s6 + $0xb0] sm:$0xf]  ;;  %v3084_v60 = vor.u32 %v3947_v57, %v3081_v58  ;;  %v3936_v63 = vld [vmem:[%s5696_s6 + $0x54] sm:$0xf0]  ;;  %v3161_v5 = vld [vmem:[%s5696_s6 + $0x58] sm:$0xf0] }
  0x24   : > { %622 = vmatpush.bf16.msrb.mxu1 %v3909_v61  ;;  %v3948_v61 = vld [vmem:[%s5696_s6 + $0xb4] sm:$0xf0]  ;;  %v3159_v62 = vld [vmem:[%s5696_s6 + $0x50] sm:$0xf]  ;;  %v3945_v7 = vld [vmem:[%s5696_s6 + $0xa4] sm:$0xf] }
  0x25   : > { %1122 = vmatpush.bf16.msrb.mxu2 %v3108_v22  ;;  %v3080_v0 = vor.u32 %v3948_v61, %v3079_v59  ;;  %v3160_v2 = vor.u32 %v3936_v63, %v3159_v62  ;;  %v3073_v8 = vld [vmem:[%s5696_s6 + $0xa8] sm:$0xf0]  ;;  %v3071_v10 = vld [vmem:[%s5696_s6 + $0xa0] sm:$0xf]  ;;  %v3946_v12 = vld [vmem:[%s5696_s6 + $0xa4] sm:$0xf0] }
  0x26   : > { %3035 = vmatmul.msk.bf16.vlgmr.msrb.gmra.mxu0 %vm608_vm0, %v750_v52  ;;  %v3938_v52 = vld [vmem:[%s5696_s6 + $0x64] sm:$0xf0]  ;;  %v3151_v13 = vld [vmem:[%s5696_s6 + $0x40] sm:$0xf]  ;;  %v3072_v15 = vor.u32 %v3946_v12, %v3071_v10  ;;  %v3933_v17 = vld [vmem:[%s5696_s6 + $0x44] sm:$0xf] }
  0x27   : > { %1239 = vmatpush.bf16.msra.mxu0 %v3180_v34  ;;  %v3168_v54 = vor.u32 %v3938_v52, %v3167_v50  ;;  %v3153_v18 = vld [vmem:[%s5696_s6 + $0x48] sm:$0xf0]  ;;  %v3943_v20 = vld [vmem:[%s5696_s6 + $0x94] sm:$0xf]  ;;  %v3065_v21 = vld [vmem:[%s5696_s6 + $0x98] sm:$0xf0] }
  0x28   : > { %v3063_v22 = vld [vmem:[%s5696_s6 + $0x90] sm:$0xf]  ;;  %v3068_v23 = vor.u32 %v3943_v20, %v3065_v21  ;;  %v3944_v24 = vld [vmem:[%s5696_s6 + $0x94] sm:$0xf0]  ;;  %v3145_v30 = vld [vmem:[%s5696_s6 + $0x38] sm:$0xf0] }
  0x29   : > { %1123 = vmatpush.bf16.msrb.mxu2 %v3100_v35  ;;  %1221 = vmatpush.bf16.msrb.mxu3 %v3168_v54  ;;  %v3932_v26 = vld [vmem:[%s5696_s6 + $0x34] sm:$0xf0]  ;;  %v3064_v27 = vor.u32 %v3944_v24, %v3063_v22  ;;  %v3941_v34 = vld [vmem:[%s5696_s6 + $0x84] sm:$0xf]  ;;  %v3057_v35 = vld [vmem:[%s5696_s6 + $0x88] sm:$0xf0] }
  0x2a   : > { %v3060_v38 = vor.u32 %v3941_v34, %v3057_v35  ;;  %v3942_v39 = vld [vmem:[%s5696_s6 + $0x84] sm:$0xf0]  ;;  %v3971_v48 = vld [vmem:[%s5696_s6 + $0x174] sm:$0xf]  ;;  %v3127_v50 = vld [vmem:[%s5696_s6 + $0x10] sm:$0xf] }
  0x2b   : > { %1240 = vmatpush.bf16.msra.mxu0 %v3172_v56  ;;  %v3928_v54 = vld [vmem:[%s5696_s6 + $0x14] sm:$0xf0]  ;;  %v3927_v55 = vld [vmem:[%s5696_s6 + $0x14] sm:$0xf]  ;;  %v3129_v56 = vld [vmem:[%s5696_s6 + $0x18] sm:$0xf0] }
  0x2c   : > { %v3128_v57 = vor.u32 %v3928_v54, %v3127_v50  ;;  %v3132_v58 = vor.u32 %v3927_v55, %v3129_v56  ;;  %v3255_v59 = vld [vmem:[%s5696_s6 + $0x170] sm:$0xf]  ;;  %v3969_v62 = vld [vmem:[%s5696_s6 + $0x164] sm:$0xf]  ;;  %v3249_v63 = vld [vmem:[%s5696_s6 + $0x168] sm:$0xf0] }
  0x2d   : > { %1124 = vmatpush.bf16.msrb.mxu2 %v3092_v40  ;;  %1222 = vmatpush.bf16.msrb.mxu3 %v3160_v2  ;;  %v3135_v40 = vld [vmem:[%s5696_s6 + $0x20] sm:$0xf]  ;;  %v3252_v2 = vor.u32 %v3969_v62, %v3249_v63  ;;  %v3968_v20 = vld [vmem:[%s5696_s6 + $0x154] sm:$0xf0]  ;;  %v3319_v21 = vld [vmem:[#allocation2 + $0xf0] sm:$0xf] }
  0x2e   : > { %v4004_v22 = vld [vmem:[#allocation2 + $0xf4] sm:$0xf0]  ;;  %v4666_v24 = vld [vmem:[%s5695_s5] ss:$0 sm:$0xff]  ;;  %v3966_v35 = vld [vmem:[%s5696_s6 + $0x144] sm:$0xf0] }
  0x2f   : > { %2992 = vmatmul.msk.bf16.gmra.mxu2 %vm608_vm0, %v4308_v19  ;;  %v3112_v19 = vor.u32 %v3956_v16, %v3111_v14  ;;  %v3934_v14 = vld [vmem:[%s5696_s6 + $0x44] sm:$0xf0]  ;;  %v3963_v50 = vld [vmem:[%s5696_s6 + $0x134] sm:$0xf]  ;;  %v3964_v55 = vld [vmem:[%s5696_s6 + $0x134] sm:$0xf0] }
  0x30   : > { %3010 = vmatmul.msk.bf16.gmra.mxu3 %vm608_vm0, %v713_v1  ;;  %v3935_v1 = vld [vmem:[%s5696_s6 + $0x54] sm:$0xf]  ;;  %v3152_v16 = vor.u32 %v3934_v14, %v3151_v13  ;;  %v3247_v13 = vld [vmem:[%s5696_s6 + $0x160] sm:$0xf]  ;;  %v3970_v14 = vld [vmem:[%s5696_s6 + $0x164] sm:$0xf0] }
  0x31   : > { %1102 = vmatpush.bf16.msra.mxu1 %v3112_v19  ;;  %1125 = vmatpush.bf16.msrb.mxu2 %v3084_v60  ;;  %v3164_v6 = vor.u32 %v3935_v1, %v3161_v5  ;;  %v3156_v19 = vor.u32 %v3933_v17, %v3153_v18  ;;  %v3972_v60 = vld [vmem:[%s5696_s6 + $0x174] sm:$0xf0]  ;;  %v3926_v1 = vld [vmem:[%s5696_s6 + $0x4] sm:$0xf0]  ;;  %v3925_v5 = vld [vmem:[%s5696_s6 + $0x4] sm:$0xf] }
  0x32   : > { %1223 = vmatpush.bf16.msrb.mxu3 %v3152_v16  ;;  %v3256_v61 = vor.u32 %v3972_v60, %v3255_v59  ;;  %v3967_v16 = vld [vmem:[%s5696_s6 + $0x154] sm:$0xf]  ;;  %v3241_v17 = vld [vmem:[%s5696_s6 + $0x158] sm:$0xf0]  ;;  %v3239_v18 = vld [vmem:[%s5696_s6 + $0x150] sm:$0xf] }
  0x33   : > { %1241 = vmatpush.bf16.msra.mxu0 %v3164_v6  ;;  %v3121_v6 = vld [vmem:[%s5696_s6 + $0x8] sm:$0xf0]  ;;  %v3303_v56 = vld [vmem:[#allocation2 + $0xd0] sm:$0xf]  ;;  %v3999_v62 = vld [vmem:[#allocation2 + $0xd4] sm:$0xf] }
  0x34   : > { %v3124_v12 = vor.u32 %v3925_v5, %v3121_v6  ;;  %v3305_v63 = vld [vmem:[#allocation2 + $0xd8] sm:$0xf0]  ;;  %v3215_v5 = vld [vmem:[%s5696_s6 + $0x120] sm:$0xf]  ;;  %v4105_v37 = vld [vmem:[%s5700_s10 + $0x2a4] sm:$0xf] }
  0x35   : > { %1103 = vmatpush.bf16.msra.mxu1 %v3104_v25  ;;  %v3143_v25 = vld [vmem:[%s5696_s6 + $0x30] sm:$0xf] }
  0x36   : > { %3036 = vmatmul.msk.bf16.gmra.mxu0 %vm608_vm0, %v751_v4  ;;  %v3076_v4 = vor.u32 %v3945_v7, %v3073_v8  ;;  %v3144_v28 = vor.u32 %v3932_v26, %v3143_v25  ;;  %v3240_v25 = vor.u32 %v3968_v20, %v3239_v18  ;;  %v3320_v26 = vor.u32 %v4004_v22, %v3319_v21  ;;  %v3959_v22 = vld [vmem:[%s5696_s6 + $0x114] sm:$0xf] }
  0x37   : > { %1242 = vmatpush.bf16.msra.mxu0 %v3156_v19  ;;  %v3244_v19 = vor.u32 %v3967_v16, %v3241_v17  ;;  %v3297_v16 = vld [vmem:[#allocation2 + $0xc8] sm:$0xf0] }
  0x38   : > { %1126 = vmatpush.bf16.msrb.mxu2 %v3076_v4  ;;  %1224 = vmatpush.bf16.msrb.mxu3 %v3144_v28  ;;  %v3321_v28 = vld [vmem:[#allocation2 + $0xf8] sm:$0xf0] }
  0x39   : > { %1104 = vmatpush.bf16.msra.mxu1 %v3096_v36  ;;  %v3055_v36 = vld [vmem:[%s5696_s6 + $0x80] sm:$0xf] }
  0x3c   : > { %1127 = vmatpush.bf16.msrb.mxu2 %v3068_v23 }
  0x3d   : > { %1105 = vmatpush.bf16.msra.mxu1 %v3088_v49  ;;  %v3257_v49 = vld [vmem:[%s5696_s6 + $0x178] sm:$0xf0] }
  0x3e   : > { %v3260_v53 = vor.u32 %v3971_v48, %v3257_v49 }
  0x40   : > { %1128 = vmatpush.bf16.msrb.mxu2 %v3060_v38  ;;  %v4002_v38 = vld [vmem:[#allocation2 + $0xe4] sm:$0xf0] }
  0x41   : > { %1106 = vmatpush.bf16.msra.mxu1 %v3080_v0  ;;  %v3119_v0 = vld [vmem:[%s5696_s6] sm:$0xf] }
  0x42   : > { %v3120_v4 = vor.u32 %v3926_v1, %v3119_v0  ;;  %v3308_v0 = vor.u32 %v3999_v62, %v3305_v63  ;;  %v3217_v1 = vld [vmem:[%s5696_s6 + $0x128] sm:$0xf0] }
  0x44   : > { %1374 = vmatpush.bf16.msra.mxu2 %v3260_v53  ;;  %v3223_v53 = vld [vmem:[%s5696_s6 + $0x130] sm:$0xf] }
  0x45   : > { %1107 = vmatpush.bf16.msra.mxu1 %v3072_v15  ;;  %v3248_v15 = vor.u32 %v3970_v14, %v3247_v13  ;;  %v3224_v60 = vor.u32 %v3964_v55, %v3223_v53  ;;  %v3281_v55 = vld [vmem:[#allocation2 + $0xa8] sm:$0xf0] }
  0x48   : > { %1375 = vmatpush.bf16.msra.mxu2 %v3252_v2  ;;  %v3961_v2 = vld [vmem:[%s5696_s6 + $0x124] sm:$0xf] }
  0x49   : > { %1108 = vmatpush.bf16.msra.mxu1 %v3064_v27  ;;  %v4003_v27 = vld [vmem:[#allocation2 + $0xf4] sm:$0xf]  ;;  %v3220_v6 = vor.u32 %v3961_v2, %v3217_v1  ;;  %v3992_v2 = vld [vmem:[#allocation2 + $0x94] sm:$0xf0] }
  0x4a   : > { %v3991_v1 = vld [vmem:[#allocation2 + $0x94] sm:$0xf] }
  0x4c   : > { %1376 = vmatpush.bf16.msra.mxu2 %v3244_v19 }
  0x93   : > { %v564_v29 = vpop.f32.mrf.mxu0  ;;  %v569_v43 = vpop.f32.mrf.mxu1 }
  0x9b   : > { %v566_v41 = vpop.f32.mrf.mxu0  ;;  %v571_v44 = vpop.f32.mrf.mxu1 }
  0x9c   : > { %v574_v42 = vpack.c.bf16 %v566_v41, %v564_v29  ;;  %v575_v46 = vpack.c.bf16 %v571_v44, %v569_v43  ;;  %v3931_v29 = vld [vmem:[%s5696_s6 + $0x34] sm:$0xf]  ;;  %v3930_v41 = vld [vmem:[%s5696_s6 + $0x24] sm:$0xf0]  ;;  %v3929_v44 = vld [vmem:[%s5696_s6 + $0x24] sm:$0xf] }
  0x9d   : > { %v3148_v31 = vor.u32 %v3931_v29, %v3145_v30  ;;  %v3136_v43 = vor.u32 %v3930_v41, %v3135_v40  ;;  %v3324_v30 = vor.u32 %v4003_v27, %v3321_v28  ;;  %v3960_v28 = vld [vmem:[%s5696_s6 + $0x114] sm:$0xf0] }
  0x9e   : > { %2949 = vmatmul.msk.bf16.vlgmr.msrb.gmra.mxu1 %vm608_vm0, %v574_v42  ;;  %v3056_v42 = vor.u32 %v3942_v39, %v3055_v36  ;;  %v3311_v36 = vld [vmem:[#allocation2 + $0xe0] sm:$0xf] }
  0x9f   : > { %1243 = vmatpush.bf16.msra.mxu0 %v3148_v31  ;;  %1225 = vmatpush.bf16.msrb.mxu3 %v3136_v43  ;;  %v3965_v31 = vld [vmem:[%s5696_s6 + $0x144] sm:$0xf] }
  0xa0   : > { %1109 = vmatpush.bf16.msra.mxu1 %v3056_v42  ;;  %v3312_v42 = vor.u32 %v4002_v38, %v3311_v36  ;;  %v4001_v43 = vld [vmem:[#allocation2 + $0xe4] sm:$0xf]  ;;  %v3995_v38 = vld [vmem:[#allocation2 + $0xb4] sm:$0xf] }
  0xa2   : > { %v806_v32 = vpop.f32.mrf.mxu2 }
  0xa3   : > { %v855_v33 = vpop.f32.mrf.mxu3  ;;  %v913_v52 = vpop.f32.mrf.mxu0  ;;  %1226 = vmatpush.bf16.msrb.mxu3 %v3128_v57  ;;  %v4000_v57 = vld [vmem:[#allocation2 + $0xd4] sm:$0xf0] }
  0xa4   : > { %1355 = vmatpush.bf16.msrb.mxu1 %v3256_v61  ;;  %v856_v7 = vadd.f32 %v855_v33, %v806_v32  ;;  %v3233_v32 = vld [vmem:[%s5696_s6 + $0x148] sm:$0xf0]  ;;  %v3231_v33 = vld [vmem:[%s5696_s6 + $0x140] sm:$0xf]  ;;  %v3304_v61 = vor.u32 %v4000_v57, %v3303_v56 }
  0xa5   : > { %v3236_v34 = vor.u32 %v3965_v31, %v3233_v32  ;;  %v3232_v41 = vor.u32 %v3966_v35, %v3231_v33 }
  0xa6   : > { %v923_v23 = vadd.f32 %v913_v52, %v856_v7  ;;  %v3225_v52 = vld [vmem:[%s5696_s6 + $0x138] sm:$0xf0]  ;;  %v3962_v7 = vld [vmem:[%s5696_s6 + $0x124] sm:$0xf0] }
  0xa7   : > { %1227 = vmatpush.bf16.msrb.mxu3 %v3120_v4  ;;  %1377 = vmatpush.bf16.msra.mxu2 %v3236_v34  ;;  %v3228_v54 = vor.u32 %v3963_v50, %v3225_v52  ;;  %v3216_v13 = vor.u32 %v3962_v7, %v3215_v5  ;;  %v3383_v7 = vld [vmem:[#allocation2 + $0x70] sm:$0xf] }
  0xa8   : > { %1356 = vmatpush.bf16.msrb.mxu1 %v3248_v15  ;;  %v931_v40 = vadd.f32 %v4666_v24, %v923_v23  ;;  %v3997_v15 = vld [vmem:[#allocation2 + $0xc4] sm:$0xf]  ;;  %v3209_v23 = vld [vmem:[%s5696_s6 + $0x118] sm:$0xf0] }
  0xa9   : > { %v3300_v19 = vor.u32 %v3997_v15, %v3297_v16  ;;  %v3212_v27 = vor.u32 %v3959_v22, %v3209_v23  ;;  %v3385_v16 = vld [vmem:[#allocation2 + $0x78] sm:$0xf0]  ;;  %v3989_v22 = vld [vmem:[#allocation2 + $0x84] sm:$0xf]  ;;  %v3265_v23 = vld [vmem:[#allocation2 + $0x88] sm:$0xf0] }
  0xaa   : > { %v808_v8 = vpop.f32.mrf.mxu2 }
  0xab   : > { %v857_v10 = vpop.f32.mrf.mxu3  ;;  %v915_v29 = vpop.f32.mrf.mxu0  ;;  %1574 = vmatpush.bf16.msra.mxu3 %v3320_v26  ;;  %1378 = vmatpush.bf16.msra.mxu2 %v3228_v54  ;;  %v3993_v54 = vld [vmem:[#allocation2 + $0xa4] sm:$0xf] }
  0xac   : > { %1357 = vmatpush.bf16.msrb.mxu1 %v3240_v25  ;;  %v858_v39 = vadd.f32 %v857_v10, %v808_v8  ;;  %v3295_v8 = vld [vmem:[#allocation2 + $0xc0] sm:$0xf]  ;;  %v3998_v10 = vld [vmem:[#allocation2 + $0xc4] sm:$0xf0]  ;;  %v3207_v25 = vld [vmem:[%s5696_s6 + $0x110] sm:$0xf] }
  0xad   : > { %v3296_v14 = vor.u32 %v3998_v10, %v3295_v8  ;;  %v3208_v35 = vor.u32 %v3960_v28, %v3207_v25  ;;  %v3988_v8 = vld [vmem:[#allocation2 + $0x74] sm:$0xf0]  ;;  %v3375_v28 = vld [vmem:[#allocation2 + $0x60] sm:$0xf] }
  0xae   : > { %2950 = vmatmul.msk.bf16.gmra.mxu1 %vm608_vm0, %v575_v46  ;;  %v3137_v46 = vld [vmem:[%s5696_s6 + $0x28] sm:$0xf0]  ;;  %v3384_v15 = vor.u32 %v3988_v8, %v3383_v7 }
  0xaf   : > { %v3140_v47 = vor.u32 %v3929_v44, %v3137_v46  ;;  %v3313_v44 = vld [vmem:[#allocation2 + $0xe8] sm:$0xf0]  ;;  %1575 = vmatpush.bf16.msra.mxu3 %v3312_v42  ;;  %1379 = vmatpush.bf16.msra.mxu2 %v3220_v6  ;;  %v3273_v6 = vld [vmem:[#allocation2 + $0x98] sm:$0xf0] }
  0xb0   : > { %1358 = vmatpush.bf16.msrb.mxu1 %v3232_v41  ;;  %v3957_v41 = vld [vmem:[%s5696_s6 + $0x104] sm:$0xf]  ;;  %v3201_v42 = vld [vmem:[%s5696_s6 + $0x108] sm:$0xf0] }
  0xb1   : > { %1244 = vmatpush.bf16.msra.mxu0 %v3140_v47  ;;  %v3316_v47 = vor.u32 %v4001_v43, %v3313_v44  ;;  %v3199_v43 = vld [vmem:[%s5696_s6 + $0x100] sm:$0xf] }
  0xb2   : > { %v811_v48 = vpop.f32.mrf.mxu2 }
  0xb3   : > { %v860_v49 = vpop.f32.mrf.mxu3  ;;  %1576 = vmatpush.bf16.msra.mxu3 %v3304_v61  ;;  %1380 = vmatpush.bf16.msra.mxu2 %v3212_v27  ;;  %v3268_v27 = vor.u32 %v3989_v22, %v3265_v23  ;;  %v3353_v23 = vld [vmem:[#allocation2 + $0x38] sm:$0xf0] }
  0xb4   : > { %v861_v4 = vadd.f32 %v860_v49, %v811_v48  ;;  %1359 = vmatpush.bf16.msrb.mxu1 %v3224_v60  ;;  %v3279_v48 = vld [vmem:[#allocation2 + $0xa0] sm:$0xf]  ;;  %v3994_v49 = vld [vmem:[#allocation2 + $0xa4] sm:$0xf0]  ;;  %v3284_v60 = vor.u32 %v3993_v54, %v3281_v55  ;;  %v4019_v54 = vld [vmem:[#allocation2 + $0x174] sm:$0xf] }
  0xb5   : > { %1245 = vmatpush.bf16.msra.mxu0 %v3132_v58  ;;  %v924_v58 = vadd.f32 %v915_v29, %v858_v39  ;;  %v3287_v29 = vld [vmem:[#allocation2 + $0xb0] sm:$0xf]  ;;  %v3289_v39 = vld [vmem:[#allocation2 + $0xb8] sm:$0xf0]  ;;  %v3280_v53 = vor.u32 %v3994_v49, %v3279_v48 }
  0xb6   : > { %v3447_v49 = vld [vmem:[#allocation2 + $0x170] sm:$0xf]  ;;  %v3449_v55 = vld [vmem:[#allocation2 + $0x178] sm:$0xf0] }
  0xb7   : > { %v932_v18 = vadd.f32 %v4666_v24, %v924_v58  ;;  %1577 = vmatpush.bf16.msra.mxu3 %v3296_v14  ;;  %v3276_v14 = vor.u32 %v3991_v1, %v3273_v6  ;;  %v4018_v1 = vld [vmem:[#allocation2 + $0x164] sm:$0xf0] }
  0xb8   : > { %1360 = vmatpush.bf16.msrb.mxu1 %v3216_v13  ;;  %v3987_v13 = vld [vmem:[#allocation2 + $0x74] sm:$0xf] }
  0xb9   : > { %1246 = vmatpush.bf16.msra.mxu0 %v3124_v12  ;;  %v918_v12 = vpop.f32.mrf.mxu0  ;;  %v3388_v25 = vor.u32 %v3987_v13, %v3385_v16  ;;  %v3351_v16 = vld [vmem:[#allocation2 + $0x30] sm:$0xf] }
  0xba   : > { %v925_v26 = vadd.f32 %v918_v12, %v861_v4  ;;  %v813_v33 = vpop.f32.mrf.mxu2 }
  0xbb   : > { %v862_v34 = vpop.f32.mrf.mxu3 }
  0xbc   : > { %v863_v50 = vadd.f32 %v862_v34, %v813_v33  ;;  %1361 = vmatpush.bf16.msrb.mxu1 %v3208_v35  ;;  %v933_v58 = vadd.f32 %v4666_v24, %v925_v26  ;;  %v3377_v35 = vld [vmem:[#allocation2 + $0x68] sm:$0xf0] }
  0xbd   : > { %1593 = vmatpush.bf16.msrb.mxu0 %v3324_v30  ;;  %v3996_v30 = vld [vmem:[#allocation2 + $0xb4] sm:$0xf0] }
  0xbe   : > { %v3288_v36 = vor.u32 %v3996_v30, %v3287_v29  ;;  %v3986_v29 = vld [vmem:[#allocation2 + $0x64] sm:$0xf0]  ;;  %v3985_v30 = vld [vmem:[#allocation2 + $0x64] sm:$0xf] }
  0xbf   : > { %v3376_v34 = vor.u32 %v3986_v29, %v3375_v28  ;;  %v4015_v29 = vld [vmem:[#allocation2 + $0x154] sm:$0xf] }
  0xc0   : > { %1578 = vmatpush.bf16.msra.mxu3 %v3288_v36 }
  0xc1   : > { %1594 = vmatpush.bf16.msrb.mxu0 %v3316_v47  ;;  %v3958_v47 = vld [vmem:[%s5696_s6 + $0x104] sm:$0xf0]  ;;  %v920_v61 = vpop.f32.mrf.mxu0 }
  0xc2   : > { %v3200_v52 = vor.u32 %v3958_v47, %v3199_v43  ;;  %v926_v10 = vadd.f32 %v920_v61, %v863_v50  ;;  %v4020_v50 = vld [vmem:[#allocation2 + $0x174] sm:$0xf0]  ;;  %v3981_v61 = vld [vmem:[#allocation2 + $0x44] sm:$0xf] }
  0xc4   : > { %1579 = vmatpush.bf16.msra.mxu3 %v3280_v53  ;;  %1362 = vmatpush.bf16.msrb.mxu1 %v3200_v52  ;;  %v3448_v53 = vor.u32 %v4020_v50, %v3447_v49 }
  0xc5   : > { %1595 = vmatpush.bf16.msrb.mxu0 %v3308_v0  ;;  %v3271_v0 = vld [vmem:[#allocation2 + $0x90] sm:$0xf] }
  0xc6   : > { %v3272_v5 = vor.u32 %v3992_v2, %v3271_v0  ;;  %v3439_v2 = vld [vmem:[#allocation2 + $0x160] sm:$0xf] }
  0xc7   : > { %v3440_v8 = vor.u32 %v4018_v1, %v3439_v2  ;;  %v3417_v2 = vld [vmem:[#allocation2 + $0x138] sm:$0xf0]  ;;  %v3327_v1 = vld [vmem:[#allocation2] sm:$0xf] }
  0xc8   : > { %1580 = vmatpush.bf16.msra.mxu3 %v3272_v5  ;;  %v4017_v5 = vld [vmem:[#allocation2 + $0x164] sm:$0xf] }
  0xc9   : > { %1596 = vmatpush.bf16.msrb.mxu0 %v3300_v19 }
 0x11b   : > { %v624_v46 = vpop.f32.mrf.mxu1 }
 0x11c   : > { %v4693_v59 = vadd.f32 %v931_v40, %v624_v46  ;;  %v3292_v40 = vor.u32 %v3995_v38, %v3289_v39  ;;  %v3204_v46 = vor.u32 %v3957_v41, %v3201_v42  ;;  %v3380_v38 = vor.u32 %v3985_v30, %v3377_v35  ;;  %v3367_v41 = vld [vmem:[#allocation2 + $0x50] sm:$0xf]  ;;  %v3984_v42 = vld [vmem:[#allocation2 + $0x54] sm:$0xf0]  ;;  %v3433_v30 = vld [vmem:[#allocation2 + $0x158] sm:$0xf0] }
 0x11d   : > { %v3368_v43 = vor.u32 %v3984_v42, %v3367_v41  ;;  %v3977_v35 = vld [vmem:[#allocation2 + $0x24] sm:$0xf]  ;;  %v3423_v41 = vld [vmem:[#allocation2 + $0x140] sm:$0xf] }
 0x11e   : > { %v939_v17 = vmax.f32 %v4693_v59, 0.0  ;;  %1597 = vmatpush.bf16.msrb.mxu0 %v3292_v40  ;;  %1381 = vmatpush.bf16.msra.mxu2 %v3204_v46  ;;  %v3369_v46 = vld [vmem:[#allocation2 + $0x58] sm:$0xf0] }
 0x120   : > { %v943_v31 = vpack.c.bf16 %v939_v17, %v939_v17  ;;  %v3263_v17 = vld [vmem:[#allocation2 + $0x80] sm:$0xf] }
 0x122   : > { %v951_v56 = vunpack.c.l.b16 %v943_v31  ;;  %1598 = vmatpush.bf16.msrb.mxu0 %v3284_v60  ;;  %v3982_v60 = vld [vmem:[#allocation2 + $0x44] sm:$0xf0] }
 0x123   : > { %v626_v20 = vpop.f32.mrf.mxu1 }
 0x124   : > { %v4709_v21 = vadd.f32 %v932_v18, %v626_v20  ;;  %v3990_v18 = vld [vmem:[#allocation2 + $0x84] sm:$0xf0] }
 0x125   : > { %v3264_v26 = vor.u32 %v3990_v18, %v3263_v17  ;;  %v3980_v17 = vld [vmem:[#allocation2 + $0x34] sm:$0xf0]  ;;  %v3979_v18 = vld [vmem:[#allocation2 + $0x34] sm:$0xf] }
 0x126   : > { %v940_v32 = vmax.f32 %v4709_v21, 0.0  ;;  %1599 = vmatpush.bf16.msrb.mxu0 %v3276_v14  ;;  %v3352_v22 = vor.u32 %v3980_v17, %v3351_v16  ;;  %v4010_v16 = vld [vmem:[#allocation2 + $0x124] sm:$0xf0]  ;;  %v4009_v17 = vld [vmem:[#allocation2 + $0x124] sm:$0xf] }
 0x127   : > { %1581 = vmatpush.bf16.msra.mxu3 %v3264_v26  ;;  %v4016_v26 = vld [vmem:[#allocation2 + $0x154] sm:$0xf0] }
 0x128   : > { %v944_v44 = vpack.c.bf16 %v940_v32, %v940_v32  ;;  %v934_v32 = vadd.f32 %v4666_v24, %v926_v10  ;;  %v3441_v10 = vld [vmem:[#allocation2 + $0x168] sm:$0xf0] }
 0x129   : > { %v3444_v14 = vor.u32 %v4017_v5, %v3441_v10  ;;  %v3974_v5 = vld [vmem:[#allocation2 + $0x4] sm:$0xf0]  ;;  %v3329_v10 = vld [vmem:[#allocation2 + $0x8] sm:$0xf0] }
 0x12a   : > { %v952_v57 = vunpack.c.l.b16 %v944_v44  ;;  %1600 = vmatpush.bf16.msrb.mxu0 %v3268_v27  ;;  %v3983_v44 = vld [vmem:[#allocation2 + $0x54] sm:$0xf] }
 0x12b   : > { %v629_v62 = vpop.f32.mrf.mxu1  ;;  %v3372_v52 = vor.u32 %v3983_v44, %v3369_v46  ;;  %v3425_v44 = vld [vmem:[#allocation2 + $0x148] sm:$0xf0] }
 0x12c   : > { %v4737_v63 = vpack.c.b16 %v952_v57, %v951_v56  ;;  %v4739_v4 = vadd.f32 %v933_v58, %v629_v62  ;;  %v3359_v56 = vld [vmem:[#allocation2 + $0x40] sm:$0xf]  ;;  %v3452_v58 = vor.u32 %v4019_v54, %v3449_v55  ;;  %v3361_v62 = vld [vmem:[#allocation2 + $0x48] sm:$0xf0]  ;;  %v3976_v54 = vld [vmem:[#allocation2 + $0x14] sm:$0xf0] }
 0x12d   : > { %v3360_v0 = vor.u32 %v3982_v60, %v3359_v56  ;;  %v3364_v13 = vor.u32 %v3981_v61, %v3361_v62  ;;  %v3337_v60 = vld [vmem:[#allocation2 + $0x18] sm:$0xf0]  ;;  %v3415_v61 = vld [vmem:[#allocation2 + $0x130] sm:$0xf]  ;;  %v4012_v62 = vld [vmem:[#allocation2 + $0x134] sm:$0xf0] }
 0x12e   : > { %1110 = vmatmul.bf16.vlgmr.msra.gmra.mxu1 %v4737_v63  ;;  %1129 = vmatmul.bf16.vlgmr.msrb.gmra.mxu2 %v4737_v63  ;;  %v958_v12 = vshrl.u32 %v4737_v63, 16  ;;  %v961_v20 = vshll.u32 %v4737_v63, 16  ;;  %v941_v31 = vmax.f32 %v4739_v4, 0.0  ;;  %v1416_v63 = vpack.c.bf16 %v4709_v21, %v4709_v21 }
 0x12f   : > { %1692 = vmatpush.bf16.msra.mxu1 %v3384_v15  ;;  %1711 = vmatpush.bf16.msrb.mxu2 %v3388_v25  ;;  %v3431_v25 = vld [vmem:[#allocation2 + $0x150] sm:$0xf] }
 0x130   : > { %v4746_v19 = vrot.slane %v958_v12, 7  ;;  %v945_v47 = vpack.c.bf16 %v941_v31, %v941_v31  ;;  %v3432_v28 = vor.u32 %v4016_v26, %v3431_v25  ;;  %v3356_v31 = vor.u32 %v3979_v18, %v3353_v23  ;;  %v3409_v18 = vld [vmem:[#allocation2 + $0x128] sm:$0xf0] }
 0x131   : > { %v975_v50 = vrot.slane %v961_v20, 1  ;;  %v3412_v26 = vor.u32 %v4009_v17, %v3409_v18  ;;  %v1424_v21 = vunpack.c.l.b16 %v1416_v63  ;;  %v4068_v17 = vld [vmem:[%s5700_s10 + $0x174] sm:$0xf0]  ;;  %v3599_v63 = vld [vmem:[%s5700_s10 + $0x1e0] sm:$0xf] }
 0x132   : > { %v963_v33 = vor.u32 %v961_v20, %v4746_v19  ;;  %v953_v6 = vunpack.c.l.b16 %v945_v47  ;;  %v4011_v20 = vld [vmem:[#allocation2 + $0x134] sm:$0xf] }
 0x133   : > { %v631_v36 = vpop.f32.mrf.mxu1  ;;  %1693 = vmatpush.bf16.msra.mxu1 %v3376_v34  ;;  %1712 = vmatpush.bf16.msrb.mxu2 %v3380_v38  ;;  %v3978_v34 = vld [vmem:[#allocation2 + $0x24] sm:$0xf0] }
 0x134   : > { %v4754_v39 = vadd.f32 %v934_v32, %v631_v36  ;;  %v974_v40 = vsel %vm4344_vm9, 0, %v963_v33  ;;  %v3436_v32 = vor.u32 %v4015_v29, %v3433_v30  ;;  %v3343_v33 = vld [vmem:[#allocation2 + $0x20] sm:$0xf]  ;;  %v3399_v29 = vld [vmem:[#allocation2 + $0x110] sm:$0xf] }
 0x135   : > { %v983_v24 = vsel %vm4365_vm12, 0, %v974_v40  ;;  %v3345_v40 = vld [vmem:[#allocation2 + $0x28] sm:$0xf0]  ;;  %v3344_v42 = vor.u32 %v3978_v34, %v3343_v33  ;;  %v4008_v30 = vld [vmem:[#allocation2 + $0x114] sm:$0xf0] }
 0x136   : > { %v942_v48 = vmax.f32 %v4754_v39, 0.0  ;;  %1228 = vmatmul.bf16.vlgmr.msrb.gmra.mxu3 %v983_v24  ;;  %1247 = vmatmul.bf16.vlgmr.msra.gmra.mxu0 %v983_v24  ;;  %v4014_v24 = vld [vmem:[#allocation2 + $0x144] sm:$0xf0]  ;;  %v3401_v33 = vld [vmem:[#allocation2 + $0x118] sm:$0xf0] }
 0x137   : > { %1694 = vmatpush.bf16.msra.mxu1 %v3368_v43  ;;  %1827 = vmatpush.bf16.msrb.mxu3 %v3448_v53  ;;  %v4013_v43 = vld [vmem:[#allocation2 + $0x144] sm:$0xf]  ;;  %v3424_v47 = vor.u32 %v4014_v24, %v3423_v41  ;;  %v3335_v53 = vld [vmem:[#allocation2 + $0x10] sm:$0xf]  ;;  %v3391_v34 = vld [vmem:[#allocation2 + $0x100] sm:$0xf] }
 0x138   : > { %v946_v57 = vpack.c.bf16 %v942_v48, %v942_v48  ;;  %1846 = vmatpush.bf16.msra.mxu0 %v3452_v58  ;;  %1713 = vmatpush.bf16.msrb.mxu2 %v3372_v52  ;;  %v3348_v48 = vor.u32 %v3977_v35, %v3345_v40  ;;  %v3428_v49 = vor.u32 %v4013_v43, %v3425_v44  ;;  %v3975_v58 = vld [vmem:[#allocation2 + $0x14] sm:$0xf]  ;;  %v4006_v35 = vld [vmem:[#allocation2 + $0x104] sm:$0xf0]  ;;  %v3393_v40 = vld [vmem:[#allocation2 + $0x108] sm:$0xf0] }
 0x139   : > { %v3392_v41 = vor.u32 %v4006_v35, %v3391_v34  ;;  %v4066_v34 = vld [vmem:[%s5700_s10 + $0x164] sm:$0xf0]  ;;  %v4081_v35 = vld [vmem:[%s5700_s10 + $0x1e4] sm:$0xf] }
 0x13a   : > { %v954_v7 = vunpack.c.l.b16 %v946_v57  ;;  %v3336_v57 = vor.u32 %v3976_v54, %v3335_v53 }
 0x13b   : > { %1695 = vmatpush.bf16.msra.mxu1 %v3360_v0  ;;  %1828 = vmatpush.bf16.msrb.mxu3 %v3440_v8  ;;  %v3416_v0 = vor.u32 %v4012_v62, %v3415_v61  ;;  %v3973_v8 = vld [vmem:[#allocation2 + $0x4] sm:$0xf] }
 0x13c   : > { %v4761_v15 = vpack.c.b16 %v954_v7, %v953_v6  ;;  %1714 = vmatpush.bf16.msrb.mxu2 %v3364_v13  ;;  %1847 = vmatpush.bf16.msra.mxu0 %v3444_v14  ;;  %v976_v6 = vor.u32 %v975_v50, %v958_v12  ;;  %v3420_v7 = vor.u32 %v4011_v20, %v3417_v2  ;;  %v3407_v13 = vld [vmem:[#allocation2 + $0x120] sm:$0xf] }
 0x13d   : > { %v3328_v14 = vor.u32 %v3974_v5, %v3327_v1  ;;  %v3408_v23 = vor.u32 %v4010_v16, %v3407_v13  ;;  %v3332_v25 = vor.u32 %v3973_v8, %v3329_v10  ;;  %v4084_v8 = vld [vmem:[%s5700_s10 + $0x1f4] sm:$0xf0]  ;;  %v4067_v10 = vld [vmem:[%s5700_s10 + $0x174] sm:$0xf]  ;;  %v3543_v16 = vld [vmem:[%s5700_s10 + $0x170] sm:$0xf] }
 0x13e   : > { %1115 = vmatmul.bf16.gmra.mxu1 %v4761_v15  ;;  %1134 = vmatmul.bf16.gmra.mxu2 %v4761_v15  ;;  %v965_v27 = vshrl.u32 %v4761_v15, 16  ;;  %v968_v38 = vshll.u32 %v4761_v15, 16 }
 0x13f   : > { %1696 = vmatpush.bf16.msra.mxu1 %v3352_v22  ;;  %1829 = vmatpush.bf16.msrb.mxu3 %v3432_v28  ;;  %v1415_v28 = vpack.c.bf16 %v4693_v59, %v4693_v59 }
 0x140   : > { %v967_v36 = vrot.slane %v965_v27, 7  ;;  %1715 = vmatpush.bf16.msrb.mxu2 %v3356_v31  ;;  %1848 = vmatpush.bf16.msra.mxu0 %v3436_v32  ;;  %v4775_v56 = vrot.slane %v968_v38, 1  ;;  %v4007_v31 = vld [vmem:[#allocation2 + $0x114] sm:$0xf]  ;;  %v3400_v32 = vor.u32 %v4008_v30, %v3399_v29 }
 0x142   : > { %v970_v46 = vor.u32 %v968_v38, %v967_v36  ;;  %v978_v22 = vsel %vm665_vm13, %v976_v6, %v4775_v56  ;;  %v3404_v36 = vor.u32 %v4007_v31, %v3401_v33  ;;  %v4005_v38 = vld [vmem:[#allocation2 + $0x104] sm:$0xf]  ;;  %v979_v43 = vor.u32 %v4775_v56, %v965_v27  ;;  %v3537_v31 = vld [vmem:[%s5700_s10 + $0x168] sm:$0xf0]  ;;  %v3535_v33 = vld [vmem:[%s5700_s10 + $0x160] sm:$0xf] }
 0x143   : > { %1697 = vmatpush.bf16.msra.mxu1 %v3344_v42  ;;  %1830 = vmatpush.bf16.msrb.mxu3 %v3424_v47  ;;  %v985_v12 = vsel %vm4381_vm1, 0, %v978_v22  ;;  %v1423_v42 = vunpack.c.l.b16 %v1415_v28  ;;  %v3396_v59 = vor.u32 %v4005_v38, %v3393_v40  ;;  %v3544_v22 = vor.u32 %v4068_v17, %v3543_v16  ;;  %v4065_v28 = vld [vmem:[%s5700_s10 + $0x164] sm:$0xf]  ;;  %v3601_v38 = vld [vmem:[%s5700_s10 + $0x1e8] sm:$0xf0] }
 0x144   : > { %v971_v52 = vsel %vm644_vm5, %v4746_v19, %v970_v46  ;;  %1716 = vmatpush.bf16.msrb.mxu2 %v3348_v48  ;;  %1849 = vmatpush.bf16.msra.mxu0 %v3428_v49  ;;  %v3340_v19 = vor.u32 %v3975_v58, %v3337_v60  ;;  %v982_v44 = vsel %vm4416_vm15, %v979_v43, 0  ;;  %v1418_v46 = vpack.c.bf16 %v4754_v39, %v4754_v39  ;;  %v3591_v40 = vld [vmem:[%s5700_s10 + $0x1d0] sm:$0xf]  ;;  %v3529_v43 = vld [vmem:[%s5700_s10 + $0x158] sm:$0xf0] }
 0x145   : > { %v984_v55 = vsel %vm4407_vm6, 0, %v971_v52  ;;  %v1427_v24 = vpack.c.b16 %v1424_v21, %v1423_v42  ;;  %v986_v47 = vsel %vm4426_vm2, 0, %v982_v44  ;;  %v1417_v48 = vpack.c.bf16 %v4739_v4, %v4739_v4  ;;  %v3527_v44 = vld [vmem:[%s5700_s10 + $0x150] sm:$0xf]  ;;  %v4060_v16 = vld [vmem:[%s5700_s10 + $0x134] sm:$0xf0] }
 0x146   : > { %1233 = vmatmul.bf16.gmra.mxu3 %v984_v55  ;;  %1252 = vmatmul.bf16.gmra.mxu0 %v984_v55  ;;  %v1426_v50 = vunpack.c.l.b16 %v1418_v46  ;;  %v3604_v42 = vor.u32 %v4081_v35, %v3601_v38  ;;  %v4075_v17 = vld [vmem:[%s5700_s10 + $0x1b4] sm:$0xf]  ;;  %v4058_v35 = vld [vmem:[%s5700_s10 + $0x124] sm:$0xf0] }
 0x147   : > { %1698 = vmatpush.bf16.msra.mxu1 %v3336_v57  ;;  %1831 = vmatpush.bf16.msrb.mxu3 %v3416_v0  ;;  %v1430_v49 = vshrl.u32 %v1427_v24, 16  ;;  %v1425_v15 = vunpack.c.l.b16 %v1417_v48  ;;  %v1433_v53 = vshll.u32 %v1427_v24, 16 }
 0x148   : > { %1717 = vmatpush.bf16.msrb.mxu2 %v3340_v19  ;;  %1850 = vmatpush.bf16.msra.mxu0 %v3420_v7  ;;  %v3607_v7 = vld [vmem:[%s5700_s10 + $0x1f0] sm:$0xf] }
 0x149   : > { %v1432_v52 = vrot.slane %v1430_v49, 7  ;;  %v1428_v27 = vpack.c.b16 %v1426_v50, %v1425_v15  ;;  %v1447_v56 = vrot.slane %v1433_v53, 1  ;;  %v3608_v13 = vor.u32 %v4084_v8, %v3607_v7  ;;  %v4079_v50 = vld [vmem:[%s5700_s10 + $0x1d4] sm:$0xf]  ;;  %v3593_v15 = vld [vmem:[%s5700_s10 + $0x1d8] sm:$0xf0] }
 0x14a   : > { %v4059_v7 = vld [vmem:[%s5700_s10 + $0x134] sm:$0xf]  ;;  %v3513_v8 = vld [vmem:[%s5700_s10 + $0x138] sm:$0xf0] }
 0x14b   : > { %1699 = vmatpush.bf16.msra.mxu1 %v3328_v14  ;;  %1832 = vmatpush.bf16.msrb.mxu3 %v3408_v23  ;;  %v1435_v54 = vor.u32 %v1433_v53, %v1432_v52  ;;  %v1440_v55 = vshll.u32 %v1428_v27, 16  ;;  %v1437_v58 = vshrl.u32 %v1428_v27, 16  ;;  %v1448_v60 = vor.u32 %v1447_v56, %v1430_v49  ;;  %v3545_v14 = vld [vmem:[%s5700_s10 + $0x178] sm:$0xf0]  ;;  %v4083_v23 = vld [vmem:[%s5700_s10 + $0x1f4] sm:$0xf] }
 0x14c   : > { %1718 = vmatpush.bf16.msrb.mxu2 %v3332_v25  ;;  %1851 = vmatpush.bf16.msra.mxu0 %v3412_v26  ;;  %v3548_v18 = vor.u32 %v4067_v10, %v3545_v14  ;;  %v3609_v25 = vld [vmem:[%s5700_s10 + $0x1f8] sm:$0xf0]  ;;  %v4064_v49 = vld [vmem:[%s5700_s10 + $0x154] sm:$0xf0]  ;;  %v4061_v56 = vld [vmem:[%s5700_s10 + $0x144] sm:$0xf] }
 0x14d   : > { %v1446_v39 = vsel %vm4344_vm9, 0, %v1435_v54  ;;  %v1449_v4 = vrot.slane %v1440_v55, 1  ;;  %v1439_v62 = vrot.slane %v1437_v58, 7  ;;  %v3612_v26 = vor.u32 %v4083_v23, %v3609_v25  ;;  %v3511_v14 = vld [vmem:[%s5700_s10 + $0x130] sm:$0xf] }
 0x14e   : > { %1363 = vmatmul.bf16.vlgmr.msrb.gmra.mxu1 %v985_v12  ;;  %1382 = vmatmul.bf16.vlgmr.msra.gmra.mxu2 %v985_v12  ;;  %v1455_v57 = vsel %vm4365_vm12, 0, %v1446_v39  ;;  %v4082_v12 = vld [vmem:[%s5700_s10 + $0x1e4] sm:$0xf0]  ;;  %v3583_v39 = vld [vmem:[%s5700_s10 + $0x1c0] sm:$0xf] }
 0x14f   : > { %1833 = vmatpush.bf16.msrb.mxu3 %v3400_v32  ;;  %v1450_v61 = vsel %vm665_vm13, %v1448_v60, %v1449_v4  ;;  %v1442_v19 = vor.u32 %v1440_v55, %v1439_v62  ;;  %v1451_v1 = vor.u32 %v1449_v4, %v1437_v58  ;;  %2204 = vmatpush.bf16.msrb.mxu1 %v3544_v22  ;;  %v4078_v55 = vld [vmem:[%s5700_s10 + $0x1c4] sm:$0xf0]  ;;  %v3521_v60 = vld [vmem:[%s5700_s10 + $0x148] sm:$0xf0]  ;;  %v3577_v22 = vld [vmem:[%s5700_s10 + $0x1b8] sm:$0xf0] }
 0x150   : > { %1852 = vmatpush.bf16.msra.mxu0 %v3404_v36  ;;  %v1457_v20 = vsel %vm4381_vm1, 0, %v1450_v61  ;;  %2223 = vmatpush.bf16.msra.mxu2 %v3608_v13  ;;  %v3600_v30 = vor.u32 %v4082_v12, %v3599_v63  ;;  %v3540_v32 = vor.u32 %v4065_v28, %v3537_v31  ;;  %v3536_v36 = vor.u32 %v4066_v34, %v3535_v33  ;;  %v3519_v61 = vld [vmem:[%s5700_s10 + $0x140] sm:$0xf]  ;;  %v4062_v62 = vld [vmem:[%s5700_s10 + $0x144] sm:$0xf0] }
 0x151   : > { %v1443_v0 = vsel %vm644_vm5, %v1432_v52, %v1442_v19  ;;  %v1454_v5 = vsel %vm4416_vm15, %v1451_v1, 0  ;;  %v3528_v52 = vor.u32 %v4064_v49, %v3527_v44  ;;  %v3584_v58 = vor.u32 %v4078_v55, %v3583_v39  ;;  %v3575_v1 = vld [vmem:[%s5700_s10 + $0x1b0] sm:$0xf]  ;;  %v3567_v63 = vld [vmem:[%s5700_s10 + $0x1a0] sm:$0xf] }
 0x152   : > { %v1456_v2 = vsel %vm4407_vm6, 0, %v1443_v0  ;;  %v1458_v6 = vsel %vm4426_vm2, 0, %v1454_v5  ;;  %v3520_v19 = vor.u32 %v4062_v62, %v3519_v61  ;;  %v4077_v0 = vld [vmem:[%s5700_s10 + $0x1c4] sm:$0xf]  ;;  %v3516_v13 = vor.u32 %v4059_v7, %v3513_v8  ;;  %v4074_v12 = vld [vmem:[%s5700_s10 + $0x1a4] sm:$0xf0] }
 0x153   : > { %1834 = vmatpush.bf16.msrb.mxu3 %v3392_v41  ;;  %v4080_v41 = vld [vmem:[%s5700_s10 + $0x1d4] sm:$0xf0]  ;;  %2205 = vmatpush.bf16.msrb.mxu1 %v3536_v36  ;;  %v3580_v23 = vor.u32 %v4075_v17, %v3577_v22  ;;  %v4057_v28 = vld [vmem:[%s5700_s10 + $0x124] sm:$0xf]  ;;  %v3505_v33 = vld [vmem:[%s5700_s10 + $0x128] sm:$0xf0] }
 0x154   : > { %1853 = vmatpush.bf16.msra.mxu0 %v3396_v59  ;;  %2224 = vmatpush.bf16.msra.mxu2 %v3600_v30  ;;  %v3592_v59 = vor.u32 %v4080_v41, %v3591_v40  ;;  %v3503_v34 = vld [vmem:[%s5700_s10 + $0x120] sm:$0xf]  ;;  %v3508_v36 = vor.u32 %v4057_v28, %v3505_v33  ;;  %v4073_v40 = vld [vmem:[%s5700_s10 + $0x1a4] sm:$0xf]  ;;  %v3569_v41 = vld [vmem:[%s5700_s10 + $0x1a8] sm:$0xf0] }
 0x155   : > { %v3504_v38 = vor.u32 %v4058_v35, %v3503_v34  ;;  %v3497_v44 = vld [vmem:[%s5700_s10 + $0x118] sm:$0xf0]  ;;  %v4070_v61 = vld [vmem:[%s5700_s10 + $0x184] sm:$0xf0]  ;;  %v4053_v62 = vld [vmem:[%s5700_s10 + $0x104] sm:$0xf] }
 0x156   : > { %1582 = vmatmul.bf16.vlgmr.msra.gmra.mxu3 %v1427_v24  ;;  %1601 = vmatmul.bf16.vlgmr.msrb.gmra.mxu0 %v1427_v24  ;;  %v4063_v24 = vld [vmem:[%s5700_s10 + $0x154] sm:$0xf]  ;;  %v3561_v39 = vld [vmem:[%s5700_s10 + $0x198] sm:$0xf0]  ;;  %v4052_v17 = vld [vmem:[%s5700_s10 + $0xf4] sm:$0xf0] }
 0x157   : > { %2242 = vmatpush.bf16.msra.mxu3 %v3548_v18  ;;  %v3532_v48 = vor.u32 %v4063_v24, %v3529_v43  ;;  %2206 = vmatpush.bf16.msrb.mxu1 %v3528_v52  ;;  %v3512_v18 = vor.u32 %v4060_v16, %v3511_v14  ;;  %v4072_v24 = vld [vmem:[%s5700_s10 + $0x194] sm:$0xf0]  ;;  %v4055_v43 = vld [vmem:[%s5700_s10 + $0x114] sm:$0xf]  ;;  %v3735_v14 = vld [vmem:[%s5700_s10 + $0xf0] sm:$0xf] }
 0x158   : > { %2261 = vmatpush.bf16.msrb.mxu0 %v3612_v26  ;;  %2225 = vmatpush.bf16.msra.mxu2 %v3592_v59  ;;  %v3572_v59 = vor.u32 %v4073_v40, %v3569_v41  ;;  %v3500_v49 = vor.u32 %v4055_v43, %v3497_v44  ;;  %v4071_v52 = vld [vmem:[%s5700_s10 + $0x194] sm:$0xf]  ;;  %v3673_v22 = vld [vmem:[%s5700_s10 + $0x78] sm:$0xf0]  ;;  %v4036_v28 = vld [vmem:[%s5700_s10 + $0x74] sm:$0xf0] }
 0x159   : > { %v3564_v55 = vor.u32 %v4071_v52, %v3561_v39  ;;  %v3737_v34 = vld [vmem:[%s5700_s10 + $0xf8] sm:$0xf0] }
 0x15b   : > { %2243 = vmatpush.bf16.msra.mxu3 %v3540_v32  ;;  %2207 = vmatpush.bf16.msrb.mxu1 %v3520_v19  ;;  %v3568_v32 = vor.u32 %v4074_v12, %v3567_v63  ;;  %v3671_v12 = vld [vmem:[%s5700_s10 + $0x70] sm:$0xf] }
 0x15c   : > { %2262 = vmatpush.bf16.msrb.mxu0 %v3604_v42  ;;  %2226 = vmatpush.bf16.msra.mxu2 %v3584_v58  ;;  %v3559_v42 = vld [vmem:[%s5700_s10 + $0x190] sm:$0xf]  ;;  %v3672_v33 = vor.u32 %v4036_v28, %v3671_v12 }
 0x15e   : > { %1368 = vmatmul.bf16.gmra.mxu1 %v986_v47  ;;  %1387 = vmatmul.bf16.gmra.mxu2 %v986_v47 }
 0x15f   : > { %2244 = vmatpush.bf16.msra.mxu3 %v3532_v48  ;;  %2208 = vmatpush.bf16.msrb.mxu1 %v3512_v18  ;;  %v3560_v48 = vor.u32 %v4072_v24, %v3559_v42  ;;  %v4035_v18 = vld [vmem:[%s5700_s10 + $0x74] sm:$0xf] }
 0x160   : > { %v3676_v63 = vor.u32 %v4035_v18, %v3673_v22  ;;  %v4046_v22 = vld [vmem:[%s5700_s10 + $0xc4] sm:$0xf0] }
 0x163   : > { %2209 = vmatpush.bf16.msrb.mxu1 %v3504_v38 }
 0x166   : > { %1587 = vmatmul.bf16.gmra.mxu3 %v1428_v27  ;;  %1606 = vmatmul.bf16.gmra.mxu0 %v1428_v27  ;;  %v3596_v27 = vor.u32 %v4079_v50, %v3593_v15  ;;  %v3495_v50 = vld [vmem:[%s5700_s10 + $0x110] sm:$0xf]  ;;  %v4056_v15 = vld [vmem:[%s5700_s10 + $0x114] sm:$0xf0] }
 0x168   : > { %2263 = vmatpush.bf16.msrb.mxu0 %v3596_v27  ;;  %v3496_v27 = vor.u32 %v4056_v15, %v3495_v50  ;;  %v3663_v50 = vld [vmem:[%s5700_s10 + $0x60] sm:$0xf]  ;;  %v4034_v15 = vld [vmem:[%s5700_s10 + $0x64] sm:$0xf0] }
 0x169   : > { %v3664_v39 = vor.u32 %v4034_v15, %v3663_v50  ;;  %v4027_v50 = vld [vmem:[%s5700_s10 + $0x34] sm:$0xf]  ;;  %v3641_v15 = vld [vmem:[%s5700_s10 + $0x38] sm:$0xf0] }
 0x16a   : > { %2210 = vmatpush.bf16.msrb.mxu1 %v3496_v27 }
 0x16e   : > { %1700 = vmatmul.bf16.vlgmr.msra.gmra.mxu1 %v1455_v57  ;;  %1719 = vmatmul.bf16.vlgmr.msrb.gmra.mxu2 %v1455_v57 }
 0x176   : > { %1835 = vmatmul.bf16.vlgmr.msrb.gmra.mxu3 %v1457_v20  ;;  %1854 = vmatmul.bf16.vlgmr.msra.gmra.mxu0 %v1457_v20  ;;  %v3524_v20 = vor.u32 %v4061_v56, %v3521_v60  ;;  %v3551_v60 = vld [vmem:[%s5700_s10 + $0x180] sm:$0xf] }
 0x178   : > { %2245 = vmatpush.bf16.msra.mxu3 %v3524_v20 }
 0x17c   : > { %2246 = vmatpush.bf16.msra.mxu3 %v3516_v13  ;;  %v3553_v13 = vld [vmem:[%s5700_s10 + $0x188] sm:$0xf0] }
 0x17e   : > { %1705 = vmatmul.bf16.gmra.mxu1 %v1456_v2  ;;  %1724 = vmatmul.bf16.gmra.mxu2 %v1456_v2  ;;  %v3585_v2 = vld [vmem:[%s5700_s10 + $0x1c8] sm:$0xf0] }
 0x17f   : > { %v3588_v5 = vor.u32 %v4077_v0, %v3585_v2  ;;  %v3552_v0 = vor.u32 %v4070_v61, %v3551_v60  ;;  %v3489_v2 = vld [vmem:[%s5700_s10 + $0x108] sm:$0xf0]  ;;  %v3719_v61 = vld [vmem:[%s5700_s10 + $0xd0] sm:$0xf] }
 0x180   : > { %2247 = vmatpush.bf16.msra.mxu3 %v3508_v36  ;;  %v3492_v7 = vor.u32 %v4053_v62, %v3489_v2  ;;  %v3729_v60 = vld [vmem:[%s5700_s10 + $0xe8] sm:$0xf0] }
 0x181   : > { %2264 = vmatpush.bf16.msrb.mxu0 %v3588_v5  ;;  %v4054_v5 = vld [vmem:[%s5700_s10 + $0x104] sm:$0xf0] }
 0x184   : > { %2248 = vmatpush.bf16.msra.mxu3 %v3500_v49  ;;  %v3665_v49 = vld [vmem:[%s5700_s10 + $0x68] sm:$0xf0] }
 0x185   : > { %2265 = vmatpush.bf16.msrb.mxu0 %v3580_v23  ;;  %v3736_v23 = vor.u32 %v4052_v17, %v3735_v14  ;;  %v3721_v14 = vld [vmem:[%s5700_s10 + $0xd8] sm:$0xf0] }
 0x186   : > { %1840 = vmatmul.bf16.gmra.mxu3 %v1458_v6  ;;  %1859 = vmatmul.bf16.gmra.mxu0 %v1458_v6  ;;  %v4076_v6 = vld [vmem:[%s5700_s10 + $0x1b4] sm:$0xf0] }
 0x187   : > { %v3576_v10 = vor.u32 %v4076_v6, %v3575_v1  ;;  %v3487_v1 = vld [vmem:[%s5700_s10 + $0x100] sm:$0xf] }
 0x188   : > { %v1401_v6 = vld [vmem:[%s5697_s7] sm:$0x3]  ;;  %v3488_v8 = vor.u32 %v4054_v5, %v3487_v1  ;;  %2249 = vmatpush.bf16.msra.mxu3 %v3492_v7  ;;  %v4032_v7 = vld [vmem:[%s5700_s10 + $0x54] sm:$0xf0] }
 0x189   : > { %2227 = vmatpush.bf16.msra.mxu2 %v3576_v10  ;;  %2266 = vmatpush.bf16.msrb.mxu0 %v3572_v59  ;;  %v4069_v10 = vld [vmem:[%s5700_s10 + $0x184] sm:$0xf]  ;;  %v5065_v40 = vperm.slane %v1401_v6, 0  ;;  %v5069_v59 = vperm.slane %v1401_v6, 1  ;;  %v3655_v6 = vld [vmem:[%s5700_s10 + $0x50] sm:$0xf] }
 0x18a   : > { %v3556_v16 = vor.u32 %v4069_v10, %v3553_v13  ;;  %2211 = vmatpush.bf16.msrb.mxu1 %v3488_v8  ;;  %v3656_v10 = vor.u32 %v4032_v7, %v3655_v6  ;;  %v4047_v13 = vld [vmem:[%s5700_s10 + $0xd4] sm:$0xf]  ;;  %v4025_v7 = vld [vmem:[%s5700_s10 + $0x24] sm:$0xf] }
 0x18b   : > { %v3724_v18 = vor.u32 %v4047_v13, %v3721_v14 }
 0x18c   : > { %2478 = vmatpush.bf16.msrb.mxu3 %v3676_v63 }
 0x18d   : > { %2228 = vmatpush.bf16.msra.mxu2 %v3568_v32  ;;  %2267 = vmatpush.bf16.msrb.mxu0 %v3564_v55  ;;  %v4051_v32 = vld [vmem:[%s5700_s10 + $0xf4] sm:$0xf]  ;;  %v4049_v55 = vld [vmem:[%s5700_s10 + $0xe4] sm:$0xf] }
 0x18e   : > { %v3740_v36 = vor.u32 %v4051_v32, %v3737_v34  ;;  %2440 = vmatpush.bf16.msra.mxu1 %v3672_v33  ;;  %v3649_v33 = vld [vmem:[%s5700_s10 + $0x48] sm:$0xf0] }
 0x191   : > { %2229 = vmatpush.bf16.msra.mxu2 %v3560_v48  ;;  %2268 = vmatpush.bf16.msrb.mxu0 %v3556_v16  ;;  %v3711_v16 = vld [vmem:[%s5700_s10 + $0xc0] sm:$0xf] }
 0x192   : > { %2441 = vmatpush.bf16.msra.mxu1 %v3664_v39  ;;  %v3712_v32 = vor.u32 %v4046_v22, %v3711_v16 }
 0x195   : > { %2230 = vmatpush.bf16.msra.mxu2 %v3552_v0  ;;  %2497 = vmatpush.bf16.msra.mxu0 %v3740_v36  ;;  %v3657_v0 = vld [vmem:[%s5700_s10 + $0x58] sm:$0xf0]  ;;  %v4030_v36 = vld [vmem:[%s5700_s10 + $0x44] sm:$0xf0] }
 0x196   : > { %2442 = vmatpush.bf16.msra.mxu1 %v3656_v10 }
 0x199   : > { %2459 = vmatpush.bf16.msrb.mxu2 %v3736_v23  ;;  %v4029_v23 = vld [vmem:[%s5700_s10 + $0x44] sm:$0xf] }
 0x1ab   : > { %v4845_v29 = vpop.f32.mrf.mxu1 }
 0x1b1   : > { %v4859_v21 = vpop.f32.mrf.mxu2 }
 0x1b3   : > { %v4879_v46 = vpop.f32.mrf.mxu1  ;;  %v4881_v47 = vpop.f32.mrf.mxu0 }
 0x1b4   : > { %v1249_v35 = vadd.f32 %v4881_v47, %v4859_v21  ;;  %v3727_v21 = vld [vmem:[%s5700_s10 + $0xe0] sm:$0xf]  ;;  %v4050_v47 = vld [vmem:[%s5700_s10 + $0xe4] sm:$0xf0] }
 0x1b5   : > { %v3728_v48 = vor.u32 %v4050_v47, %v3727_v21 }
 0x1b7   : > { %2460 = vmatpush.bf16.msrb.mxu2 %v3728_v48  ;;  %v4044_v48 = vld [vmem:[%s5700_s10 + $0xb4] sm:$0xf0] }
 0x1b9   : > { %v4892_v53 = vpop.f32.mrf.mxu2  ;;  %v4894_v54 = vpop.f32.mrf.mxu3 }
 0x1ba   : > { %v1230_v38 = vadd.f32 %v4894_v54, %v4845_v29  ;;  %v4033_v29 = vld [vmem:[%s5700_s10 + $0x64] sm:$0xf] }
 0x1bb   : > { %v4905_v57 = vpop.f32.mrf.mxu1  ;;  %v4907_v4 = vpop.f32.mrf.mxu0  ;;  %v3668_v27 = vor.u32 %v4033_v29, %v3665_v49 }
 0x1bc   : > { %v1251_v17 = vadd.f32 %v4907_v4, %v4892_v53  ;;  %v3647_v53 = vld [vmem:[%s5700_s10 + $0x40] sm:$0xf] }
 0x1bd   : > { %2479 = vmatpush.bf16.msrb.mxu3 %v3668_v27  ;;  %v3648_v29 = vor.u32 %v4030_v36, %v3647_v53 }
 0x1bf   : > { %2443 = vmatpush.bf16.msra.mxu1 %v3648_v29  ;;  %v4023_v29 = vld [vmem:[%s5700_s10 + $0x14] sm:$0xf] }
 0x1c1   : > { %v4948_v25 = vpop.f32.mrf.mxu2  ;;  %v4950_v26 = vpop.f32.mrf.mxu3 }
 0x1c2   : > { %v1232_v52 = vadd.f32 %v4950_v26, %v4879_v46  ;;  %v4048_v46 = vld [vmem:[%s5700_s10 + $0xd4] sm:$0xf0]  ;;  %v4031_v26 = vld [vmem:[%s5700_s10 + $0x54] sm:$0xf] }
 0x1c3   : > { %v4961_v30 = vpop.f32.mrf.mxu1  ;;  %v4963_v31 = vpop.f32.mrf.mxu0  ;;  %v3720_v1 = vor.u32 %v4048_v46, %v3719_v61  ;;  %v3660_v5 = vor.u32 %v4031_v26, %v3657_v0  ;;  %v4043_v61 = vld [vmem:[%s5700_s10 + $0xb4] sm:$0xf]  ;;  %v3695_v26 = vld [vmem:[%s5700_s10 + $0xa0] sm:$0xf]  ;;  %v4042_v0 = vld [vmem:[%s5700_s10 + $0xa4] sm:$0xf0] }
 0x1c4   : > { %v3696_v16 = vor.u32 %v4042_v0, %v3695_v26  ;;  %v4116_v26 = vld [vmem:[%s5700_s10 + $0x2f4] sm:$0xf0] }
 0x1c5   : > { %2461 = vmatpush.bf16.msrb.mxu2 %v3720_v1  ;;  %2480 = vmatpush.bf16.msrb.mxu3 %v3660_v5  ;;  %v1254_v5 = vadd.f32 %v4963_v31, %v4948_v25  ;;  %v4026_v25 = vld [vmem:[%s5700_s10 + $0x24] sm:$0xf0]  ;;  %v4041_v31 = vld [vmem:[%s5700_s10 + $0xa4] sm:$0xf] }
 0x1c9   : > { %v5004_v56 = vpop.f32.mrf.mxu2  ;;  %v5006_v58 = vpop.f32.mrf.mxu3  ;;  %2462 = vmatpush.bf16.msrb.mxu2 %v3712_v32  ;;  %v3687_v32 = vld [vmem:[%s5700_s10 + $0x90] sm:$0xf] }
 0x1ca   : > { %v1235_v27 = vadd.f32 %v5006_v58, %v4905_v57  ;;  %v3644_v57 = vor.u32 %v4027_v50, %v3641_v15  ;;  %v3689_v15 = vld [vmem:[%s5700_s10 + $0x98] sm:$0xf0] }
 0x1cb   : > { %v5017_v20 = vpop.f32.mrf.mxu0  ;;  %v1364_v19 = vpop.f32.mrf.mxu1 }
 0x1cc   : > { %v1393_v54 = vadd.f32 %v1364_v19, %v1230_v38  ;;  %v3732_v19 = vor.u32 %v4049_v55, %v3729_v60  ;;  %v4045_v38 = vld [vmem:[%s5700_s10 + $0xc4] sm:$0xf]  ;;  %v4028_v60 = vld [vmem:[%s5700_s10 + $0x34] sm:$0xf0] }
 0x1ce   : > { %v1407_v8 = vadd.f32 %v5065_v40, %v1393_v54  ;;  %2498 = vmatpush.bf16.msra.mxu0 %v3732_v19 }
 0x1d1   : > { %v5067_v41 = vpop.f32.mrf.mxu3  ;;  %v1383_v42 = vpop.f32.mrf.mxu2 }
 0x1d2   : > { %v1394_v24 = vadd.f32 %v1383_v42, %v1249_v35  ;;  %v3652_v35 = vor.u32 %v4029_v23, %v3649_v33  ;;  %v3713_v42 = vld [vmem:[%s5700_s10 + $0xc8] sm:$0xf0]  ;;  %2499 = vmatpush.bf16.msra.mxu0 %v3724_v18  ;;  %v4040_v33 = vld [vmem:[%s5700_s10 + $0x94] sm:$0xf0]  ;;  %v1237_v53 = vadd.f32 %v5067_v41, %v4961_v30  ;;  %v3625_v30 = vld [vmem:[%s5700_s10 + $0x18] sm:$0xf0] }
 0x1d3   : > { %v1366_v43 = vpop.f32.mrf.mxu1  ;;  %v5080_v44 = vpop.f32.mrf.mxu0  ;;  %v3716_v54 = vor.u32 %v4045_v38, %v3713_v42 }
 0x1d4   : > { %v1408_v62 = vadd.f32 %v5069_v59, %v1394_v24  ;;  %v1395_v2 = vadd.f32 %v1366_v43, %v1232_v52  ;;  %v1887_v24 = vmax.f32 %v1407_v8, 0.0  ;;  %v3703_v43 = vld [vmem:[%s5700_s10 + $0xb0] sm:$0xf]  ;;  %2481 = vmatpush.bf16.msrb.mxu3 %v3652_v35  ;;  %v3633_v8 = vld [vmem:[%s5700_s10 + $0x28] sm:$0xf0] }
 0x1d5   : > { %v3639_v52 = vld [vmem:[%s5700_s10 + $0x30] sm:$0xf]  ;;  %v3704_v55 = vor.u32 %v4044_v48, %v3703_v43  ;;  %v3636_v36 = vor.u32 %v4025_v7, %v3633_v8  ;;  %v4024_v48 = vld [vmem:[%s5700_s10 + $0x14] sm:$0xf0] }
 0x1d6   : > { %v1888_v63 = vmax.f32 %v1408_v62, 0.0  ;;  %v1409_v4 = vadd.f32 %v5065_v40, %v1395_v2  ;;  %v3705_v62 = vld [vmem:[%s5700_s10 + $0xb8] sm:$0xf0]  ;;  %v3640_v58 = vor.u32 %v4028_v60, %v3639_v52  ;;  %2500 = vmatpush.bf16.msra.mxu0 %v3716_v54  ;;  %v3688_v54 = vor.u32 %v4040_v33, %v3687_v32  ;;  %v3623_v43 = vld [vmem:[%s5700_s10 + $0x10] sm:$0xf] }
 0x1d7   : > { %v3708_v1 = vor.u32 %v4043_v61, %v3705_v62  ;;  %2463 = vmatpush.bf16.msrb.mxu2 %v3704_v55  ;;  %v3679_v52 = vld [vmem:[%s5700_s10 + $0x80] sm:$0xf]  ;;  %v4021_v60 = vld [vmem:[%s5700_s10 + $0x4] sm:$0xf]  ;;  %v3617_v61 = vld [vmem:[%s5700_s10 + $0x8] sm:$0xf0]  ;;  %v1256_v62 = vadd.f32 %v5017_v20, %v5004_v56 }
 0x1d8   : > { %v1895_v39 = vpack.c.bf16 %v1888_v63, %v1887_v24  ;;  %v1889_v19 = vmax.f32 %v1409_v4, 0.0  ;;  %2482 = vmatpush.bf16.msrb.mxu3 %v3644_v57  ;;  %2444 = vmatpush.bf16.msra.mxu1 %v3640_v58  ;;  %v3615_v57 = vld [vmem:[%s5700_s10] sm:$0xf]  ;;  %v3895_v58 = vld [vmem:[%s5700_s10 + $0x2f0] sm:$0xf] }
 0x1d9   : > { %v1385_v12 = vpop.f32.mrf.mxu2  ;;  %v5136_v28 = vpop.f32.mrf.mxu3  ;;  %v3887_v33 = vld [vmem:[%s5700_s10 + $0x2e0] sm:$0xf] }
 0x1da   : > { %v1396_v34 = vadd.f32 %v1385_v12, %v1251_v17  ;;  %v1903_v10 = vunpack.c.l.b16 %v1895_v39  ;;  %v3631_v17 = vld [vmem:[%s5700_s10 + $0x20] sm:$0xf]  ;;  %v1904_v18 = vunpack.c.h.b16 %v1895_v39  ;;  %v3697_v12 = vld [vmem:[%s5700_s10 + $0xa8] sm:$0xf0]  ;;  %2501 = vmatpush.bf16.msra.mxu0 %v3708_v1  ;;  %v4022_v1 = vld [vmem:[%s5700_s10 + $0x4] sm:$0xf0] }
 0x1db   : > { %v1369_v21 = vpop.f32.mrf.mxu1  ;;  %v5154_v47 = vpop.f32.mrf.mxu0  ;;  %2464 = vmatpush.bf16.msrb.mxu2 %v3696_v16  ;;  %v3700_v41 = vor.u32 %v4041_v31, %v3697_v12  ;;  %v3833_v16 = vld [vmem:[%s5700_s10 + $0x278] sm:$0xf0]  ;;  %v3616_v32 = vor.u32 %v4022_v1, %v3615_v57  ;;  %v4095_v57 = vld [vmem:[%s5700_s10 + $0x254] sm:$0xf] }
 0x1dc   : > { %v1410_v49 = vadd.f32 %v5069_v59, %v1396_v34  ;;  %v1397_v2 = vadd.f32 %v1369_v21, %v1235_v27  ;;  %v3632_v21 = vor.u32 %v4026_v25, %v3631_v17  ;;  %v4038_v27 = vld [vmem:[%s5700_s10 + $0x84] sm:$0xf0]  ;;  %2483 = vmatpush.bf16.msrb.mxu3 %v3636_v36  ;;  %v3831_v17 = vld [vmem:[%s5700_s10 + $0x270] sm:$0xf] }
 0x1dd   : > { %v3680_v20 = vor.u32 %v4038_v27, %v3679_v52 }
 0x1de   : > { %v1890_v46 = vmax.f32 %v1410_v49, 0.0  ;;  %v5220_v4 = vadd.f32 %v5065_v40, %v1397_v2  ;;  %v4039_v49 = vld [vmem:[%s5700_s10 + $0x94] sm:$0xf]  ;;  %2445 = vmatpush.bf16.msra.mxu1 %v3632_v21  ;;  %2502 = vmatpush.bf16.msra.mxu0 %v3700_v41 }
 0x1df   : > { %2465 = vmatpush.bf16.msrb.mxu2 %v3688_v54  ;;  %v3692_v56 = vor.u32 %v4039_v49, %v3689_v15  ;;  %v3823_v54 = vld [vmem:[%s5700_s10 + $0x260] sm:$0xf]  ;;  %v4113_v49 = vld [vmem:[%s5700_s10 + $0x2e4] sm:$0xf] }
 0x1e0   : > { %v1896_v6 = vpack.c.bf16 %v1890_v46, %v1889_v19  ;;  %v1891_v39 = vmax.f32 %v5220_v4, 0.0  ;;  %v3628_v19 = vor.u32 %v4023_v29, %v3625_v30  ;;  %v3624_v46 = vor.u32 %v4024_v48, %v3623_v43  ;;  %v4097_v29 = vld [vmem:[%s5700_s10 + $0x264] sm:$0xf]  ;;  %v3825_v30 = vld [vmem:[%s5700_s10 + $0x268] sm:$0xf0] }
 0x1e1   : > { %v1388_v13 = vpop.f32.mrf.mxu2  ;;  %v5197_v14 = vpop.f32.mrf.mxu3  ;;  %v4098_v48 = vld [vmem:[%s5700_s10 + $0x264] sm:$0xf0] }
 0x1e2   : > { %v1905_v22 = vunpack.c.l.b16 %v1896_v6  ;;  %v1906_v23 = vunpack.c.h.b16 %v1896_v6  ;;  %v1398_v63 = vadd.f32 %v1388_v13, %v1254_v5  ;;  %v4037_v5 = vld [vmem:[%s5700_s10 + $0x84] sm:$0xf]  ;;  %v3681_v6 = vld [vmem:[%s5700_s10 + $0x88] sm:$0xf0]  ;;  %v4099_v13 = vld [vmem:[%s5700_s10 + $0x274] sm:$0xf]  ;;  %2484 = vmatpush.bf16.msrb.mxu3 %v3628_v19  ;;  %2446 = vmatpush.bf16.msra.mxu1 %v3624_v46 }
 0x1e3   : > { %v1371_v34 = vpop.f32.mrf.mxu1  ;;  %v5222_v35 = vpop.f32.mrf.mxu0  ;;  %2503 = vmatpush.bf16.msra.mxu0 %v3692_v56  ;;  %2466 = vmatpush.bf16.msrb.mxu2 %v3680_v20  ;;  %v3836_v36 = vor.u32 %v4099_v13, %v3833_v16  ;;  %v4112_v46 = vld [vmem:[%s5700_s10 + $0x2d4] sm:$0xf0]  ;;  %v3824_v20 = vor.u32 %v4098_v48, %v3823_v54  ;;  %v3863_v54 = vld [vmem:[%s5700_s10 + $0x2b0] sm:$0xf] }
 0x1e4   : > { %v1412_v38 = vadd.f32 %v5069_v59, %v1398_v63  ;;  %v5225_v42 = vpack.c.b16 %v1905_v22, %v1903_v10  ;;  %v5227_v24 = vpack.c.b16 %v1906_v23, %v1904_v18  ;;  %v1399_v50 = vadd.f32 %v1371_v34, %v1237_v53  ;;  %v4115_v22 = vld [vmem:[%s5700_s10 + $0x2f4] sm:$0xf]  ;;  %v3897_v23 = vld [vmem:[%s5700_s10 + $0x2f8] sm:$0xf0]  ;;  %v4114_v53 = vld [vmem:[%s5700_s10 + $0x2e4] sm:$0xf0] }
 0x1e5   : > { %v3896_v10 = vor.u32 %v4116_v26, %v3895_v58  ;;  %v3620_v18 = vor.u32 %v4021_v60, %v3617_v61  ;;  %v3684_v34 = vor.u32 %v4037_v5, %v3681_v6  ;;  %v3900_v21 = vor.u32 %v4115_v22, %v3897_v23  ;;  %v3817_v58 = vld [vmem:[%s5700_s10 + $0x258] sm:$0xf0]  ;;  %v4096_v13 = vld [vmem:[%s5700_s10 + $0x254] sm:$0xf0]  ;;  %v4093_v22 = vld [vmem:[%s5700_s10 + $0x244] sm:$0xf] }
 0x1e6   : > { %2212 = vmatmul.bf16.vlgmr.msrb.gmra.mxu1 %v5225_v42  ;;  %2231 = vmatmul.bf16.vlgmr.msra.gmra.mxu2 %v5227_v24  ;;  %v1892_v55 = vmax.f32 %v1412_v38, 0.0  ;;  %v1413_v7 = vadd.f32 %v5065_v40, %v1399_v50  ;;  %v4100_v40 = vld [vmem:[%s5700_s10 + $0x274] sm:$0xf0]  ;;  %v3888_v41 = vor.u32 %v4114_v53, %v3887_v33  ;;  %v3889_v50 = vld [vmem:[%s5700_s10 + $0x2e8] sm:$0xf0]  ;;  %v1916_v56 = vshrl.u32 %v5225_v42, 16 }
 0x1e7   : > { %2250 = vmatmul.bf16.vlgmr.msra.gmra.mxu3 %v5225_v42  ;;  %2269 = vmatmul.bf16.vlgmr.msrb.gmra.mxu0 %v5227_v24  ;;  %v3892_v1 = vor.u32 %v4113_v49, %v3889_v50  ;;  %v3809_v23 = vld [vmem:[%s5700_s10 + $0x248] sm:$0xf0]  ;;  %v1919_v33 = vshll.u32 %v5225_v42, 16  ;;  %v1926_v53 = vshll.u32 %v5227_v24, 16  ;;  %v4108_v49 = vld [vmem:[%s5700_s10 + $0x2b4] sm:$0xf0] }
 0x1e8   : > { %v1897_v4 = vpack.c.bf16 %v1892_v55, %v1891_v39  ;;  %2728 = vmatpush.bf16.msra.mxu2 %v3896_v10  ;;  %2485 = vmatpush.bf16.msrb.mxu3 %v3620_v18  ;;  %v3828_v39 = vor.u32 %v4097_v29, %v3825_v30  ;;  %v3879_v55 = vld [vmem:[%s5700_s10 + $0x2d0] sm:$0xf]  ;;  %v3871_v18 = vld [vmem:[%s5700_s10 + $0x2c0] sm:$0xf]  ;;  %v3812_v29 = vor.u32 %v4093_v22, %v3809_v23  ;;  %v4109_v30 = vld [vmem:[%s5700_s10 + $0x2c4] sm:$0xf] }
 0x1e9   : > { %v1390_v0 = vpop.f32.mrf.mxu2  ;;  %v5275_v2 = vpop.f32.mrf.mxu3  ;;  %2447 = vmatpush.bf16.msra.mxu1 %v3616_v32  ;;  %2504 = vmatpush.bf16.msra.mxu0 %v3684_v34  ;;  %v3815_v10 = vld [vmem:[%s5700_s10 + $0x250] sm:$0xf]  ;;  %v3880_v16 = vor.u32 %v4112_v46, %v3879_v55  ;;  %v4091_v50 = vld [vmem:[%s5700_s10 + $0x234] sm:$0xf]  ;;  %v4092_v46 = vld [vmem:[%s5700_s10 + $0x234] sm:$0xf0] }
 0x1ea   : > { %v1400_v8 = vadd.f32 %v1390_v0, %v1256_v62  ;;  %v1907_v15 = vunpack.c.l.b16 %v1897_v4  ;;  %v1908_v60 = vunpack.c.h.b16 %v1897_v4  ;;  %v3816_v4 = vor.u32 %v4096_v13, %v3815_v10  ;;  %v3793_v10 = vld [vmem:[%s5700_s10 + $0x228] sm:$0xf0] }
 0x1eb   : > { %v5296_v25 = vpop.f32.mrf.mxu0  ;;  %v1701_v31 = vpop.f32.mrf.mxu1 }
 0x1ec   : > { %v1414_v63 = vadd.f32 %v5069_v59, %v1400_v8  ;;  %v5309_v12 = vadd.f32 %v1701_v31, %v5136_v28  ;;  %v1893_v59 = vmax.f32 %v1413_v7, 0.0  ;;  %v3832_v28 = vor.u32 %v4100_v40, %v3831_v17  ;;  %2747 = vmatpush.bf16.msra.mxu3 %v3836_v36  ;;  %2729 = vmatpush.bf16.msra.mxu2 %v3888_v41  ;;  %v3881_v31 = vld [vmem:[%s5700_s10 + $0x2d8] sm:$0xf0]  ;;  %v4110_v40 = vld [vmem:[%s5700_s10 + $0x2c4] sm:$0xf0] }
 0x1ed   : > { %2766 = vmatpush.bf16.msrb.mxu0 %v3900_v21  ;;  %v3820_v17 = vor.u32 %v4095_v57, %v3817_v58  ;;  %v3807_v36 = vld [vmem:[%s5700_s10 + $0x240] sm:$0xf]  ;;  %v3872_v21 = vor.u32 %v4110_v40, %v3871_v18  ;;  %v3873_v41 = vld [vmem:[%s5700_s10 + $0x2c8] sm:$0xf0]  ;;  %v3864_v57 = vor.u32 %v4108_v49, %v3863_v54  ;;  %v4090_v18 = vld [vmem:[%s5700_s10 + $0x224] sm:$0xf0] }
 0x1ee   : > { %v1894_v38 = vmax.f32 %v1414_v63, 0.0  ;;  %2709 = vmatpush.bf16.msrb.mxu1 %v3832_v28  ;;  %v5391_v63 = vrot.slane %v1916_v56, 7 }
 0x1f0   : > { %v1898_v43 = vpack.c.bf16 %v1894_v38, %v1893_v59  ;;  %2748 = vmatpush.bf16.msra.mxu3 %v3828_v39  ;;  %v4094_v59 = vld [vmem:[%s5700_s10 + $0x244] sm:$0xf0]  ;;  %2730 = vmatpush.bf16.msra.mxu2 %v3880_v16 }
 0x1f1   : > { %v5335_v52 = vpop.f32.mrf.mxu3  ;;  %v1720_v27 = vpop.f32.mrf.mxu2  ;;  %2767 = vmatpush.bf16.msrb.mxu0 %v3892_v1  ;;  %v3808_v55 = vor.u32 %v4094_v59, %v3807_v36  ;;  %v4089_v1 = vld [vmem:[%s5700_s10 + $0x224] sm:$0xf]  ;;  %v3847_v36 = vld [vmem:[%s5700_s10 + $0x290] sm:$0xf] }
 0x1f2   : > { %v1909_v61 = vunpack.c.l.b16 %v1898_v43  ;;  %v1910_v62 = vunpack.c.h.b16 %v1898_v43  ;;  %v1721_v19 = vadd.f32 %v1720_v27, %v5080_v44  ;;  %v1923_v44 = vshrl.u32 %v5227_v24, 16  ;;  %2710 = vmatpush.bf16.msrb.mxu1 %v3824_v20  ;;  %v4106_v20 = vld [vmem:[%s5700_s10 + $0x2a4] sm:$0xf0] }
 0x1f3   : > { %v1703_v26 = vpop.f32.mrf.mxu1  ;;  %v1855_v0 = vpop.f32.mrf.mxu0 }
 0x1f4   : > { %v5353_v5 = vadd.f32 %v1703_v26, %v5197_v14  ;;  %v5355_v6 = vadd.f32 %v1855_v0, %v1721_v19  ;;  %v5357_v7 = vpack.c.b16 %v1909_v61, %v1907_v15  ;;  %v5359_v8 = vpack.c.b16 %v1910_v62, %v1908_v60  ;;  %v4111_v14 = vld [vmem:[%s5700_s10 + $0x2d4] sm:$0xf]  ;;  %2749 = vmatpush.bf16.msra.mxu3 %v3820_v17  ;;  %v3801_v15 = vld [vmem:[%s5700_s10 + $0x238] sm:$0xf0]  ;;  %v3799_v19 = vld [vmem:[%s5700_s10 + $0x230] sm:$0xf] }
 0x1f5   : > { %v5395_v32 = vrot.slane %v1923_v44, 7  ;;  %v3884_v34 = vor.u32 %v4111_v14, %v3881_v31  ;;  %v3876_v62 = vor.u32 %v4109_v30, %v3873_v41  ;;  %2731 = vmatpush.bf16.msra.mxu2 %v3872_v21  ;;  %v3804_v58 = vor.u32 %v4091_v50, %v3801_v15  ;;  %v3865_v26 = vld [vmem:[%s5700_s10 + $0x2b8] sm:$0xf0]  ;;  %v3855_v0 = vld [vmem:[%s5700_s10 + $0x2a0] sm:$0xf] }
 0x1f6   : > { %2217 = vmatmul.bf16.gmra.mxu1 %v5357_v7  ;;  %2236 = vmatmul.bf16.gmra.mxu2 %v5359_v8  ;;  %v3800_v17 = vor.u32 %v4092_v46, %v3799_v19  ;;  %v3791_v31 = vld [vmem:[%s5700_s10 + $0x220] sm:$0xf]  ;;  %v3856_v23 = vor.u32 %v4106_v20, %v3855_v0  ;;  %v4087_v21 = vld [vmem:[%s5700_s10 + $0x214] sm:$0xf]  ;;  %v3783_v15 = vld [vmem:[%s5700_s10 + $0x210] sm:$0xf] }
 0x1f7   : > { %2255 = vmatmul.bf16.gmra.mxu3 %v5357_v7  ;;  %2274 = vmatmul.bf16.gmra.mxu0 %v5359_v8  ;;  %v3792_v49 = vor.u32 %v4090_v18, %v3791_v31  ;;  %v4085_v19 = vld [vmem:[%s5700_s10 + $0x204] sm:$0xf]  ;;  %v3777_v46 = vld [vmem:[%s5700_s10 + $0x208] sm:$0xf0]  ;;  %v1933_v31 = vshll.u32 %v5357_v7, 16  ;;  %v1941_v18 = vshll.u32 %v5359_v8, 16 }
 0x1f8   : > { %2711 = vmatpush.bf16.msrb.mxu1 %v3816_v4  ;;  %2768 = vmatpush.bf16.msrb.mxu0 %v3884_v34  ;;  %v3796_v4 = vor.u32 %v4089_v1, %v3793_v10  ;;  %v3857_v34 = vld [vmem:[%s5700_s10 + $0x2a8] sm:$0xf0]  ;;  %v3780_v20 = vor.u32 %v4085_v19, %v3777_v46  ;;  %v4086_v1 = vld [vmem:[%s5700_s10 + $0x204] sm:$0xf0]  ;;  %v4101_v10 = vld [vmem:[%s5700_s10 + $0x284] sm:$0xf] }
 0x1f9   : > { %v1722_v38 = vpop.f32.mrf.mxu2  ;;  %v1836_v28 = vpop.f32.mrf.mxu3  ;;  %2750 = vmatpush.bf16.msra.mxu3 %v3812_v29  ;;  %2732 = vmatpush.bf16.msra.mxu2 %v3864_v57  ;;  %v3785_v29 = vld [vmem:[%s5700_s10 + $0x218] sm:$0xf0]  ;;  %v3860_v50 = vor.u32 %v4105_v37, %v3857_v34 }
 0x1fa   : > { %v1723_v43 = vadd.f32 %v1722_v38, %v5154_v47  ;;  %v5416_v48 = vadd.f32 %v1836_v28, %v5309_v12  ;;  %v1921_v47 = vor.u32 %v1919_v33, %v5391_v63  ;;  %v1928_v12 = vor.u32 %v1926_v53, %v5395_v32  ;;  %v4104_v28 = vld [vmem:[%s5700_s10 + $0x294] sm:$0xf0] }
 0x1fb   : > { %v1706_v27 = vpop.f32.mrf.mxu1  ;;  %v1857_v39 = vpop.f32.mrf.mxu0  ;;  %v3848_v45 = vor.u32 %v4104_v28, %v3847_v36  ;;  %v1955_v28 = vrot.slane %v1926_v53, 1 }
 0x1fc   : > { %v5434_v60 = vadd.f32 %v1706_v27, %v5275_v2  ;;  %v5436_v61 = vadd.f32 %v1857_v39, %v1723_v43  ;;  %v4107_v2 = vld [vmem:[%s5700_s10 + $0x2b4] sm:$0xf]  ;;  %v1949_v13 = vsel %vm4344_vm9, 0, %v1921_v47  ;;  %v1950_v16 = vsel %vm4344_vm9, 0, %v1928_v12  ;;  %2712 = vmatpush.bf16.msrb.mxu1 %v3808_v55  ;;  %2769 = vmatpush.bf16.msrb.mxu0 %v3876_v62  ;;  %v4088_v27 = vld [vmem:[%s5700_s10 + $0x214] sm:$0xf0] }
 0x1fd   : > { %v3868_v14 = vor.u32 %v4107_v2, %v3865_v26  ;;  %2751 = vmatpush.bf16.msra.mxu3 %v3804_v58  ;;  %v1967_v41 = vsel %vm4365_vm12, 0, %v1949_v13  ;;  %v1938_v43 = vshrl.u32 %v5359_v8, 16  ;;  %2733 = vmatpush.bf16.msra.mxu2 %v3856_v23  ;;  %v3788_v39 = vor.u32 %v4087_v21, %v3785_v29  ;;  %v4103_v47 = vld [vmem:[%s5700_s10 + $0x294] sm:$0xf]  ;;  %v3849_v12 = vld [vmem:[%s5700_s10 + $0x298] sm:$0xf0] }
 0x1fe   : > { %v3839_v55 = vld [vmem:[%s5700_s10 + $0x280] sm:$0xf]  ;;  %v4102_v62 = vld [vmem:[%s5700_s10 + $0x284] sm:$0xf0]  ;;  %v3784_v57 = vor.u32 %v4088_v27, %v3783_v15  ;;  %v3852_v58 = vor.u32 %v4103_v47, %v3849_v12  ;;  %v3841_v13 = vld [vmem:[%s5700_s10 + $0x288] sm:$0xf0]  ;;  %v1956_v29 = vor.u32 %v1955_v28, %v1923_v44 }
 0x1ff   : > { %v3775_v2 = vld [vmem:[%s5700_s10 + $0x200] sm:$0xf]  ;;  %v3840_v0 = vor.u32 %v4102_v62, %v3839_v55  ;;  %v1953_v21 = vrot.slane %v1933_v31, 1 }
 0x200   : > { %2713 = vmatpush.bf16.msrb.mxu1 %v3800_v17  ;;  %2770 = vmatpush.bf16.msrb.mxu0 %v3868_v14  ;;  %v1940_v14 = vrot.slane %v1938_v43, 7  ;;  %v2793_v28 = vld [vmem:[%s5701_s11] sm:$0x3] }
 0x201   : > { %v1725_v40 = vpop.f32.mrf.mxu2  ;;  %v1838_v22 = vpop.f32.mrf.mxu3  ;;  %2752 = vmatpush.bf16.msra.mxu3 %v3796_v4  ;;  %2734 = vmatpush.bf16.msra.mxu2 %v3848_v45 }
 0x202   : > { %v1726_v59 = vadd.f32 %v1725_v40, %v5222_v35  ;;  %v5483_v38 = vadd.f32 %v1838_v22, %v5353_v5  ;;  %v1968_v35 = vsel %vm4365_vm12, 0, %v1950_v16  ;;  %v1930_v5 = vshrl.u32 %v5357_v7, 16 }
 0x203   : > { %v1860_v30 = vpop.f32.mrf.mxu0  ;;  %v3776_v40 = vor.u32 %v4086_v1, %v3775_v2  ;;  %v3844_v22 = vor.u32 %v4101_v10, %v3841_v13  ;;  %v1943_v4 = vor.u32 %v1941_v18, %v1940_v14  ;;  %v5581_v7 = vpop.f32.mrf.mxu1 }
 0x204   : > { %v5499_v54 = vadd.f32 %v1860_v30, %v1726_v59  ;;  %2714 = vmatpush.bf16.msrb.mxu1 %v3792_v49  ;;  %2771 = vmatpush.bf16.msrb.mxu0 %v3860_v50  ;;  %v1932_v17 = vrot.slane %v1930_v5, 7  ;;  %v1951_v59 = vrot.slane %v1919_v33, 1  ;;  %v1959_v42 = vor.u32 %v1953_v21, %v1930_v5 }
 0x205   : > { %2753 = vmatpush.bf16.msra.mxu3 %v3788_v39  ;;  %2735 = vmatpush.bf16.msra.mxu2 %v3840_v0  ;;  %v1944_v37 = vsel %vm644_vm5, %v5395_v32, %v1943_v4 }
 0x206   : > { %2448 = vmatmul.bf16.vlgmr.msra.gmra.mxu1 %v1967_v41  ;;  %2467 = vmatmul.bf16.vlgmr.msrb.gmra.mxu2 %v1968_v35  ;;  %v1935_v23 = vor.u32 %v1933_v31, %v1932_v17  ;;  %v1970_v36 = vsel %vm4407_vm6, 0, %v1944_v37  ;;  %v1952_v32 = vor.u32 %v1951_v59, %v1916_v56  ;;  %v1965_v56 = vsel %vm4416_vm15, %v1959_v42, 0 }
 0x207   : > { %2486 = vmatmul.bf16.vlgmr.msrb.gmra.mxu3 %v1967_v41  ;;  %2505 = vmatmul.bf16.vlgmr.msra.gmra.mxu0 %v1968_v35  ;;  %v1973_v51 = vsel %vm4426_vm2, 0, %v1965_v56 }
 0x208   : > { %2715 = vmatpush.bf16.msrb.mxu1 %v3784_v57  ;;  %2772 = vmatpush.bf16.msrb.mxu0 %v3852_v58  ;;  %v1954_v3 = vsel %vm665_vm13, %v1952_v32, %v1953_v21 }
 0x209   : > { %v1841_v26 = vpop.f32.mrf.mxu3  ;;  %2754 = vmatpush.bf16.msra.mxu3 %v3780_v20  ;;  %v1971_v41 = vsel %vm4381_vm1, 0, %v1954_v3  ;;  %v5585_v35 = vpop.f32.mrf.mxu2 }
 0x20a   : > { %v5539_v16 = vadd.f32 %v1841_v26, %v5434_v60  ;;  %v1936_v60 = vsel %vm644_vm5, %v5391_v63, %v1935_v23  ;;  %v1957_v63 = vrot.slane %v1941_v18, 1 }
 0x20b   : > { %v1969_v34 = vsel %vm4407_vm6, 0, %v1936_v60  ;;  %v5583_v8 = vpop.f32.mrf.mxu0 }
 0x20c   : > { %2716 = vmatpush.bf16.msrb.mxu1 %v3776_v40  ;;  %2773 = vmatpush.bf16.msrb.mxu0 %v3844_v22  ;;  %v1958_v30 = vsel %vm665_vm13, %v1956_v29, %v1957_v63  ;;  %v1960_v24 = vor.u32 %v1957_v63, %v1938_v43  ;;  %v1873_v63 = vld [vmem:[%s5699_s9] sm:$0x3] }
 0x20d   : > { %v1972_v33 = vsel %vm4381_vm1, 0, %v1958_v30  ;;  %v5623_v29 = vperm.slane %v1873_v63, 0  ;;  %v5627_v42 = vperm.slane %v1873_v63, 1 }
 0x20e   : > { %v1966_v44 = vsel %vm4416_vm15, %v1960_v24, 0 }
 0x20f   : > { %v1974_v53 = vsel %vm4426_vm2, 0, %v1966_v44  ;;  %v5629_v44 = vperm.slane %v2793_v28, 1 }
 0x211   : > { %v5587_v5 = vpop.f32.mrf.mxu3 }
 0x216   : > { %2453 = vmatmul.bf16.gmra.mxu1 %v1969_v34  ;;  %2472 = vmatmul.bf16.gmra.mxu2 %v1970_v36 }
 0x217   : > { %2491 = vmatmul.bf16.gmra.mxu3 %v1969_v34  ;;  %2510 = vmatmul.bf16.gmra.mxu0 %v1970_v36 }
 0x226   : > { %2717 = vmatmul.bf16.vlgmr.msrb.gmra.mxu1 %v1971_v41  ;;  %2736 = vmatmul.bf16.vlgmr.msra.gmra.mxu2 %v1972_v33 }
 0x227   : > { %2755 = vmatmul.bf16.vlgmr.msra.gmra.mxu3 %v1971_v41  ;;  %2774 = vmatmul.bf16.vlgmr.msrb.gmra.mxu0 %v1972_v33  ;;  %v5625_v41 = vperm.slane %v2793_v28, 0 }
 0x236   : > { %2722 = vmatmul.bf16.gmra.mxu1 %v1973_v51  ;;  %2741 = vmatmul.bf16.gmra.mxu2 %v1974_v53 }
 0x237   : > { %2760 = vmatmul.bf16.gmra.mxu3 %v1973_v51  ;;  %2779 = vmatmul.bf16.gmra.mxu0 %v1974_v53 }
 0x263   : > { %v2213_v9 = vpop.f32.mrf.mxu1 }
 0x264   : > { %v2270_v43 = vpop.f32.mrf.mxu0 }
 0x269   : > { %v2232_v49 = vpop.f32.mrf.mxu2 }
 0x26a   : > { %v2251_v50 = vpop.f32.mrf.mxu3  ;;  %v2233_v36 = vadd.f32 %v2232_v49, %v2213_v9  ;;  %v1879_v49 = vadd.f32 %v5623_v29, %v5416_v48 }
 0x26b   : > { %v2215_v15 = vpop.f32.mrf.mxu1  ;;  %v2271_v34 = vadd.f32 %v2270_v43, %v2251_v50 }
 0x26c   : > { %v2272_v27 = vpop.f32.mrf.mxu0 }
 0x271   : > { %v2234_v11 = vpop.f32.mrf.mxu2 }
 0x272   : > { %v2253_v45 = vpop.f32.mrf.mxu3  ;;  %v2235_v50 = vadd.f32 %v2234_v11, %v2215_v15 }
 0x273   : > { %v5589_v39 = vpop.f32.mrf.mxu1  ;;  %v2273_v53 = vadd.f32 %v2272_v27, %v2253_v45 }
 0x274   : > { %v5591_v47 = vpop.f32.mrf.mxu0 }
 0x279   : > { %v5593_v12 = vpop.f32.mrf.mxu2 }
 0x27a   : > { %v5595_v55 = vpop.f32.mrf.mxu3 }
 0x27b   : > { %v5597_v62 = vpop.f32.mrf.mxu1  ;;  %v2276_v63 = vadd.f32 %v5591_v47, %v5595_v55 }
 0x27c   : > { %v5599_v19 = vpop.f32.mrf.mxu0 }
 0x281   : > { %v5601_v46 = vpop.f32.mrf.mxu2 }
 0x282   : > { %v5603_v57 = vpop.f32.mrf.mxu3 }
 0x283   : > { %v2449_v58 = vpop.f32.mrf.mxu1 }
 0x284   : > { %v2506_v2 = vpop.f32.mrf.mxu0  ;;  %v2450_v21 = vadd.f32 %v2449_v58, %v2233_v36 }
 0x289   : > { %v2468_v26 = vpop.f32.mrf.mxu2 }
 0x28a   : > { %v2487_v0 = vpop.f32.mrf.mxu3  ;;  %v2469_v3 = vadd.f32 %v2468_v26, %v2450_v21 }
 0x28b   : > { %v2451_v20 = vpop.f32.mrf.mxu1  ;;  %v2488_v59 = vadd.f32 %v2487_v0, %v2271_v34 }
 0x28c   : > { %v2508_v1 = vpop.f32.mrf.mxu0  ;;  %v2452_v0 = vadd.f32 %v2451_v20, %v2235_v50  ;;  %v2238_v20 = vadd.f32 %v5593_v12, %v5589_v39 }
 0x28d   : > { %v2507_v24 = vadd.f32 %v2506_v2, %v2488_v59  ;;  %v1880_v2 = vadd.f32 %v5627_v42, %v5355_v6 }
 0x291   : > { %v2470_v10 = vpop.f32.mrf.mxu2 }
 0x292   : > { %v2489_v13 = vpop.f32.mrf.mxu3  ;;  %v2471_v11 = vadd.f32 %v2470_v10, %v2452_v0 }
 0x293   : > { %v2454_v17 = vpop.f32.mrf.mxu1  ;;  %v2490_v27 = vadd.f32 %v2489_v13, %v2273_v53  ;;  %v1881_v13 = vadd.f32 %v5623_v29, %v5483_v38 }
 0x294   : > { %v5605_v14 = vpop.f32.mrf.mxu0 }
 0x295   : > { %v2509_v36 = vadd.f32 %v2508_v1, %v2490_v27  ;;  %v1882_v1 = vadd.f32 %v5627_v42, %v5436_v61  ;;  %v2278_v61 = vadd.f32 %v5599_v19, %v5603_v57  ;;  %v1709_v57 = vadd.f32 %v5581_v7, %v5335_v52 }
 0x299   : > { %v5607_v31 = vpop.f32.mrf.mxu2 }
 0x29a   : > { %v2492_v18 = vpop.f32.mrf.mxu3 }
 0x29b   : > { %v5609_v40 = vpop.f32.mrf.mxu1  ;;  %v2493_v21 = vadd.f32 %v2492_v18, %v2276_v63 }
 0x29c   : > { %v5611_v22 = vpop.f32.mrf.mxu0 }
 0x29d   : > { %v2512_v12 = vadd.f32 %v5605_v14, %v2493_v21  ;;  %v1728_v14 = vadd.f32 %v5585_v35, %v5296_v25 }
 0x2a1   : > { %v5613_v23 = vpop.f32.mrf.mxu2 }
 0x2a2   : > { %v5615_v4 = vpop.f32.mrf.mxu3 }
 0x2a3   : > { %v2718_v60 = vpop.f32.mrf.mxu1 }
 0x2a4   : > { %v2775_v37 = vpop.f32.mrf.mxu0 }
 0x2a9   : > { %v2737_v32 = vpop.f32.mrf.mxu2 }
 0x2aa   : > { %v2738_v30 = vadd.f32 %v2737_v32, %v2718_v60  ;;  %v2756_v33 = vpop.f32.mrf.mxu3 }
 0x2ab   : > { %v2776_v56 = vadd.f32 %v2775_v37, %v2756_v33  ;;  %v2720_v43 = vpop.f32.mrf.mxu1 }
 0x2ac   : > { %v2785_v51 = vadd.f32 %v2738_v30, %v2469_v3  ;;  %v2777_v26 = vpop.f32.mrf.mxu0  ;;  %v2455_v30 = vadd.f32 %v2454_v17, %v2238_v20  ;;  %v1883_v17 = vadd.f32 %v5623_v29, %v5539_v16 }
 0x2ad   : > { %v2786_v9 = vadd.f32 %v2776_v56, %v2507_v24 }
 0x2ae   : > { %v2799_v58 = vadd.f32 %v5625_v41, %v2785_v51  ;;  %v2474_v38 = vadd.f32 %v5607_v31, %v2455_v30 }
 0x2af   : > { %v2800_v45 = vadd.f32 %v5629_v44, %v2786_v9  ;;  %v2240_v9 = vadd.f32 %v5601_v46, %v5597_v62 }
 0x2b0   : > { %v2807_v60 = vadd.f32 %v2799_v58, %v1879_v49  ;;  %v2495_v49 = vadd.f32 %v5615_v4, %v2278_v61 }
 0x2b1   : > { %v2808_v48 = vadd.f32 %v2800_v45, %v1880_v2  ;;  %v2739_v15 = vpop.f32.mrf.mxu2  ;;  %v2457_v16 = vadd.f32 %v5609_v40, %v2240_v9  ;;  %v1872_v2 = vadd.f32 %v5583_v8, %v1728_v14 }
 0x2b2   : > { %2815 = vst [vmem:[%s5638_s22] sm:$0xff] %v2807_v60  ;;  %v2740_v37 = vadd.f32 %v2739_v15, %v2720_v43  ;;  %v2758_v34 = vpop.f32.mrf.mxu3  ;;  %v1884_v43 = vadd.f32 %v5627_v42, %v5499_v54  ;;  %v2514_v52 = vadd.f32 %v5611_v22, %v2495_v49 }
 0x2b3   : > { %2816 = vst [vmem:[%s5638_s22 + $0x8] sm:$0xff] %v2808_v48  ;;  %v2778_v59 = vadd.f32 %v2777_v26, %v2758_v34  ;;  %v2723_v3 = vpop.f32.mrf.mxu1  ;;  %v1871_v26 = vadd.f32 %v5587_v5, %v1709_v57  ;;  %v2476_v54 = vadd.f32 %v5613_v23, %v2457_v16  ;;  %v1886_v23 = vadd.f32 %v5627_v42, %v1872_v2 }
 0x2b4   : > { %v2787_v28 = vadd.f32 %v2740_v37, %v2471_v11  ;;  %v2780_v47 = vpop.f32.mrf.mxu0 }
 0x2b5   : > { %v2788_v6 = vadd.f32 %v2778_v59, %v2509_v36  ;;  %v1885_v45 = vadd.f32 %v5623_v29, %v1871_v26 }
 0x2b6   : > { %v2801_v10 = vadd.f32 %v5625_v41, %v2787_v28 }
 0x2b7   : > { %v2802_v32 = vadd.f32 %v5629_v44, %v2788_v6 }
 0x2b8   : > { %v2809_v33 = vadd.f32 %v2801_v10, %v1881_v13 }
 0x2b9   : > { %v2810_v55 = vadd.f32 %v2802_v32, %v1882_v1  ;;  %v2742_v24 = vpop.f32.mrf.mxu2 }
 0x2ba   : > { %2817 = vst [vmem:[%s5638_s22 + $0x10] sm:$0xff] %v2809_v33  ;;  %v2743_v56 = vadd.f32 %v2742_v24, %v2723_v3  ;;  %v2761_v39 = vpop.f32.mrf.mxu3 }
 0x2bb   : > { %2818 = vst [vmem:[%s5638_s22 + $0x18] sm:$0xff] %v2810_v55  ;;  %v2781_v51 = vadd.f32 %v2780_v47, %v2761_v39  ;;  %v2725_v46 = vpop.f32.mrf.mxu1 }
 0x2bc   : > { %v2789_v53 = vadd.f32 %v2743_v56, %v2474_v38  ;;  %v2782_v25 = vpop.f32.mrf.mxu0 }
 0x2bd   : > { %v2790_v18 = vadd.f32 %v2781_v51, %v2512_v12 }
 0x2be   : > { %v2803_v31 = vadd.f32 %v5625_v41, %v2789_v53 }
 0x2bf   : > { %v2804_v19 = vadd.f32 %v5629_v44, %v2790_v18 }
 0x2c0   : > { %v2811_v50 = vadd.f32 %v2803_v31, %v1883_v17 }
 0x2c1   : > { %v2812_v62 = vadd.f32 %v2804_v19, %v1884_v43  ;;  %v2744_v58 = vpop.f32.mrf.mxu2 }
 0x2c2   : > { %2819 = vst [vmem:[%s5638_s22 + $0x20] sm:$0xff] %v2811_v50  ;;  %v2745_v35 = vadd.f32 %v2744_v58, %v2725_v46  ;;  %v2763_v4 = vpop.f32.mrf.mxu3 }
 0x2c3   : > { %2820 = vst [vmem:[%s5638_s22 + $0x28] sm:$0xff] %v2812_v62  ;;  %v2783_v7 = vadd.f32 %v2782_v25, %v2763_v4 }
 0x2c4   : > { %v2791_v40 = vadd.f32 %v2745_v35, %v2476_v54 }
 0x2c5   : > { %v2792_v27 = vadd.f32 %v2783_v7, %v2514_v52 }
 0x2c6   : > { %v2805_v5 = vadd.f32 %v5625_v41, %v2791_v40 }
 0x2c7   : > { %v2806_v0 = vadd.f32 %v5629_v44, %v2792_v27 }
 0x2c8   : > { %v2813_v60 = vadd.f32 %v2805_v5, %v1885_v45 }
 0x2c9   : > { %v2814_v48 = vadd.f32 %v2806_v0, %v1886_v23 }
 0x2ca   : > { %2821 = vst [vmem:[%s5638_s22 + $0x30] sm:$0xff] %v2813_v60 }
 0x2cb   : > { %2822 = vst [vmem:[%s5638_s22 + $0x38] sm:$0xff] %v2814_v48 }
 0x2cc PF: > { %s23_s21 = sadd.s32 1, %s4182_s21  }
 0x2cd   : > { %p20_p8 = scmp.ge.s32.totalorder %s23_s21, 4  }
 0x2cf   :  { %22 = sbr.rel (!%p20_p8) target bundleno = 1 (0x1), region = 114 }
 0x2d4   :  { %2847 = vsyncpa [#allocation3], 1 }
 0x2d5   :  { %2849 = vsyncpa [#allocation3 + $0x1], 1 }

// kernel: upsample_block_forward.1
= control target key start
LH: loop header
LB: loop body
LE: loop exit
PB: predicated region body
PF: predicated region fallthrough
CT: control target
= control target key end

     0   :  { %17 = vsyncpa [#allocation3], 0  ;;  %s4254_s21 = smov 0   ;;  %s5690_s0 = inlined_call_operand.vmem [shape: bf16[64,64], index: 0, kind: input, shape index: {}]   ;;  %s5691_s1 = inlined_call_operand.vmem [shape: bf16[32,64], index: 1, kind: input, shape index: {}]   ;;  %s5692_s2 = inlined_call_operand.vmem [shape: bf16[32,16], index: 2, kind: input, shape index: {}]   ;;  %s5693_s3 = inlined_call_operand.vmem [shape: bf16[64,128], index: 3, kind: input, shape index: {}]   ;;  %s5694_s4 = inlined_call_operand.vmem [shape: bf16[3,64,128], index: 4, kind: input, shape index: {}]   ;;  %s5695_s5 = inlined_call_operand.vmem [shape: f32[1,128], index: 5, kind: input, shape index: {}]   ;;  %s5696_s6 = inlined_call_operand.vmem [shape: bf16[3,128,256], index: 6, kind: input, shape index: {}]   ;;  %s5697_s7 = inlined_call_operand.vmem [shape: f32[1,256], index: 7, kind: input, shape index: {}]   ;;  %s5698_s8 = inlined_call_operand.hbm [shape: bf16[3,128,256], index: 8, kind: input, shape index: {}]   ;;  %s5699_s9 = inlined_call_operand.vmem [shape: f32[1,256], index: 9, kind: input, shape index: {}]   ;;  %s5700_s10 = inlined_call_operand.vmem [shape: bf16[3,256,256], index: 10, kind: input, shape index: {}]   ;;  %s5701_s11 = inlined_call_operand.vmem [shape: f32[1,256], index: 11, kind: input, shape index: {}]   ;;  %s5702_s12 = inlined_call_operand.vmem [shape: f32[64,256], index: 12, kind: output, shape index: {}]  }
   0x1 LB: > { %s345_s24 = sshll.u32 %s5698_s8, 4  ;;  %s2905_s25 = sadd.s32 4294967295, %s4182_s21   ;;  %s4182_s21 = sphi %s4254_s21, %s23_s21   ;;  %s346_s24 = int_to_ptr.hbm [resolvable:$true] %s345_s24 }
   0x2   : > { %p2907_p0 = scmp.ge.s32.totalorder %s4182_s21, 1  ;;  %p316_p1 = scmp.lt.s32.totalorder %s4182_s21, 3 }
   0x3   : > { %p4126_p2 = scmp.eq.s32.totalorder %s2905_s25, 0  ;;  %s4184_s26 = smov [#allocation2]  }
   0x4   : > { %p317_p3 = pnand %p2907_p0, %p316_p1  ;;  %s347_s27 = sshll.u32 %s4184_s26, 4  ;;  %s348_s27 = int_to_ptr.vmem [resolvable:$true] %s347_s27 }
   0x5   : > { %s4185_s28 = smov 128   ;;  %s4186_s29 = smov 8  }
   0x6   : > { %p4122_p4 = pneg %p317_p3  ;;  %390 = sbr.rel (%p317_p3) target bundleno = 716 (0x2cc), region = 68 }
   0x8   : > { %p4123_p5 = pnand %p4126_p2, %p4122_p4 }
   0xa   : > { %4125 = dma.hbm_to_vmem [thread:$0]  (!%p4123_p5), %s346_s24, 6144, %s348_s27, [#allocation3], %s4185_s28, %s4185_s28, %s4186_s29  }
   0xb   : > { %4177 = dma.done.wait (%p4126_p2), [#allocation3], 6144  }
   0xc   : > { %4179 = vsyncadd (%p4126_p2), [#allocation3], 4294961152  ;;  %s2914_s30 = sshll.u32 %s2905_s25, 1  ;;  %s2912_s13 = sshll.u32 %s2905_s25, 2  ;;  %v461_v0 = vlaneseq  ;;  %vm4187_vm0 = vmmov 0   ;;  %v4188_v4 = vmov 0  }
   0xd   : > { %p446_p6 = scmp.lt.s32.totalorder %s2914_s30, 3  ;;  %p440_p7 = scmp.lt.s32.totalorder %s2912_s13, 7  ;;  %vm685_vm1 = vmpackc.low %vm4187_vm0, %vm4187_vm0  ;;  %v3907_v8 = vld [vmem:[%s5692_s2] sm:$0xff]  ;;  %v3908_v9 = vld [vmem:[%s5692_s2 + $0x8] sm:$0xff]  ;;  %vm548_vm2 = vcmask 130048   ;;  %v4316_v21 = vunpack.c.h.b16 %v4188_v4  ;;  %vm662_vm7 = vcmask 1040384   ;;  %v4335_v30 = vunpack.c.l.b16 %v4188_v4 }
   0xe   : > { %v4265_v1 = vshrl.u32 %v461_v0, 7  ;;  %v689_v5 = vsel %vm685_vm1, 65537, %v4188_v4  ;;  %v3920_v10 = vld [vmem:[%s5694_s4 + $0x38] sm:$0xff]  ;;  %v3919_v14 = vld [vmem:[%s5694_s4 + $0x30] sm:$0xff]  ;;  %vm644_vm5 = vsmask.f32 256 }
   0xf   : > { %s5720_s30 = smov (!%p446_p6, %s2914_s30), 3  ;;  %s5722_s13 = smov (!%p440_p7, %s2912_s13), 7  ;;  %v3916_v11 = vld [vmem:[%s5694_s4 + $0x18] sm:$0xff]  ;;  %v693_v12 = vunpack.c.l.b16 %v689_v5  ;;  %801 = vmatpush.bf16.msra.mxu2 %v3920_v10  ;;  %v3915_v15 = vld [vmem:[%s5694_s4 + $0x10] sm:$0xff]  ;;  %v3918_v27 = vld [vmem:[%s5694_s4 + $0x28] sm:$0xff]  ;;  %vm608_vm0 = vcmask 523264  }
  0x10   : > { %v463_v2 = vadd.s32 8, %v4265_v1  ;;  %s2915_s14 = sshll.u32 %s5720_s30, 2  ;;  %v470_v3 = vand.u32 15, %v4265_v1  ;;  %s2913_s18 = sshll.u32 %s5722_s13, 2  ;;  %850 = vmatpush.bf16.msra.mxu3 %v3916_v11  ;;  %v3924_v16 = vld [vmem:[%s5694_s4 + $0x58] sm:$0xff]  ;;  %v3923_v23 = vld [vmem:[%s5694_s4 + $0x50] sm:$0xff]  ;;  %vm4344_vm9 = vmand %vm662_vm7, %vm644_vm5 }
  0x11   : > { %s449_s17 = scalar_lea.vmem %s5691_s1, %s2915_s14  ;;  %s443_s30 = scalar_lea.vmem %s5690_s0, %s2913_s18  ;;  %v4313_v20 = vunpack.i.l.s16 %v693_v12  ;;  %v3912_v22 = vld [vmem:[%s5693_s3 + $0x18] sm:$0xff]  ;;  %v3914_v28 = vld [vmem:[%s5694_s4 + $0x8] sm:$0xff]  ;;  %v3911_v34 = vld [vmem:[%s5693_s3 + $0x10] sm:$0xff]  ;;  %vm665_vm13 = vsmask.f32 7424  ;;  %v464_v53 = vadd.s32 16, %v4265_v1 }
  0x12   : > { %v477_v6 = vand.u32 15, %v463_v2  ;;  %v3906_v7 = vld [vmem:[%s449_s17] sm:$0xff]  ;;  %vm4291_vm3 = vcmp.eq.s32.totalorder %v470_v3, 0  ;;  %v4308_v19 = vld [vmem:[%s443_s30 + $0x8] sm:$0xff]  ;;  %v465_v60 = vadd.s32 24, %v4265_v1  ;;  %s3903_s19 = sshll.u32 %s5722_s13, 4 }
  0x13   : > { %562 = vmatpush.bf16.msra.mxu0 %v3906_v7  ;;  %4117 = vmatpush.bf16.msra.mxu1 %v3906_v7  ;;  %v3904_v18 = vld [vmem:[%s443_s30] sm:$0xff]  ;;  %vm684_vm6 = vmpackc.low %vm4291_vm3, %vm4291_vm3  ;;  %v656_v35 = vshll.u32 %v4308_v19, 16  ;;  %vm703_vm10 = vcmp.ne.s32.totalorder %v4313_v20, %v4316_v21  ;;  %v3922_v40 = vld [vmem:[%s5694_s4 + $0x48] sm:$0xff]  ;;  %vm740_vm14 = vcmp.ne.s32.totalorder %v4313_v20, %v4335_v30  ;;  %v484_v54 = vand.u32 15, %v464_v53  ;;  %s5638_s22 = scalar_lea.vmem %s5702_s12, %s3903_s19 }
  0x14   : > { %vm4304_vm4 = vcmp.eq.s32.totalorder %v477_v6, 15  ;;  %v646_v24 = vshrl.u32 %v3904_v18, 16  ;;  %v649_v25 = vshll.u32 %v3904_v18, 16  ;;  %v688_v26 = vsel %vm684_vm6, 65537, %v4188_v4  ;;  %802 = vmatpush.bf16.msra.mxu2 %v3919_v14  ;;  %851 = vmatpush.bf16.msra.mxu3 %v3915_v15  ;;  %v3917_v42 = vld [vmem:[%s5694_s4 + $0x20] sm:$0xff]  ;;  %v3910_v57 = vld [vmem:[%s5693_s3 + $0x8] sm:$0xff] }
  0x15   : > { %vm723_vm8 = vmpackc.low %vm4304_vm4, %vm4304_vm4  ;;  %v692_v29 = vunpack.c.l.b16 %v688_v26  ;;  %v3913_v43 = vld [vmem:[%s5694_s4] sm:$0xff]  ;;  %v668_v47 = vrot.slane %v656_v35, 1  ;;  %v653_v55 = vshrl.u32 %v4308_v19, 16  ;;  %v491_v0 = vand.u32 15, %v465_v60  ;;  %v3955_v12 = vld [vmem:[%s5696_s6 + $0xf4] sm:$0xf] }
  0x16   : > { %2931 = vmatmul.msk.bf16.vlgmr.msra.gmra.mxu0 %vm548_vm2, %v3907_v8  ;;  %2932 = vmatmul.msk.bf16.vlgmr.msra.gmra.mxu1 %vm548_vm2, %v3908_v9  ;;  %v727_v31 = vsel %vm723_vm8, 65537, %v4188_v4  ;;  %v648_v32 = vrot.slane %v646_v24, 7  ;;  %v666_v33 = vrot.slane %v649_v25, 1  ;;  %v3921_v49 = vld [vmem:[%s5694_s4 + $0x40] sm:$0xff]  ;;  %vm516_vm2 = vcmp.eq.s32.totalorder %v484_v54, 0 }
  0x17   : > { %908 = vmatpush.bf16.msrb.mxu0 %v3924_v16  ;;  %619 = vmatpush.bf16.msrb.mxu1 %v3912_v22  ;;  %v731_v36 = vunpack.c.l.b16 %v727_v31  ;;  %v2959_v38 = vunpack.i.l.s16 %v692_v29  ;;  %vm686_vm3 = vmpackc.low %vm516_vm2, %vm516_vm2  ;;  %v655_v59 = vrot.slane %v653_v55, 7  ;;  %v3909_v61 = vld [vmem:[%s5693_s3] sm:$0xff]  ;;  %vm521_vm7 = vcmp.eq.s32.totalorder %v491_v0, 15  ;;  %v3113_v13 = vld [vmem:[%s5696_s6 + $0xf8] sm:$0xf0] }
  0x18   : > { %v651_v39 = vor.u32 %v649_v25, %v648_v32  ;;  %803 = vmatpush.bf16.msra.mxu2 %v3918_v27  ;;  %852 = vmatpush.bf16.msra.mxu3 %v3914_v28  ;;  %v667_v46 = vor.u32 %v666_v33, %v646_v24  ;;  %v690_v56 = vsel %vm686_vm3, 65537, %v4188_v4  ;;  %vm725_vm8 = vmpackc.low %vm521_vm7, %vm521_vm7  ;;  %v670_v8 = vor.u32 %v668_v47, %v653_v55  ;;  %v3111_v14 = vld [vmem:[%s5696_s6 + $0xf0] sm:$0xf]  ;;  %v3956_v16 = vld [vmem:[%s5696_s6 + $0xf4] sm:$0xf0] }
  0x19   : > { %v2964_v41 = vunpack.i.l.s16 %v731_v36  ;;  %vm702_vm11 = vcmp.ne.s32.totalorder %v2959_v38, %v4335_v30  ;;  %v694_v58 = vunpack.c.l.b16 %v690_v56  ;;  %v658_v63 = vor.u32 %v656_v35, %v655_v59  ;;  %v3953_v17 = vld [vmem:[%s5696_s6 + $0xe4] sm:$0xf]  ;;  %v3103_v20 = vld [vmem:[%s5696_s6 + $0xe0] sm:$0xf]  ;;  %v3097_v24 = vld [vmem:[%s5696_s6 + $0xd8] sm:$0xf0] }
  0x1a   : > { %v664_v44 = vsel %vm4344_vm9, 0, %v651_v39  ;;  %vm4365_vm12 = vmpackc.low %vm703_vm10, %vm702_vm11  ;;  %v669_v50 = vsel %vm665_vm13, %v667_v46, %v668_v47  ;;  %v729_v5 = vsel %vm725_vm8, 65537, %v4188_v4  ;;  %vm673_vm11 = vcmask 1047552   ;;  %v3175_v26 = vld [vmem:[%s5696_s6 + $0x70] sm:$0xf] }
  0x1b   : > { %909 = vmatpush.bf16.msrb.mxu0 %v3923_v23  ;;  %620 = vmatpush.bf16.msrb.mxu1 %v3911_v34  ;;  %vm741_vm15 = vcmp.ne.s32.totalorder %v2964_v41, %v4316_v21  ;;  %v712_v48 = vsel %vm4365_vm12, 0, %v664_v44  ;;  %v2961_v62 = vunpack.i.l.s16 %v694_v58  ;;  %v659_v2 = vsel %vm644_vm5, %v648_v32, %v658_v63  ;;  %v3951_v23 = vld [vmem:[%s5696_s6 + $0xd4] sm:$0xf]  ;;  %v3940_v27 = vld [vmem:[%s5696_s6 + $0x74] sm:$0xf0] }
  0x1c   : > { %804 = vmatpush.bf16.msra.mxu2 %v3917_v42  ;;  %853 = vmatpush.bf16.msra.mxu3 %v3913_v43  ;;  %vm4381_vm1 = vmpackc.low %vm741_vm15, %vm740_vm14  ;;  %v733_v6 = vunpack.c.l.b16 %v729_v5  ;;  %v3116_v15 = vor.u32 %v3955_v12, %v3113_v13  ;;  %v3939_v28 = vld [vmem:[%s5696_s6 + $0x74] sm:$0xf]  ;;  %v3952_v31 = vld [vmem:[%s5696_s6 + $0xd4] sm:$0xf0]  ;;  %v3176_v32 = vor.u32 %v3940_v27, %v3175_v26  ;;  %v3100_v35 = vor.u32 %v3951_v23, %v3097_v24 }
  0x1d   : > { %v750_v52 = vsel %vm4381_vm1, 0, %v669_v50  ;;  %vm709_vm4 = vcmp.ne.s32.totalorder %v2961_v62, %v4335_v30  ;;  %vm4416_vm15 = vmand %vm673_vm11, %vm665_vm13  ;;  %v3095_v30 = vld [vmem:[%s5696_s6 + $0xd0] sm:$0xf]  ;;  %v3177_v33 = vld [vmem:[%s5696_s6 + $0x78] sm:$0xf0] }
  0x1e   : > { %vm4407_vm6 = vmpackc.low %vm703_vm10, %vm709_vm4  ;;  %v2966_v7 = vunpack.i.l.s16 %v733_v6  ;;  %v675_v10 = vsel %vm4416_vm15, %v670_v8, 0  ;;  %v3180_v34 = vor.u32 %v3939_v28, %v3177_v33  ;;  %v3096_v36 = vor.u32 %v3952_v31, %v3095_v30  ;;  %v3949_v38 = vld [vmem:[%s5696_s6 + $0xc4] sm:$0xf]  ;;  %v3089_v39 = vld [vmem:[%s5696_s6 + $0xc8] sm:$0xf0] }
  0x1f   : > { %910 = vmatpush.bf16.msrb.mxu0 %v3922_v40  ;;  %2991 = vmatmul.msk.bf16.vlgmr.msra.gmra.mxu2 %vm608_vm0, %v3904_v18  ;;  %v713_v1 = vsel %vm4407_vm6, 0, %v659_v2  ;;  %v3105_v18 = vld [vmem:[%s5696_s6 + $0xe8] sm:$0xf0]  ;;  %v3092_v40 = vor.u32 %v3949_v38, %v3089_v39  ;;  %v3087_v47 = vld [vmem:[%s5696_s6 + $0xc0] sm:$0xf] }
  0x20   : > { %3009 = vmatmul.msk.bf16.vlgmr.msra.gmra.mxu3 %vm608_vm0, %v712_v48  ;;  %621 = vmatpush.bf16.msrb.mxu1 %v3910_v57  ;;  %vm748_vm10 = vcmp.ne.s32.totalorder %v2966_v7, %v4316_v21  ;;  %v3954_v21 = vld [vmem:[%s5696_s6 + $0xe4] sm:$0xf0]  ;;  %v3108_v22 = vor.u32 %v3953_v17, %v3105_v18  ;;  %v3167_v50 = vld [vmem:[%s5696_s6 + $0x60] sm:$0xf]  ;;  %v3937_v53 = vld [vmem:[%s5696_s6 + $0x64] sm:$0xf] }
  0x21   : > { %vm4426_vm2 = vmpackc.low %vm748_vm10, %vm740_vm14  ;;  %1121 = vmatpush.bf16.msrb.mxu2 %v3116_v15  ;;  %v3104_v25 = vor.u32 %v3954_v21, %v3103_v20  ;;  %1220 = vmatpush.bf16.msrb.mxu3 %v3176_v32  ;;  %v3950_v48 = vld [vmem:[%s5696_s6 + $0xc4] sm:$0xf0]  ;;  %v3169_v55 = vld [vmem:[%s5696_s6 + $0x68] sm:$0xf0] }
  0x22   : > { %v751_v4 = vsel %vm4426_vm2, 0, %v675_v10  ;;  %v3172_v56 = vor.u32 %v3937_v53, %v3169_v55  ;;  %v3947_v57 = vld [vmem:[%s5696_s6 + $0xb4] sm:$0xf]  ;;  %v3081_v58 = vld [vmem:[%s5696_s6 + $0xb8] sm:$0xf0] }
  0x23   : > { %911 = vmatpush.bf16.msrb.mxu0 %v3921_v49  ;;  %v3088_v49 = vor.u32 %v3950_v48, %v3087_v47  ;;  %v3079_v59 = vld [vmem:[%s5696_s6 + $0xb0] sm:$0xf]  ;;  %v3084_v60 = vor.u32 %v3947_v57, %v3081_v58  ;;  %v3936_v63 = vld [vmem:[%s5696_s6 + $0x54] sm:$0xf0]  ;;  %v3161_v5 = vld [vmem:[%s5696_s6 + $0x58] sm:$0xf0] }
  0x24   : > { %622 = vmatpush.bf16.msrb.mxu1 %v3909_v61  ;;  %v3948_v61 = vld [vmem:[%s5696_s6 + $0xb4] sm:$0xf0]  ;;  %v3159_v62 = vld [vmem:[%s5696_s6 + $0x50] sm:$0xf]  ;;  %v3945_v7 = vld [vmem:[%s5696_s6 + $0xa4] sm:$0xf] }
  0x25   : > { %1122 = vmatpush.bf16.msrb.mxu2 %v3108_v22  ;;  %v3080_v0 = vor.u32 %v3948_v61, %v3079_v59  ;;  %v3160_v2 = vor.u32 %v3936_v63, %v3159_v62  ;;  %v3073_v8 = vld [vmem:[%s5696_s6 + $0xa8] sm:$0xf0]  ;;  %v3071_v10 = vld [vmem:[%s5696_s6 + $0xa0] sm:$0xf]  ;;  %v3946_v12 = vld [vmem:[%s5696_s6 + $0xa4] sm:$0xf0] }
  0x26   : > { %3035 = vmatmul.msk.bf16.vlgmr.msrb.gmra.mxu0 %vm608_vm0, %v750_v52  ;;  %v3938_v52 = vld [vmem:[%s5696_s6 + $0x64] sm:$0xf0]  ;;  %v3151_v13 = vld [vmem:[%s5696_s6 + $0x40] sm:$0xf]  ;;  %v3072_v15 = vor.u32 %v3946_v12, %v3071_v10  ;;  %v3933_v17 = vld [vmem:[%s5696_s6 + $0x44] sm:$0xf] }
  0x27   : > { %1239 = vmatpush.bf16.msra.mxu0 %v3180_v34  ;;  %v3168_v54 = vor.u32 %v3938_v52, %v3167_v50  ;;  %v3153_v18 = vld [vmem:[%s5696_s6 + $0x48] sm:$0xf0]  ;;  %v3943_v20 = vld [vmem:[%s5696_s6 + $0x94] sm:$0xf]  ;;  %v3065_v21 = vld [vmem:[%s5696_s6 + $0x98] sm:$0xf0] }
  0x28   : > { %v3063_v22 = vld [vmem:[%s5696_s6 + $0x90] sm:$0xf]  ;;  %v3068_v23 = vor.u32 %v3943_v20, %v3065_v21  ;;  %v3944_v24 = vld [vmem:[%s5696_s6 + $0x94] sm:$0xf0]  ;;  %v3145_v30 = vld [vmem:[%s5696_s6 + $0x38] sm:$0xf0] }
  0x29   : > { %1123 = vmatpush.bf16.msrb.mxu2 %v3100_v35  ;;  %1221 = vmatpush.bf16.msrb.mxu3 %v3168_v54  ;;  %v3932_v26 = vld [vmem:[%s5696_s6 + $0x34] sm:$0xf0]  ;;  %v3064_v27 = vor.u32 %v3944_v24, %v3063_v22  ;;  %v3941_v34 = vld [vmem:[%s5696_s6 + $0x84] sm:$0xf]  ;;  %v3057_v35 = vld [vmem:[%s5696_s6 + $0x88] sm:$0xf0] }
  0x2a   : > { %v3060_v38 = vor.u32 %v3941_v34, %v3057_v35  ;;  %v3942_v39 = vld [vmem:[%s5696_s6 + $0x84] sm:$0xf0]  ;;  %v3971_v48 = vld [vmem:[%s5696_s6 + $0x174] sm:$0xf]  ;;  %v3127_v50 = vld [vmem:[%s5696_s6 + $0x10] sm:$0xf] }
  0x2b   : > { %1240 = vmatpush.bf16.msra.mxu0 %v3172_v56  ;;  %v3928_v54 = vld [vmem:[%s5696_s6 + $0x14] sm:$0xf0]  ;;  %v3927_v55 = vld [vmem:[%s5696_s6 + $0x14] sm:$0xf]  ;;  %v3129_v56 = vld [vmem:[%s5696_s6 + $0x18] sm:$0xf0] }
  0x2c   : > { %v3128_v57 = vor.u32 %v3928_v54, %v3127_v50  ;;  %v3132_v58 = vor.u32 %v3927_v55, %v3129_v56  ;;  %v3255_v59 = vld [vmem:[%s5696_s6 + $0x170] sm:$0xf]  ;;  %v3969_v62 = vld [vmem:[%s5696_s6 + $0x164] sm:$0xf]  ;;  %v3249_v63 = vld [vmem:[%s5696_s6 + $0x168] sm:$0xf0] }
  0x2d   : > { %1124 = vmatpush.bf16.msrb.mxu2 %v3092_v40  ;;  %1222 = vmatpush.bf16.msrb.mxu3 %v3160_v2  ;;  %v3135_v40 = vld [vmem:[%s5696_s6 + $0x20] sm:$0xf]  ;;  %v3252_v2 = vor.u32 %v3969_v62, %v3249_v63  ;;  %v3968_v20 = vld [vmem:[%s5696_s6 + $0x154] sm:$0xf0]  ;;  %v3319_v21 = vld [vmem:[#allocation2 + $0xf0] sm:$0xf] }
  0x2e   : > { %v4004_v22 = vld [vmem:[#allocation2 + $0xf4] sm:$0xf0]  ;;  %v4666_v24 = vld [vmem:[%s5695_s5] ss:$0 sm:$0xff]  ;;  %v3966_v35 = vld [vmem:[%s5696_s6 + $0x144] sm:$0xf0] }
  0x2f   : > { %2992 = vmatmul.msk.bf16.gmra.mxu2 %vm608_vm0, %v4308_v19  ;;  %v3112_v19 = vor.u32 %v3956_v16, %v3111_v14  ;;  %v3934_v14 = vld [vmem:[%s5696_s6 + $0x44] sm:$0xf0]  ;;  %v3963_v50 = vld [vmem:[%s5696_s6 + $0x134] sm:$0xf]  ;;  %v3964_v55 = vld [vmem:[%s5696_s6 + $0x134] sm:$0xf0] }
  0x30   : > { %3010 = vmatmul.msk.bf16.gmra.mxu3 %vm608_vm0, %v713_v1  ;;  %v3935_v1 = vld [vmem:[%s5696_s6 + $0x54] sm:$0xf]  ;;  %v3152_v16 = vor.u32 %v3934_v14, %v3151_v13  ;;  %v3247_v13 = vld [vmem:[%s5696_s6 + $0x160] sm:$0xf]  ;;  %v3970_v14 = vld [vmem:[%s5696_s6 + $0x164] sm:$0xf0] }
  0x31   : > { %1102 = vmatpush.bf16.msra.mxu1 %v3112_v19  ;;  %1125 = vmatpush.bf16.msrb.mxu2 %v3084_v60  ;;  %v3164_v6 = vor.u32 %v3935_v1, %v3161_v5  ;;  %v3156_v19 = vor.u32 %v3933_v17, %v3153_v18  ;;  %v3972_v60 = vld [vmem:[%s5696_s6 + $0x174] sm:$0xf0]  ;;  %v3926_v1 = vld [vmem:[%s5696_s6 + $0x4] sm:$0xf0]  ;;  %v3925_v5 = vld [vmem:[%s5696_s6 + $0x4] sm:$0xf] }
  0x32   : > { %1223 = vmatpush.bf16.msrb.mxu3 %v3152_v16  ;;  %v3256_v61 = vor.u32 %v3972_v60, %v3255_v59  ;;  %v3967_v16 = vld [vmem:[%s5696_s6 + $0x154] sm:$0xf]  ;;  %v3241_v17 = vld [vmem:[%s5696_s6 + $0x158] sm:$0xf0]  ;;  %v3239_v18 = vld [vmem:[%s5696_s6 + $0x150] sm:$0xf] }
  0x33   : > { %1241 = vmatpush.bf16.msra.mxu0 %v3164_v6  ;;  %v3121_v6 = vld [vmem:[%s5696_s6 + $0x8] sm:$0xf0]  ;;  %v3303_v56 = vld [vmem:[#allocation2 + $0xd0] sm:$0xf]  ;;  %v3999_v62 = vld [vmem:[#allocation2 + $0xd4] sm:$0xf] }
  0x34   : > { %v3124_v12 = vor.u32 %v3925_v5, %v3121_v6  ;;  %v3305_v63 = vld [vmem:[#allocation2 + $0xd8] sm:$0xf0]  ;;  %v3215_v5 = vld [vmem:[%s5696_s6 + $0x120] sm:$0xf]  ;;  %v4105_v37 = vld [vmem:[%s5700_s10 + $0x2a4] sm:$0xf] }
  0x35   : > { %1103 = vmatpush.bf16.msra.mxu1 %v3104_v25  ;;  %v3143_v25 = vld [vmem:[%s5696_s6 + $0x30] sm:$0xf] }
  0x36   : > { %3036 = vmatmul.msk.bf16.gmra.mxu0 %vm608_vm0, %v751_v4  ;;  %v3076_v4 = vor.u32 %v3945_v7, %v3073_v8  ;;  %v3144_v28 = vor.u32 %v3932_v26, %v3143_v25  ;;  %v3240_v25 = vor.u32 %v3968_v20, %v3239_v18  ;;  %v3320_v26 = vor.u32 %v4004_v22, %v3319_v21  ;;  %v3959_v22 = vld [vmem:[%s5696_s6 + $0x114] sm:$0xf] }
  0x37   : > { %1242 = vmatpush.bf16.msra.mxu0 %v3156_v19  ;;  %v3244_v19 = vor.u32 %v3967_v16, %v3241_v17  ;;  %v3297_v16 = vld [vmem:[#allocation2 + $0xc8] sm:$0xf0] }
  0x38   : > { %1126 = vmatpush.bf16.msrb.mxu2 %v3076_v4  ;;  %1224 = vmatpush.bf16.msrb.mxu3 %v3144_v28  ;;  %v3321_v28 = vld [vmem:[#allocation2 + $0xf8] sm:$0xf0] }
  0x39   : > { %1104 = vmatpush.bf16.msra.mxu1 %v3096_v36  ;;  %v3055_v36 = vld [vmem:[%s5696_s6 + $0x80] sm:$0xf] }
  0x3c   : > { %1127 = vmatpush.bf16.msrb.mxu2 %v3068_v23 }
  0x3d   : > { %1105 = vmatpush.bf16.msra.mxu1 %v3088_v49  ;;  %v3257_v49 = vld [vmem:[%s5696_s6 + $0x178] sm:$0xf0] }
  0x3e   : > { %v3260_v53 = vor.u32 %v3971_v48, %v3257_v49 }
  0x40   : > { %1128 = vmatpush.bf16.msrb.mxu2 %v3060_v38  ;;  %v4002_v38 = vld [vmem:[#allocation2 + $0xe4] sm:$0xf0] }
  0x41   : > { %1106 = vmatpush.bf16.msra.mxu1 %v3080_v0  ;;  %v3119_v0 = vld [vmem:[%s5696_s6] sm:$0xf] }
  0x42   : > { %v3120_v4 = vor.u32 %v3926_v1, %v3119_v0  ;;  %v3308_v0 = vor.u32 %v3999_v62, %v3305_v63  ;;  %v3217_v1 = vld [vmem:[%s5696_s6 + $0x128] sm:$0xf0] }
  0x44   : > { %1374 = vmatpush.bf16.msra.mxu2 %v3260_v53  ;;  %v3223_v53 = vld [vmem:[%s5696_s6 + $0x130] sm:$0xf] }
  0x45   : > { %1107 = vmatpush.bf16.msra.mxu1 %v3072_v15  ;;  %v3248_v15 = vor.u32 %v3970_v14, %v3247_v13  ;;  %v3224_v60 = vor.u32 %v3964_v55, %v3223_v53  ;;  %v3281_v55 = vld [vmem:[#allocation2 + $0xa8] sm:$0xf0] }
  0x48   : > { %1375 = vmatpush.bf16.msra.mxu2 %v3252_v2  ;;  %v3961_v2 = vld [vmem:[%s5696_s6 + $0x124] sm:$0xf] }
  0x49   : > { %1108 = vmatpush.bf16.msra.mxu1 %v3064_v27  ;;  %v4003_v27 = vld [vmem:[#allocation2 + $0xf4] sm:$0xf]  ;;  %v3220_v6 = vor.u32 %v3961_v2, %v3217_v1  ;;  %v3992_v2 = vld [vmem:[#allocation2 + $0x94] sm:$0xf0] }
  0x4a   : > { %v3991_v1 = vld [vmem:[#allocation2 + $0x94] sm:$0xf] }
  0x4c   : > { %1376 = vmatpush.bf16.msra.mxu2 %v3244_v19 }
  0x93   : > { %v564_v29 = vpop.f32.mrf.mxu0  ;;  %v569_v43 = vpop.f32.mrf.mxu1 }
  0x9b   : > { %v566_v41 = vpop.f32.mrf.mxu0  ;;  %v571_v44 = vpop.f32.mrf.mxu1 }
  0x9c   : > { %v574_v42 = vpack.c.bf16 %v566_v41, %v564_v29  ;;  %v575_v46 = vpack.c.bf16 %v571_v44, %v569_v43  ;;  %v3931_v29 = vld [vmem:[%s5696_s6 + $0x34] sm:$0xf]  ;;  %v3930_v41 = vld [vmem:[%s5696_s6 + $0x24] sm:$0xf0]  ;;  %v3929_v44 = vld [vmem:[%s5696_s6 + $0x24] sm:$0xf] }
  0x9d   : > { %v3148_v31 = vor.u32 %v3931_v29, %v3145_v30  ;;  %v3136_v43 = vor.u32 %v3930_v41, %v3135_v40  ;;  %v3324_v30 = vor.u32 %v4003_v27, %v3321_v28  ;;  %v3960_v28 = vld [vmem:[%s5696_s6 + $0x114] sm:$0xf0] }
  0x9e   : > { %2949 = vmatmul.msk.bf16.vlgmr.msrb.gmra.mxu1 %vm608_vm0, %v574_v42  ;;  %v3056_v42 = vor.u32 %v3942_v39, %v3055_v36  ;;  %v3311_v36 = vld [vmem:[#allocation2 + $0xe0] sm:$0xf] }
  0x9f   : > { %1243 = vmatpush.bf16.msra.mxu0 %v3148_v31  ;;  %1225 = vmatpush.bf16.msrb.mxu3 %v3136_v43  ;;  %v3965_v31 = vld [vmem:[%s5696_s6 + $0x144] sm:$0xf] }
  0xa0   : > { %1109 = vmatpush.bf16.msra.mxu1 %v3056_v42  ;;  %v3312_v42 = vor.u32 %v4002_v38, %v3311_v36  ;;  %v4001_v43 = vld [vmem:[#allocation2 + $0xe4] sm:$0xf]  ;;  %v3995_v38 = vld [vmem:[#allocation2 + $0xb4] sm:$0xf] }
  0xa2   : > { %v806_v32 = vpop.f32.mrf.mxu2 }
  0xa3   : > { %v855_v33 = vpop.f32.mrf.mxu3  ;;  %v913_v52 = vpop.f32.mrf.mxu0  ;;  %1226 = vmatpush.bf16.msrb.mxu3 %v3128_v57  ;;  %v4000_v57 = vld [vmem:[#allocation2 + $0xd4] sm:$0xf0] }
  0xa4   : > { %1355 = vmatpush.bf16.msrb.mxu1 %v3256_v61  ;;  %v856_v7 = vadd.f32 %v855_v33, %v806_v32  ;;  %v3233_v32 = vld [vmem:[%s5696_s6 + $0x148] sm:$0xf0]  ;;  %v3231_v33 = vld [vmem:[%s5696_s6 + $0x140] sm:$0xf]  ;;  %v3304_v61 = vor.u32 %v4000_v57, %v3303_v56 }
  0xa5   : > { %v3236_v34 = vor.u32 %v3965_v31, %v3233_v32  ;;  %v3232_v41 = vor.u32 %v3966_v35, %v3231_v33 }
  0xa6   : > { %v923_v23 = vadd.f32 %v913_v52, %v856_v7  ;;  %v3225_v52 = vld [vmem:[%s5696_s6 + $0x138] sm:$0xf0]  ;;  %v3962_v7 = vld [vmem:[%s5696_s6 + $0x124] sm:$0xf0] }
  0xa7   : > { %1227 = vmatpush.bf16.msrb.mxu3 %v3120_v4  ;;  %1377 = vmatpush.bf16.msra.mxu2 %v3236_v34  ;;  %v3228_v54 = vor.u32 %v3963_v50, %v3225_v52  ;;  %v3216_v13 = vor.u32 %v3962_v7, %v3215_v5  ;;  %v3383_v7 = vld [vmem:[#allocation2 + $0x70] sm:$0xf] }
  0xa8   : > { %1356 = vmatpush.bf16.msrb.mxu1 %v3248_v15  ;;  %v931_v40 = vadd.f32 %v4666_v24, %v923_v23  ;;  %v3997_v15 = vld [vmem:[#allocation2 + $0xc4] sm:$0xf]  ;;  %v3209_v23 = vld [vmem:[%s5696_s6 + $0x118] sm:$0xf0] }
  0xa9   : > { %v3300_v19 = vor.u32 %v3997_v15, %v3297_v16  ;;  %v3212_v27 = vor.u32 %v3959_v22, %v3209_v23  ;;  %v3385_v16 = vld [vmem:[#allocation2 + $0x78] sm:$0xf0]  ;;  %v3989_v22 = vld [vmem:[#allocation2 + $0x84] sm:$0xf]  ;;  %v3265_v23 = vld [vmem:[#allocation2 + $0x88] sm:$0xf0] }
  0xaa   : > { %v808_v8 = vpop.f32.mrf.mxu2 }
  0xab   : > { %v857_v10 = vpop.f32.mrf.mxu3  ;;  %v915_v29 = vpop.f32.mrf.mxu0  ;;  %1574 = vmatpush.bf16.msra.mxu3 %v3320_v26  ;;  %1378 = vmatpush.bf16.msra.mxu2 %v3228_v54  ;;  %v3993_v54 = vld [vmem:[#allocation2 + $0xa4] sm:$0xf] }
  0xac   : > { %1357 = vmatpush.bf16.msrb.mxu1 %v3240_v25  ;;  %v858_v39 = vadd.f32 %v857_v10, %v808_v8  ;;  %v3295_v8 = vld [vmem:[#allocation2 + $0xc0] sm:$0xf]  ;;  %v3998_v10 = vld [vmem:[#allocation2 + $0xc4] sm:$0xf0]  ;;  %v3207_v25 = vld [vmem:[%s5696_s6 + $0x110] sm:$0xf] }
  0xad   : > { %v3296_v14 = vor.u32 %v3998_v10, %v3295_v8  ;;  %v3208_v35 = vor.u32 %v3960_v28, %v3207_v25  ;;  %v3988_v8 = vld [vmem:[#allocation2 + $0x74] sm:$0xf0]  ;;  %v3375_v28 = vld [vmem:[#allocation2 + $0x60] sm:$0xf] }
  0xae   : > { %2950 = vmatmul.msk.bf16.gmra.mxu1 %vm608_vm0, %v575_v46  ;;  %v3137_v46 = vld [vmem:[%s5696_s6 + $0x28] sm:$0xf0]  ;;  %v3384_v15 = vor.u32 %v3988_v8, %v3383_v7 }
  0xaf   : > { %v3140_v47 = vor.u32 %v3929_v44, %v3137_v46  ;;  %v3313_v44 = vld [vmem:[#allocation2 + $0xe8] sm:$0xf0]  ;;  %1575 = vmatpush.bf16.msra.mxu3 %v3312_v42  ;;  %1379 = vmatpush.bf16.msra.mxu2 %v3220_v6  ;;  %v3273_v6 = vld [vmem:[#allocation2 + $0x98] sm:$0xf0] }
  0xb0   : > { %1358 = vmatpush.bf16.msrb.mxu1 %v3232_v41  ;;  %v3957_v41 = vld [vmem:[%s5696_s6 + $0x104] sm:$0xf]  ;;  %v3201_v42 = vld [vmem:[%s5696_s6 + $0x108] sm:$0xf0] }
  0xb1   : > { %1244 = vmatpush.bf16.msra.mxu0 %v3140_v47  ;;  %v3316_v47 = vor.u32 %v4001_v43, %v3313_v44  ;;  %v3199_v43 = vld [vmem:[%s5696_s6 + $0x100] sm:$0xf] }
  0xb2   : > { %v811_v48 = vpop.f32.mrf.mxu2 }
  0xb3   : > { %v860_v49 = vpop.f32.mrf.mxu3  ;;  %1576 = vmatpush.bf16.msra.mxu3 %v3304_v61  ;;  %1380 = vmatpush.bf16.msra.mxu2 %v3212_v27  ;;  %v3268_v27 = vor.u32 %v3989_v22, %v3265_v23  ;;  %v3353_v23 = vld [vmem:[#allocation2 + $0x38] sm:$0xf0] }
  0xb4   : > { %v861_v4 = vadd.f32 %v860_v49, %v811_v48  ;;  %1359 = vmatpush.bf16.msrb.mxu1 %v3224_v60  ;;  %v3279_v48 = vld [vmem:[#allocation2 + $0xa0] sm:$0xf]  ;;  %v3994_v49 = vld [vmem:[#allocation2 + $0xa4] sm:$0xf0]  ;;  %v3284_v60 = vor.u32 %v3993_v54, %v3281_v55  ;;  %v4019_v54 = vld [vmem:[#allocation2 + $0x174] sm:$0xf] }
  0xb5   : > { %1245 = vmatpush.bf16.msra.mxu0 %v3132_v58  ;;  %v924_v58 = vadd.f32 %v915_v29, %v858_v39  ;;  %v3287_v29 = vld [vmem:[#allocation2 + $0xb0] sm:$0xf]  ;;  %v3289_v39 = vld [vmem:[#allocation2 + $0xb8] sm:$0xf0]  ;;  %v3280_v53 = vor.u32 %v3994_v49, %v3279_v48 }
  0xb6   : > { %v3447_v49 = vld [vmem:[#allocation2 + $0x170] sm:$0xf]  ;;  %v3449_v55 = vld [vmem:[#allocation2 + $0x178] sm:$0xf0] }
  0xb7   : > { %v932_v18 = vadd.f32 %v4666_v24, %v924_v58  ;;  %1577 = vmatpush.bf16.msra.mxu3 %v3296_v14  ;;  %v3276_v14 = vor.u32 %v3991_v1, %v3273_v6  ;;  %v4018_v1 = vld [vmem:[#allocation2 + $0x164] sm:$0xf0] }
  0xb8   : > { %1360 = vmatpush.bf16.msrb.mxu1 %v3216_v13  ;;  %v3987_v13 = vld [vmem:[#allocation2 + $0x74] sm:$0xf] }
  0xb9   : > { %1246 = vmatpush.bf16.msra.mxu0 %v3124_v12  ;;  %v918_v12 = vpop.f32.mrf.mxu0  ;;  %v3388_v25 = vor.u32 %v3987_v13, %v3385_v16  ;;  %v3351_v16 = vld [vmem:[#allocation2 + $0x30] sm:$0xf] }
  0xba   : > { %v925_v26 = vadd.f32 %v918_v12, %v861_v4  ;;  %v813_v33 = vpop.f32.mrf.mxu2 }
  0xbb   : > { %v862_v34 = vpop.f32.mrf.mxu3 }
  0xbc   : > { %v863_v50 = vadd.f32 %v862_v34, %v813_v33  ;;  %1361 = vmatpush.bf16.msrb.mxu1 %v3208_v35  ;;  %v933_v58 = vadd.f32 %v4666_v24, %v925_v26  ;;  %v3377_v35 = vld [vmem:[#allocation2 + $0x68] sm:$0xf0] }
  0xbd   : > { %1593 = vmatpush.bf16.msrb.mxu0 %v3324_v30  ;;  %v3996_v30 = vld [vmem:[#allocation2 + $0xb4] sm:$0xf0] }
  0xbe   : > { %v3288_v36 = vor.u32 %v3996_v30, %v3287_v29  ;;  %v3986_v29 = vld [vmem:[#allocation2 + $0x64] sm:$0xf0]  ;;  %v3985_v30 = vld [vmem:[#allocation2 + $0x64] sm:$0xf] }
  0xbf   : > { %v3376_v34 = vor.u32 %v3986_v29, %v3375_v28  ;;  %v4015_v29 = vld [vmem:[#allocation2 + $0x154] sm:$0xf] }
  0xc0   : > { %1578 = vmatpush.bf16.msra.mxu3 %v3288_v36 }
  0xc1   : > { %1594 = vmatpush.bf16.msrb.mxu0 %v3316_v47  ;;  %v3958_v47 = vld [vmem:[%s5696_s6 + $0x104] sm:$0xf0]  ;;  %v920_v61 = vpop.f32.mrf.mxu0 }
  0xc2   : > { %v3200_v52 = vor.u32 %v3958_v47, %v3199_v43  ;;  %v926_v10 = vadd.f32 %v920_v61, %v863_v50  ;;  %v4020_v50 = vld [vmem:[#allocation2 + $0x174] sm:$0xf0]  ;;  %v3981_v61 = vld [vmem:[#allocation2 + $0x44] sm:$0xf] }
  0xc4   : > { %1579 = vmatpush.bf16.msra.mxu3 %v3280_v53  ;;  %1362 = vmatpush.bf16.msrb.mxu1 %v3200_v52  ;;  %v3448_v53 = vor.u32 %v4020_v50, %v3447_v49 }
  0xc5   : > { %1595 = vmatpush.bf16.msrb.mxu0 %v3308_v0  ;;  %v3271_v0 = vld [vmem:[#allocation2 + $0x90] sm:$0xf] }
  0xc6   : > { %v3272_v5 = vor.u32 %v3992_v2, %v3271_v0  ;;  %v3439_v2 = vld [vmem:[#allocation2 + $0x160] sm:$0xf] }
  0xc7   : > { %v3440_v8 = vor.u32 %v4018_v1, %v3439_v2  ;;  %v3417_v2 = vld [vmem:[#allocation2 + $0x138] sm:$0xf0]  ;;  %v3327_v1 = vld [vmem:[#allocation2] sm:$0xf] }
  0xc8   : > { %1580 = vmatpush.bf16.msra.mxu3 %v3272_v5  ;;  %v4017_v5 = vld [vmem:[#allocation2 + $0x164] sm:$0xf] }
  0xc9   : > { %1596 = vmatpush.bf16.msrb.mxu0 %v3300_v19 }
 0x11b   : > { %v624_v46 = vpop.f32.mrf.mxu1 }
 0x11c   : > { %v4693_v59 = vadd.f32 %v931_v40, %v624_v46  ;;  %v3292_v40 = vor.u32 %v3995_v38, %v3289_v39  ;;  %v3204_v46 = vor.u32 %v3957_v41, %v3201_v42  ;;  %v3380_v38 = vor.u32 %v3985_v30, %v3377_v35  ;;  %v3367_v41 = vld [vmem:[#allocation2 + $0x50] sm:$0xf]  ;;  %v3984_v42 = vld [vmem:[#allocation2 + $0x54] sm:$0xf0]  ;;  %v3433_v30 = vld [vmem:[#allocation2 + $0x158] sm:$0xf0] }
 0x11d   : > { %v3368_v43 = vor.u32 %v3984_v42, %v3367_v41  ;;  %v3977_v35 = vld [vmem:[#allocation2 + $0x24] sm:$0xf]  ;;  %v3423_v41 = vld [vmem:[#allocation2 + $0x140] sm:$0xf] }
 0x11e   : > { %v939_v17 = vmax.f32 %v4693_v59, 0.0  ;;  %1597 = vmatpush.bf16.msrb.mxu0 %v3292_v40  ;;  %1381 = vmatpush.bf16.msra.mxu2 %v3204_v46  ;;  %v3369_v46 = vld [vmem:[#allocation2 + $0x58] sm:$0xf0] }
 0x120   : > { %v943_v31 = vpack.c.bf16 %v939_v17, %v939_v17  ;;  %v3263_v17 = vld [vmem:[#allocation2 + $0x80] sm:$0xf] }
 0x122   : > { %v951_v56 = vunpack.c.l.b16 %v943_v31  ;;  %1598 = vmatpush.bf16.msrb.mxu0 %v3284_v60  ;;  %v3982_v60 = vld [vmem:[#allocation2 + $0x44] sm:$0xf0] }
 0x123   : > { %v626_v20 = vpop.f32.mrf.mxu1 }
 0x124   : > { %v4709_v21 = vadd.f32 %v932_v18, %v626_v20  ;;  %v3990_v18 = vld [vmem:[#allocation2 + $0x84] sm:$0xf0] }
 0x125   : > { %v3264_v26 = vor.u32 %v3990_v18, %v3263_v17  ;;  %v3980_v17 = vld [vmem:[#allocation2 + $0x34] sm:$0xf0]  ;;  %v3979_v18 = vld [vmem:[#allocation2 + $0x34] sm:$0xf] }
 0x126   : > { %v940_v32 = vmax.f32 %v4709_v21, 0.0  ;;  %1599 = vmatpush.bf16.msrb.mxu0 %v3276_v14  ;;  %v3352_v22 = vor.u32 %v3980_v17, %v3351_v16  ;;  %v4010_v16 = vld [vmem:[#allocation2 + $0x124] sm:$0xf0]  ;;  %v4009_v17 = vld [vmem:[#allocation2 + $0x124] sm:$0xf] }
 0x127   : > { %1581 = vmatpush.bf16.msra.mxu3 %v3264_v26  ;;  %v4016_v26 = vld [vmem:[#allocation2 + $0x154] sm:$0xf0] }
 0x128   : > { %v944_v44 = vpack.c.bf16 %v940_v32, %v940_v32  ;;  %v934_v32 = vadd.f32 %v4666_v24, %v926_v10  ;;  %v3441_v10 = vld [vmem:[#allocation2 + $0x168] sm:$0xf0] }
 0x129   : > { %v3444_v14 = vor.u32 %v4017_v5, %v3441_v10  ;;  %v3974_v5 = vld [vmem:[#allocation2 + $0x4] sm:$0xf0]  ;;  %v3329_v10 = vld [vmem:[#allocation2 + $0x8] sm:$0xf0] }
 0x12a   : > { %v952_v57 = vunpack.c.l.b16 %v944_v44  ;;  %1600 = vmatpush.bf16.msrb.mxu0 %v3268_v27  ;;  %v3983_v44 = vld [vmem:[#allocation2 + $0x54] sm:$0xf] }
 0x12b   : > { %v629_v62 = vpop.f32.mrf.mxu1  ;;  %v3372_v52 = vor.u32 %v3983_v44, %v3369_v46  ;;  %v3425_v44 = vld [vmem:[#allocation2 + $0x148] sm:$0xf0] }
 0x12c   : > { %v4737_v63 = vpack.c.b16 %v952_v57, %v951_v56  ;;  %v4739_v4 = vadd.f32 %v933_v58, %v629_v62  ;;  %v3359_v56 = vld [vmem:[#allocation2 + $0x40] sm:$0xf]  ;;  %v3452_v58 = vor.u32 %v4019_v54, %v3449_v55  ;;  %v3361_v62 = vld [vmem:[#allocation2 + $0x48] sm:$0xf0]  ;;  %v3976_v54 = vld [vmem:[#allocation2 + $0x14] sm:$0xf0] }
 0x12d   : > { %v3360_v0 = vor.u32 %v3982_v60, %v3359_v56  ;;  %v3364_v13 = vor.u32 %v3981_v61, %v3361_v62  ;;  %v3337_v60 = vld [vmem:[#allocation2 + $0x18] sm:$0xf0]  ;;  %v3415_v61 = vld [vmem:[#allocation2 + $0x130] sm:$0xf]  ;;  %v4012_v62 = vld [vmem:[#allocation2 + $0x134] sm:$0xf0] }
 0x12e   : > { %1110 = vmatmul.bf16.vlgmr.msra.gmra.mxu1 %v4737_v63  ;;  %1129 = vmatmul.bf16.vlgmr.msrb.gmra.mxu2 %v4737_v63  ;;  %v958_v12 = vshrl.u32 %v4737_v63, 16  ;;  %v961_v20 = vshll.u32 %v4737_v63, 16  ;;  %v941_v31 = vmax.f32 %v4739_v4, 0.0  ;;  %v1416_v63 = vpack.c.bf16 %v4709_v21, %v4709_v21 }
 0x12f   : > { %1692 = vmatpush.bf16.msra.mxu1 %v3384_v15  ;;  %1711 = vmatpush.bf16.msrb.mxu2 %v3388_v25  ;;  %v3431_v25 = vld [vmem:[#allocation2 + $0x150] sm:$0xf] }
 0x130   : > { %v4746_v19 = vrot.slane %v958_v12, 7  ;;  %v945_v47 = vpack.c.bf16 %v941_v31, %v941_v31  ;;  %v3432_v28 = vor.u32 %v4016_v26, %v3431_v25  ;;  %v3356_v31 = vor.u32 %v3979_v18, %v3353_v23  ;;  %v3409_v18 = vld [vmem:[#allocation2 + $0x128] sm:$0xf0] }
 0x131   : > { %v975_v50 = vrot.slane %v961_v20, 1  ;;  %v3412_v26 = vor.u32 %v4009_v17, %v3409_v18  ;;  %v1424_v21 = vunpack.c.l.b16 %v1416_v63  ;;  %v4068_v17 = vld [vmem:[%s5700_s10 + $0x174] sm:$0xf0]  ;;  %v3599_v63 = vld [vmem:[%s5700_s10 + $0x1e0] sm:$0xf] }
 0x132   : > { %v963_v33 = vor.u32 %v961_v20, %v4746_v19  ;;  %v953_v6 = vunpack.c.l.b16 %v945_v47  ;;  %v4011_v20 = vld [vmem:[#allocation2 + $0x134] sm:$0xf] }
 0x133   : > { %v631_v36 = vpop.f32.mrf.mxu1  ;;  %1693 = vmatpush.bf16.msra.mxu1 %v3376_v34  ;;  %1712 = vmatpush.bf16.msrb.mxu2 %v3380_v38  ;;  %v3978_v34 = vld [vmem:[#allocation2 + $0x24] sm:$0xf0] }
 0x134   : > { %v4754_v39 = vadd.f32 %v934_v32, %v631_v36  ;;  %v974_v40 = vsel %vm4344_vm9, 0, %v963_v33  ;;  %v3436_v32 = vor.u32 %v4015_v29, %v3433_v30  ;;  %v3343_v33 = vld [vmem:[#allocation2 + $0x20] sm:$0xf]  ;;  %v3399_v29 = vld [vmem:[#allocation2 + $0x110] sm:$0xf] }
 0x135   : > { %v983_v24 = vsel %vm4365_vm12, 0, %v974_v40  ;;  %v3345_v40 = vld [vmem:[#allocation2 + $0x28] sm:$0xf0]  ;;  %v3344_v42 = vor.u32 %v3978_v34, %v3343_v33  ;;  %v4008_v30 = vld [vmem:[#allocation2 + $0x114] sm:$0xf0] }
 0x136   : > { %v942_v48 = vmax.f32 %v4754_v39, 0.0  ;;  %1228 = vmatmul.bf16.vlgmr.msrb.gmra.mxu3 %v983_v24  ;;  %1247 = vmatmul.bf16.vlgmr.msra.gmra.mxu0 %v983_v24  ;;  %v4014_v24 = vld [vmem:[#allocation2 + $0x144] sm:$0xf0]  ;;  %v3401_v33 = vld [vmem:[#allocation2 + $0x118] sm:$0xf0] }
 0x137   : > { %1694 = vmatpush.bf16.msra.mxu1 %v3368_v43  ;;  %1827 = vmatpush.bf16.msrb.mxu3 %v3448_v53  ;;  %v4013_v43 = vld [vmem:[#allocation2 + $0x144] sm:$0xf]  ;;  %v3424_v47 = vor.u32 %v4014_v24, %v3423_v41  ;;  %v3335_v53 = vld [vmem:[#allocation2 + $0x10] sm:$0xf]  ;;  %v3391_v34 = vld [vmem:[#allocation2 + $0x100] sm:$0xf] }
 0x138   : > { %v946_v57 = vpack.c.bf16 %v942_v48, %v942_v48  ;;  %1846 = vmatpush.bf16.msra.mxu0 %v3452_v58  ;;  %1713 = vmatpush.bf16.msrb.mxu2 %v3372_v52  ;;  %v3348_v48 = vor.u32 %v3977_v35, %v3345_v40  ;;  %v3428_v49 = vor.u32 %v4013_v43, %v3425_v44  ;;  %v3975_v58 = vld [vmem:[#allocation2 + $0x14] sm:$0xf]  ;;  %v4006_v35 = vld [vmem:[#allocation2 + $0x104] sm:$0xf0]  ;;  %v3393_v40 = vld [vmem:[#allocation2 + $0x108] sm:$0xf0] }
 0x139   : > { %v3392_v41 = vor.u32 %v4006_v35, %v3391_v34  ;;  %v4066_v34 = vld [vmem:[%s5700_s10 + $0x164] sm:$0xf0]  ;;  %v4081_v35 = vld [vmem:[%s5700_s10 + $0x1e4] sm:$0xf] }
 0x13a   : > { %v954_v7 = vunpack.c.l.b16 %v946_v57  ;;  %v3336_v57 = vor.u32 %v3976_v54, %v3335_v53 }
 0x13b   : > { %1695 = vmatpush.bf16.msra.mxu1 %v3360_v0  ;;  %1828 = vmatpush.bf16.msrb.mxu3 %v3440_v8  ;;  %v3416_v0 = vor.u32 %v4012_v62, %v3415_v61  ;;  %v3973_v8 = vld [vmem:[#allocation2 + $0x4] sm:$0xf] }
 0x13c   : > { %v4761_v15 = vpack.c.b16 %v954_v7, %v953_v6  ;;  %1714 = vmatpush.bf16.msrb.mxu2 %v3364_v13  ;;  %1847 = vmatpush.bf16.msra.mxu0 %v3444_v14  ;;  %v976_v6 = vor.u32 %v975_v50, %v958_v12  ;;  %v3420_v7 = vor.u32 %v4011_v20, %v3417_v2  ;;  %v3407_v13 = vld [vmem:[#allocation2 + $0x120] sm:$0xf] }
 0x13d   : > { %v3328_v14 = vor.u32 %v3974_v5, %v3327_v1  ;;  %v3408_v23 = vor.u32 %v4010_v16, %v3407_v13  ;;  %v3332_v25 = vor.u32 %v3973_v8, %v3329_v10  ;;  %v4084_v8 = vld [vmem:[%s5700_s10 + $0x1f4] sm:$0xf0]  ;;  %v4067_v10 = vld [vmem:[%s5700_s10 + $0x174] sm:$0xf]  ;;  %v3543_v16 = vld [vmem:[%s5700_s10 + $0x170] sm:$0xf] }
 0x13e   : > { %1115 = vmatmul.bf16.gmra.mxu1 %v4761_v15  ;;  %1134 = vmatmul.bf16.gmra.mxu2 %v4761_v15  ;;  %v965_v27 = vshrl.u32 %v4761_v15, 16  ;;  %v968_v38 = vshll.u32 %v4761_v15, 16 }
 0x13f   : > { %1696 = vmatpush.bf16.msra.mxu1 %v3352_v22  ;;  %1829 = vmatpush.bf16.msrb.mxu3 %v3432_v28  ;;  %v1415_v28 = vpack.c.bf16 %v4693_v59, %v4693_v59 }
 0x140   : > { %v967_v36 = vrot.slane %v965_v27, 7  ;;  %1715 = vmatpush.bf16.msrb.mxu2 %v3356_v31  ;;  %1848 = vmatpush.bf16.msra.mxu0 %v3436_v32  ;;  %v4775_v56 = vrot.slane %v968_v38, 1  ;;  %v4007_v31 = vld [vmem:[#allocation2 + $0x114] sm:$0xf]  ;;  %v3400_v32 = vor.u32 %v4008_v30, %v3399_v29 }
 0x142   : > { %v970_v46 = vor.u32 %v968_v38, %v967_v36  ;;  %v978_v22 = vsel %vm665_vm13, %v976_v6, %v4775_v56  ;;  %v3404_v36 = vor.u32 %v4007_v31, %v3401_v33  ;;  %v4005_v38 = vld [vmem:[#allocation2 + $0x104] sm:$0xf]  ;;  %v979_v43 = vor.u32 %v4775_v56, %v965_v27  ;;  %v3537_v31 = vld [vmem:[%s5700_s10 + $0x168] sm:$0xf0]  ;;  %v3535_v33 = vld [vmem:[%s5700_s10 + $0x160] sm:$0xf] }
 0x143   : > { %1697 = vmatpush.bf16.msra.mxu1 %v3344_v42  ;;  %1830 = vmatpush.bf16.msrb.mxu3 %v3424_v47  ;;  %v985_v12 = vsel %vm4381_vm1, 0, %v978_v22  ;;  %v1423_v42 = vunpack.c.l.b16 %v1415_v28  ;;  %v3396_v59 = vor.u32 %v4005_v38, %v3393_v40  ;;  %v3544_v22 = vor.u32 %v4068_v17, %v3543_v16  ;;  %v4065_v28 = vld [vmem:[%s5700_s10 + $0x164] sm:$0xf]  ;;  %v3601_v38 = vld [vmem:[%s5700_s10 + $0x1e8] sm:$0xf0] }
 0x144   : > { %v971_v52 = vsel %vm644_vm5, %v4746_v19, %v970_v46  ;;  %1716 = vmatpush.bf16.msrb.mxu2 %v3348_v48  ;;  %1849 = vmatpush.bf16.msra.mxu0 %v3428_v49  ;;  %v3340_v19 = vor.u32 %v3975_v58, %v3337_v60  ;;  %v982_v44 = vsel %vm4416_vm15, %v979_v43, 0  ;;  %v1418_v46 = vpack.c.bf16 %v4754_v39, %v4754_v39  ;;  %v3591_v40 = vld [vmem:[%s5700_s10 + $0x1d0] sm:$0xf]  ;;  %v3529_v43 = vld [vmem:[%s5700_s10 + $0x158] sm:$0xf0] }
 0x145   : > { %v984_v55 = vsel %vm4407_vm6, 0, %v971_v52  ;;  %v1427_v24 = vpack.c.b16 %v1424_v21, %v1423_v42  ;;  %v986_v47 = vsel %vm4426_vm2, 0, %v982_v44  ;;  %v1417_v48 = vpack.c.bf16 %v4739_v4, %v4739_v4  ;;  %v3527_v44 = vld [vmem:[%s5700_s10 + $0x150] sm:$0xf]  ;;  %v4060_v16 = vld [vmem:[%s5700_s10 + $0x134] sm:$0xf0] }
 0x146   : > { %1233 = vmatmul.bf16.gmra.mxu3 %v984_v55  ;;  %1252 = vmatmul.bf16.gmra.mxu0 %v984_v55  ;;  %v1426_v50 = vunpack.c.l.b16 %v1418_v46  ;;  %v3604_v42 = vor.u32 %v4081_v35, %v3601_v38  ;;  %v4075_v17 = vld [vmem:[%s5700_s10 + $0x1b4] sm:$0xf]  ;;  %v4058_v35 = vld [vmem:[%s5700_s10 + $0x124] sm:$0xf0] }
 0x147   : > { %1698 = vmatpush.bf16.msra.mxu1 %v3336_v57  ;;  %1831 = vmatpush.bf16.msrb.mxu3 %v3416_v0  ;;  %v1430_v49 = vshrl.u32 %v1427_v24, 16  ;;  %v1425_v15 = vunpack.c.l.b16 %v1417_v48  ;;  %v1433_v53 = vshll.u32 %v1427_v24, 16 }
 0x148   : > { %1717 = vmatpush.bf16.msrb.mxu2 %v3340_v19  ;;  %1850 = vmatpush.bf16.msra.mxu0 %v3420_v7  ;;  %v3607_v7 = vld [vmem:[%s5700_s10 + $0x1f0] sm:$0xf] }
 0x149   : > { %v1432_v52 = vrot.slane %v1430_v49, 7  ;;  %v1428_v27 = vpack.c.b16 %v1426_v50, %v1425_v15  ;;  %v1447_v56 = vrot.slane %v1433_v53, 1  ;;  %v3608_v13 = vor.u32 %v4084_v8, %v3607_v7  ;;  %v4079_v50 = vld [vmem:[%s5700_s10 + $0x1d4] sm:$0xf]  ;;  %v3593_v15 = vld [vmem:[%s5700_s10 + $0x1d8] sm:$0xf0] }
 0x14a   : > { %v4059_v7 = vld [vmem:[%s5700_s10 + $0x134] sm:$0xf]  ;;  %v3513_v8 = vld [vmem:[%s5700_s10 + $0x138] sm:$0xf0] }
 0x14b   : > { %1699 = vmatpush.bf16.msra.mxu1 %v3328_v14  ;;  %1832 = vmatpush.bf16.msrb.mxu3 %v3408_v23  ;;  %v1435_v54 = vor.u32 %v1433_v53, %v1432_v52  ;;  %v1440_v55 = vshll.u32 %v1428_v27, 16  ;;  %v1437_v58 = vshrl.u32 %v1428_v27, 16  ;;  %v1448_v60 = vor.u32 %v1447_v56, %v1430_v49  ;;  %v3545_v14 = vld [vmem:[%s5700_s10 + $0x178] sm:$0xf0]  ;;  %v4083_v23 = vld [vmem:[%s5700_s10 + $0x1f4] sm:$0xf] }
 0x14c   : > { %1718 = vmatpush.bf16.msrb.mxu2 %v3332_v25  ;;  %1851 = vmatpush.bf16.msra.mxu0 %v3412_v26  ;;  %v3548_v18 = vor.u32 %v4067_v10, %v3545_v14  ;;  %v3609_v25 = vld [vmem:[%s5700_s10 + $0x1f8] sm:$0xf0]  ;;  %v4064_v49 = vld [vmem:[%s5700_s10 + $0x154] sm:$0xf0]  ;;  %v4061_v56 = vld [vmem:[%s5700_s10 + $0x144] sm:$0xf] }
 0x14d   : > { %v1446_v39 = vsel %vm4344_vm9, 0, %v1435_v54  ;;  %v1449_v4 = vrot.slane %v1440_v55, 1  ;;  %v1439_v62 = vrot.slane %v1437_v58, 7  ;;  %v3612_v26 = vor.u32 %v4083_v23, %v3609_v25  ;;  %v3511_v14 = vld [vmem:[%s5700_s10 + $0x130] sm:$0xf] }
 0x14e   : > { %1363 = vmatmul.bf16.vlgmr.msrb.gmra.mxu1 %v985_v12  ;;  %1382 = vmatmul.bf16.vlgmr.msra.gmra.mxu2 %v985_v12  ;;  %v1455_v57 = vsel %vm4365_vm12, 0, %v1446_v39  ;;  %v4082_v12 = vld [vmem:[%s5700_s10 + $0x1e4] sm:$0xf0]  ;;  %v3583_v39 = vld [vmem:[%s5700_s10 + $0x1c0] sm:$0xf] }
 0x14f   : > { %1833 = vmatpush.bf16.msrb.mxu3 %v3400_v32  ;;  %v1450_v61 = vsel %vm665_vm13, %v1448_v60, %v1449_v4  ;;  %v1442_v19 = vor.u32 %v1440_v55, %v1439_v62  ;;  %v1451_v1 = vor.u32 %v1449_v4, %v1437_v58  ;;  %2204 = vmatpush.bf16.msrb.mxu1 %v3544_v22  ;;  %v4078_v55 = vld [vmem:[%s5700_s10 + $0x1c4] sm:$0xf0]  ;;  %v3521_v60 = vld [vmem:[%s5700_s10 + $0x148] sm:$0xf0]  ;;  %v3577_v22 = vld [vmem:[%s5700_s10 + $0x1b8] sm:$0xf0] }
 0x150   : > { %1852 = vmatpush.bf16.msra.mxu0 %v3404_v36  ;;  %v1457_v20 = vsel %vm4381_vm1, 0, %v1450_v61  ;;  %2223 = vmatpush.bf16.msra.mxu2 %v3608_v13  ;;  %v3600_v30 = vor.u32 %v4082_v12, %v3599_v63  ;;  %v3540_v32 = vor.u32 %v4065_v28, %v3537_v31  ;;  %v3536_v36 = vor.u32 %v4066_v34, %v3535_v33  ;;  %v3519_v61 = vld [vmem:[%s5700_s10 + $0x140] sm:$0xf]  ;;  %v4062_v62 = vld [vmem:[%s5700_s10 + $0x144] sm:$0xf0] }
 0x151   : > { %v1443_v0 = vsel %vm644_vm5, %v1432_v52, %v1442_v19  ;;  %v1454_v5 = vsel %vm4416_vm15, %v1451_v1, 0  ;;  %v3528_v52 = vor.u32 %v4064_v49, %v3527_v44  ;;  %v3584_v58 = vor.u32 %v4078_v55, %v3583_v39  ;;  %v3575_v1 = vld [vmem:[%s5700_s10 + $0x1b0] sm:$0xf]  ;;  %v3567_v63 = vld [vmem:[%s5700_s10 + $0x1a0] sm:$0xf] }
 0x152   : > { %v1456_v2 = vsel %vm4407_vm6, 0, %v1443_v0  ;;  %v1458_v6 = vsel %vm4426_vm2, 0, %v1454_v5  ;;  %v3520_v19 = vor.u32 %v4062_v62, %v3519_v61  ;;  %v4077_v0 = vld [vmem:[%s5700_s10 + $0x1c4] sm:$0xf]  ;;  %v3516_v13 = vor.u32 %v4059_v7, %v3513_v8  ;;  %v4074_v12 = vld [vmem:[%s5700_s10 + $0x1a4] sm:$0xf0] }
 0x153   : > { %1834 = vmatpush.bf16.msrb.mxu3 %v3392_v41  ;;  %v4080_v41 = vld [vmem:[%s5700_s10 + $0x1d4] sm:$0xf0]  ;;  %2205 = vmatpush.bf16.msrb.mxu1 %v3536_v36  ;;  %v3580_v23 = vor.u32 %v4075_v17, %v3577_v22  ;;  %v4057_v28 = vld [vmem:[%s5700_s10 + $0x124] sm:$0xf]  ;;  %v3505_v33 = vld [vmem:[%s5700_s10 + $0x128] sm:$0xf0] }
 0x154   : > { %1853 = vmatpush.bf16.msra.mxu0 %v3396_v59  ;;  %2224 = vmatpush.bf16.msra.mxu2 %v3600_v30  ;;  %v3592_v59 = vor.u32 %v4080_v41, %v3591_v40  ;;  %v3503_v34 = vld [vmem:[%s5700_s10 + $0x120] sm:$0xf]  ;;  %v3508_v36 = vor.u32 %v4057_v28, %v3505_v33  ;;  %v4073_v40 = vld [vmem:[%s5700_s10 + $0x1a4] sm:$0xf]  ;;  %v3569_v41 = vld [vmem:[%s5700_s10 + $0x1a8] sm:$0xf0] }
 0x155   : > { %v3504_v38 = vor.u32 %v4058_v35, %v3503_v34  ;;  %v3497_v44 = vld [vmem:[%s5700_s10 + $0x118] sm:$0xf0]  ;;  %v4070_v61 = vld [vmem:[%s5700_s10 + $0x184] sm:$0xf0]  ;;  %v4053_v62 = vld [vmem:[%s5700_s10 + $0x104] sm:$0xf] }
 0x156   : > { %1582 = vmatmul.bf16.vlgmr.msra.gmra.mxu3 %v1427_v24  ;;  %1601 = vmatmul.bf16.vlgmr.msrb.gmra.mxu0 %v1427_v24  ;;  %v4063_v24 = vld [vmem:[%s5700_s10 + $0x154] sm:$0xf]  ;;  %v3561_v39 = vld [vmem:[%s5700_s10 + $0x198] sm:$0xf0]  ;;  %v4052_v17 = vld [vmem:[%s5700_s10 + $0xf4] sm:$0xf0] }
 0x157   : > { %2242 = vmatpush.bf16.msra.mxu3 %v3548_v18  ;;  %v3532_v48 = vor.u32 %v4063_v24, %v3529_v43  ;;  %2206 = vmatpush.bf16.msrb.mxu1 %v3528_v52  ;;  %v3512_v18 = vor.u32 %v4060_v16, %v3511_v14  ;;  %v4072_v24 = vld [vmem:[%s5700_s10 + $0x194] sm:$0xf0]  ;;  %v4055_v43 = vld [vmem:[%s5700_s10 + $0x114] sm:$0xf]  ;;  %v3735_v14 = vld [vmem:[%s5700_s10 + $0xf0] sm:$0xf] }
 0x158   : > { %2261 = vmatpush.bf16.msrb.mxu0 %v3612_v26  ;;  %2225 = vmatpush.bf16.msra.mxu2 %v3592_v59  ;;  %v3572_v59 = vor.u32 %v4073_v40, %v3569_v41  ;;  %v3500_v49 = vor.u32 %v4055_v43, %v3497_v44  ;;  %v4071_v52 = vld [vmem:[%s5700_s10 + $0x194] sm:$0xf]  ;;  %v3673_v22 = vld [vmem:[%s5700_s10 + $0x78] sm:$0xf0]  ;;  %v4036_v28 = vld [vmem:[%s5700_s10 + $0x74] sm:$0xf0] }
 0x159   : > { %v3564_v55 = vor.u32 %v4071_v52, %v3561_v39  ;;  %v3737_v34 = vld [vmem:[%s5700_s10 + $0xf8] sm:$0xf0] }
 0x15b   : > { %2243 = vmatpush.bf16.msra.mxu3 %v3540_v32  ;;  %2207 = vmatpush.bf16.msrb.mxu1 %v3520_v19  ;;  %v3568_v32 = vor.u32 %v4074_v12, %v3567_v63  ;;  %v3671_v12 = vld [vmem:[%s5700_s10 + $0x70] sm:$0xf] }
 0x15c   : > { %2262 = vmatpush.bf16.msrb.mxu0 %v3604_v42  ;;  %2226 = vmatpush.bf16.msra.mxu2 %v3584_v58  ;;  %v3559_v42 = vld [vmem:[%s5700_s10 + $0x190] sm:$0xf]  ;;  %v3672_v33 = vor.u32 %v4036_v28, %v3671_v12 }
 0x15e   : > { %1368 = vmatmul.bf16.gmra.mxu1 %v986_v47  ;;  %1387 = vmatmul.bf16.gmra.mxu2 %v986_v47 }
 0x15f   : > { %2244 = vmatpush.bf16.msra.mxu3 %v3532_v48  ;;  %2208 = vmatpush.bf16.msrb.mxu1 %v3512_v18  ;;  %v3560_v48 = vor.u32 %v4072_v24, %v3559_v42  ;;  %v4035_v18 = vld [vmem:[%s5700_s10 + $0x74] sm:$0xf] }
 0x160   : > { %v3676_v63 = vor.u32 %v4035_v18, %v3673_v22  ;;  %v4046_v22 = vld [vmem:[%s5700_s10 + $0xc4] sm:$0xf0] }
 0x163   : > { %2209 = vmatpush.bf16.msrb.mxu1 %v3504_v38 }
 0x166   : > { %1587 = vmatmul.bf16.gmra.mxu3 %v1428_v27  ;;  %1606 = vmatmul.bf16.gmra.mxu0 %v1428_v27  ;;  %v3596_v27 = vor.u32 %v4079_v50, %v3593_v15  ;;  %v3495_v50 = vld [vmem:[%s5700_s10 + $0x110] sm:$0xf]  ;;  %v4056_v15 = vld [vmem:[%s5700_s10 + $0x114] sm:$0xf0] }
 0x168   : > { %2263 = vmatpush.bf16.msrb.mxu0 %v3596_v27  ;;  %v3496_v27 = vor.u32 %v4056_v15, %v3495_v50  ;;  %v3663_v50 = vld [vmem:[%s5700_s10 + $0x60] sm:$0xf]  ;;  %v4034_v15 = vld [vmem:[%s5700_s10 + $0x64] sm:$0xf0] }
 0x169   : > { %v3664_v39 = vor.u32 %v4034_v15, %v3663_v50  ;;  %v4027_v50 = vld [vmem:[%s5700_s10 + $0x34] sm:$0xf]  ;;  %v3641_v15 = vld [vmem:[%s5700_s10 + $0x38] sm:$0xf0] }
 0x16a   : > { %2210 = vmatpush.bf16.msrb.mxu1 %v3496_v27 }
 0x16e   : > { %1700 = vmatmul.bf16.vlgmr.msra.gmra.mxu1 %v1455_v57  ;;  %1719 = vmatmul.bf16.vlgmr.msrb.gmra.mxu2 %v1455_v57 }
 0x176   : > { %1835 = vmatmul.bf16.vlgmr.msrb.gmra.mxu3 %v1457_v20  ;;  %1854 = vmatmul.bf16.vlgmr.msra.gmra.mxu0 %v1457_v20  ;;  %v3524_v20 = vor.u32 %v4061_v56, %v3521_v60  ;;  %v3551_v60 = vld [vmem:[%s5700_s10 + $0x180] sm:$0xf] }
 0x178   : > { %2245 = vmatpush.bf16.msra.mxu3 %v3524_v20 }
 0x17c   : > { %2246 = vmatpush.bf16.msra.mxu3 %v3516_v13  ;;  %v3553_v13 = vld [vmem:[%s5700_s10 + $0x188] sm:$0xf0] }
 0x17e   : > { %1705 = vmatmul.bf16.gmra.mxu1 %v1456_v2  ;;  %1724 = vmatmul.bf16.gmra.mxu2 %v1456_v2  ;;  %v3585_v2 = vld [vmem:[%s5700_s10 + $0x1c8] sm:$0xf0] }
 0x17f   : > { %v3588_v5 = vor.u32 %v4077_v0, %v3585_v2  ;;  %v3552_v0 = vor.u32 %v4070_v61, %v3551_v60  ;;  %v3489_v2 = vld [vmem:[%s5700_s10 + $0x108] sm:$0xf0]  ;;  %v3719_v61 = vld [vmem:[%s5700_s10 + $0xd0] sm:$0xf] }
 0x180   : > { %2247 = vmatpush.bf16.msra.mxu3 %v3508_v36  ;;  %v3492_v7 = vor.u32 %v4053_v62, %v3489_v2  ;;  %v3729_v60 = vld [vmem:[%s5700_s10 + $0xe8] sm:$0xf0] }
 0x181   : > { %2264 = vmatpush.bf16.msrb.mxu0 %v3588_v5  ;;  %v4054_v5 = vld [vmem:[%s5700_s10 + $0x104] sm:$0xf0] }
 0x184   : > { %2248 = vmatpush.bf16.msra.mxu3 %v3500_v49  ;;  %v3665_v49 = vld [vmem:[%s5700_s10 + $0x68] sm:$0xf0] }
 0x185   : > { %2265 = vmatpush.bf16.msrb.mxu0 %v3580_v23  ;;  %v3736_v23 = vor.u32 %v4052_v17, %v3735_v14  ;;  %v3721_v14 = vld [vmem:[%s5700_s10 + $0xd8] sm:$0xf0] }
 0x186   : > { %1840 = vmatmul.bf16.gmra.mxu3 %v1458_v6  ;;  %1859 = vmatmul.bf16.gmra.mxu0 %v1458_v6  ;;  %v4076_v6 = vld [vmem:[%s5700_s10 + $0x1b4] sm:$0xf0] }
 0x187   : > { %v3576_v10 = vor.u32 %v4076_v6, %v3575_v1  ;;  %v3487_v1 = vld [vmem:[%s5700_s10 + $0x100] sm:$0xf] }
 0x188   : > { %v1401_v6 = vld [vmem:[%s5697_s7] sm:$0x3]  ;;  %v3488_v8 = vor.u32 %v4054_v5, %v3487_v1  ;;  %2249 = vmatpush.bf16.msra.mxu3 %v3492_v7  ;;  %v4032_v7 = vld [vmem:[%s5700_s10 + $0x54] sm:$0xf0] }
 0x189   : > { %2227 = vmatpush.bf16.msra.mxu2 %v3576_v10  ;;  %2266 = vmatpush.bf16.msrb.mxu0 %v3572_v59  ;;  %v4069_v10 = vld [vmem:[%s5700_s10 + $0x184] sm:$0xf]  ;;  %v5065_v40 = vperm.slane %v1401_v6, 0  ;;  %v5069_v59 = vperm.slane %v1401_v6, 1  ;;  %v3655_v6 = vld [vmem:[%s5700_s10 + $0x50] sm:$0xf] }
 0x18a   : > { %v3556_v16 = vor.u32 %v4069_v10, %v3553_v13  ;;  %2211 = vmatpush.bf16.msrb.mxu1 %v3488_v8  ;;  %v3656_v10 = vor.u32 %v4032_v7, %v3655_v6  ;;  %v4047_v13 = vld [vmem:[%s5700_s10 + $0xd4] sm:$0xf]  ;;  %v4025_v7 = vld [vmem:[%s5700_s10 + $0x24] sm:$0xf] }
 0x18b   : > { %v3724_v18 = vor.u32 %v4047_v13, %v3721_v14 }
 0x18c   : > { %2478 = vmatpush.bf16.msrb.mxu3 %v3676_v63 }
 0x18d   : > { %2228 = vmatpush.bf16.msra.mxu2 %v3568_v32  ;;  %2267 = vmatpush.bf16.msrb.mxu0 %v3564_v55  ;;  %v4051_v32 = vld [vmem:[%s5700_s10 + $0xf4] sm:$0xf]  ;;  %v4049_v55 = vld [vmem:[%s5700_s10 + $0xe4] sm:$0xf] }
 0x18e   : > { %v3740_v36 = vor.u32 %v4051_v32, %v3737_v34  ;;  %2440 = vmatpush.bf16.msra.mxu1 %v3672_v33  ;;  %v3649_v33 = vld [vmem:[%s5700_s10 + $0x48] sm:$0xf0] }
 0x191   : > { %2229 = vmatpush.bf16.msra.mxu2 %v3560_v48  ;;  %2268 = vmatpush.bf16.msrb.mxu0 %v3556_v16  ;;  %v3711_v16 = vld [vmem:[%s5700_s10 + $0xc0] sm:$0xf] }
 0x192   : > { %2441 = vmatpush.bf16.msra.mxu1 %v3664_v39  ;;  %v3712_v32 = vor.u32 %v4046_v22, %v3711_v16 }
 0x195   : > { %2230 = vmatpush.bf16.msra.mxu2 %v3552_v0  ;;  %2497 = vmatpush.bf16.msra.mxu0 %v3740_v36  ;;  %v3657_v0 = vld [vmem:[%s5700_s10 + $0x58] sm:$0xf0]  ;;  %v4030_v36 = vld [vmem:[%s5700_s10 + $0x44] sm:$0xf0] }
 0x196   : > { %2442 = vmatpush.bf16.msra.mxu1 %v3656_v10 }
 0x199   : > { %2459 = vmatpush.bf16.msrb.mxu2 %v3736_v23  ;;  %v4029_v23 = vld [vmem:[%s5700_s10 + $0x44] sm:$0xf] }
 0x1ab   : > { %v4845_v29 = vpop.f32.mrf.mxu1 }
 0x1b1   : > { %v4859_v21 = vpop.f32.mrf.mxu2 }
 0x1b3   : > { %v4879_v46 = vpop.f32.mrf.mxu1  ;;  %v4881_v47 = vpop.f32.mrf.mxu0 }
 0x1b4   : > { %v1249_v35 = vadd.f32 %v4881_v47, %v4859_v21  ;;  %v3727_v21 = vld [vmem:[%s5700_s10 + $0xe0] sm:$0xf]  ;;  %v4050_v47 = vld [vmem:[%s5700_s10 + $0xe4] sm:$0xf0] }
 0x1b5   : > { %v3728_v48 = vor.u32 %v4050_v47, %v3727_v21 }
 0x1b7   : > { %2460 = vmatpush.bf16.msrb.mxu2 %v3728_v48  ;;  %v4044_v48 = vld [vmem:[%s5700_s10 + $0xb4] sm:$0xf0] }
 0x1b9   : > { %v4892_v53 = vpop.f32.mrf.mxu2  ;;  %v4894_v54 = vpop.f32.mrf.mxu3 }
 0x1ba   : > { %v1230_v38 = vadd.f32 %v4894_v54, %v4845_v29  ;;  %v4033_v29 = vld [vmem:[%s5700_s10 + $0x64] sm:$0xf] }
 0x1bb   : > { %v4905_v57 = vpop.f32.mrf.mxu1  ;;  %v4907_v4 = vpop.f32.mrf.mxu0  ;;  %v3668_v27 = vor.u32 %v4033_v29, %v3665_v49 }
 0x1bc   : > { %v1251_v17 = vadd.f32 %v4907_v4, %v4892_v53  ;;  %v3647_v53 = vld [vmem:[%s5700_s10 + $0x40] sm:$0xf] }
 0x1bd   : > { %2479 = vmatpush.bf16.msrb.mxu3 %v3668_v27  ;;  %v3648_v29 = vor.u32 %v4030_v36, %v3647_v53 }
 0x1bf   : > { %2443 = vmatpush.bf16.msra.mxu1 %v3648_v29  ;;  %v4023_v29 = vld [vmem:[%s5700_s10 + $0x14] sm:$0xf] }
 0x1c1   : > { %v4948_v25 = vpop.f32.mrf.mxu2  ;;  %v4950_v26 = vpop.f32.mrf.mxu3 }
 0x1c2   : > { %v1232_v52 = vadd.f32 %v4950_v26, %v4879_v46  ;;  %v4048_v46 = vld [vmem:[%s5700_s10 + $0xd4] sm:$0xf0]  ;;  %v4031_v26 = vld [vmem:[%s5700_s10 + $0x54] sm:$0xf] }
 0x1c3   : > { %v4961_v30 = vpop.f32.mrf.mxu1  ;;  %v4963_v31 = vpop.f32.mrf.mxu0  ;;  %v3720_v1 = vor.u32 %v4048_v46, %v3719_v61  ;;  %v3660_v5 = vor.u32 %v4031_v26, %v3657_v0  ;;  %v4043_v61 = vld [vmem:[%s5700_s10 + $0xb4] sm:$0xf]  ;;  %v3695_v26 = vld [vmem:[%s5700_s10 + $0xa0] sm:$0xf]  ;;  %v4042_v0 = vld [vmem:[%s5700_s10 + $0xa4] sm:$0xf0] }
 0x1c4   : > { %v3696_v16 = vor.u32 %v4042_v0, %v3695_v26  ;;  %v4116_v26 = vld [vmem:[%s5700_s10 + $0x2f4] sm:$0xf0] }
 0x1c5   : > { %2461 = vmatpush.bf16.msrb.mxu2 %v3720_v1  ;;  %2480 = vmatpush.bf16.msrb.mxu3 %v3660_v5  ;;  %v1254_v5 = vadd.f32 %v4963_v31, %v4948_v25  ;;  %v4026_v25 = vld [vmem:[%s5700_s10 + $0x24] sm:$0xf0]  ;;  %v4041_v31 = vld [vmem:[%s5700_s10 + $0xa4] sm:$0xf] }
 0x1c9   : > { %v5004_v56 = vpop.f32.mrf.mxu2  ;;  %v5006_v58 = vpop.f32.mrf.mxu3  ;;  %2462 = vmatpush.bf16.msrb.mxu2 %v3712_v32  ;;  %v3687_v32 = vld [vmem:[%s5700_s10 + $0x90] sm:$0xf] }
 0x1ca   : > { %v1235_v27 = vadd.f32 %v5006_v58, %v4905_v57  ;;  %v3644_v57 = vor.u32 %v4027_v50, %v3641_v15  ;;  %v3689_v15 = vld [vmem:[%s5700_s10 + $0x98] sm:$0xf0] }
 0x1cb   : > { %v5017_v20 = vpop.f32.mrf.mxu0  ;;  %v1364_v19 = vpop.f32.mrf.mxu1 }
 0x1cc   : > { %v1393_v54 = vadd.f32 %v1364_v19, %v1230_v38  ;;  %v3732_v19 = vor.u32 %v4049_v55, %v3729_v60  ;;  %v4045_v38 = vld [vmem:[%s5700_s10 + $0xc4] sm:$0xf]  ;;  %v4028_v60 = vld [vmem:[%s5700_s10 + $0x34] sm:$0xf0] }
 0x1ce   : > { %v1407_v8 = vadd.f32 %v5065_v40, %v1393_v54  ;;  %2498 = vmatpush.bf16.msra.mxu0 %v3732_v19 }
 0x1d1   : > { %v5067_v41 = vpop.f32.mrf.mxu3  ;;  %v1383_v42 = vpop.f32.mrf.mxu2 }
 0x1d2   : > { %v1394_v24 = vadd.f32 %v1383_v42, %v1249_v35  ;;  %v3652_v35 = vor.u32 %v4029_v23, %v3649_v33  ;;  %v3713_v42 = vld [vmem:[%s5700_s10 + $0xc8] sm:$0xf0]  ;;  %2499 = vmatpush.bf16.msra.mxu0 %v3724_v18  ;;  %v4040_v33 = vld [vmem:[%s5700_s10 + $0x94] sm:$0xf0]  ;;  %v1237_v53 = vadd.f32 %v5067_v41, %v4961_v30  ;;  %v3625_v30 = vld [vmem:[%s5700_s10 + $0x18] sm:$0xf0] }
 0x1d3   : > { %v1366_v43 = vpop.f32.mrf.mxu1  ;;  %v5080_v44 = vpop.f32.mrf.mxu0  ;;  %v3716_v54 = vor.u32 %v4045_v38, %v3713_v42 }
 0x1d4   : > { %v1408_v62 = vadd.f32 %v5069_v59, %v1394_v24  ;;  %v1395_v2 = vadd.f32 %v1366_v43, %v1232_v52  ;;  %v1887_v24 = vmax.f32 %v1407_v8, 0.0  ;;  %v3703_v43 = vld [vmem:[%s5700_s10 + $0xb0] sm:$0xf]  ;;  %2481 = vmatpush.bf16.msrb.mxu3 %v3652_v35  ;;  %v3633_v8 = vld [vmem:[%s5700_s10 + $0x28] sm:$0xf0] }
 0x1d5   : > { %v3639_v52 = vld [vmem:[%s5700_s10 + $0x30] sm:$0xf]  ;;  %v3704_v55 = vor.u32 %v4044_v48, %v3703_v43  ;;  %v3636_v36 = vor.u32 %v4025_v7, %v3633_v8  ;;  %v4024_v48 = vld [vmem:[%s5700_s10 + $0x14] sm:$0xf0] }
 0x1d6   : > { %v1888_v63 = vmax.f32 %v1408_v62, 0.0  ;;  %v1409_v4 = vadd.f32 %v5065_v40, %v1395_v2  ;;  %v3705_v62 = vld [vmem:[%s5700_s10 + $0xb8] sm:$0xf0]  ;;  %v3640_v58 = vor.u32 %v4028_v60, %v3639_v52  ;;  %2500 = vmatpush.bf16.msra.mxu0 %v3716_v54  ;;  %v3688_v54 = vor.u32 %v4040_v33, %v3687_v32  ;;  %v3623_v43 = vld [vmem:[%s5700_s10 + $0x10] sm:$0xf] }
 0x1d7   : > { %v3708_v1 = vor.u32 %v4043_v61, %v3705_v62  ;;  %2463 = vmatpush.bf16.msrb.mxu2 %v3704_v55  ;;  %v3679_v52 = vld [vmem:[%s5700_s10 + $0x80] sm:$0xf]  ;;  %v4021_v60 = vld [vmem:[%s5700_s10 + $0x4] sm:$0xf]  ;;  %v3617_v61 = vld [vmem:[%s5700_s10 + $0x8] sm:$0xf0]  ;;  %v1256_v62 = vadd.f32 %v5017_v20, %v5004_v56 }
 0x1d8   : > { %v1895_v39 = vpack.c.bf16 %v1888_v63, %v1887_v24  ;;  %v1889_v19 = vmax.f32 %v1409_v4, 0.0  ;;  %2482 = vmatpush.bf16.msrb.mxu3 %v3644_v57  ;;  %2444 = vmatpush.bf16.msra.mxu1 %v3640_v58  ;;  %v3615_v57 = vld [vmem:[%s5700_s10] sm:$0xf]  ;;  %v3895_v58 = vld [vmem:[%s5700_s10 + $0x2f0] sm:$0xf] }
 0x1d9   : > { %v1385_v12 = vpop.f32.mrf.mxu2  ;;  %v5136_v28 = vpop.f32.mrf.mxu3  ;;  %v3887_v33 = vld [vmem:[%s5700_s10 + $0x2e0] sm:$0xf] }
 0x1da   : > { %v1396_v34 = vadd.f32 %v1385_v12, %v1251_v17  ;;  %v1903_v10 = vunpack.c.l.b16 %v1895_v39  ;;  %v3631_v17 = vld [vmem:[%s5700_s10 + $0x20] sm:$0xf]  ;;  %v1904_v18 = vunpack.c.h.b16 %v1895_v39  ;;  %v3697_v12 = vld [vmem:[%s5700_s10 + $0xa8] sm:$0xf0]  ;;  %2501 = vmatpush.bf16.msra.mxu0 %v3708_v1  ;;  %v4022_v1 = vld [vmem:[%s5700_s10 + $0x4] sm:$0xf0] }
 0x1db   : > { %v1369_v21 = vpop.f32.mrf.mxu1  ;;  %v5154_v47 = vpop.f32.mrf.mxu0  ;;  %2464 = vmatpush.bf16.msrb.mxu2 %v3696_v16  ;;  %v3700_v41 = vor.u32 %v4041_v31, %v3697_v12  ;;  %v3833_v16 = vld [vmem:[%s5700_s10 + $0x278] sm:$0xf0]  ;;  %v3616_v32 = vor.u32 %v4022_v1, %v3615_v57  ;;  %v4095_v57 = vld [vmem:[%s5700_s10 + $0x254] sm:$0xf] }
 0x1dc   : > { %v1410_v49 = vadd.f32 %v5069_v59, %v1396_v34  ;;  %v1397_v2 = vadd.f32 %v1369_v21, %v1235_v27  ;;  %v3632_v21 = vor.u32 %v4026_v25, %v3631_v17  ;;  %v4038_v27 = vld [vmem:[%s5700_s10 + $0x84] sm:$0xf0]  ;;  %2483 = vmatpush.bf16.msrb.mxu3 %v3636_v36  ;;  %v3831_v17 = vld [vmem:[%s5700_s10 + $0x270] sm:$0xf] }
 0x1dd   : > { %v3680_v20 = vor.u32 %v4038_v27, %v3679_v52 }
 0x1de   : > { %v1890_v46 = vmax.f32 %v1410_v49, 0.0  ;;  %v5220_v4 = vadd.f32 %v5065_v40, %v1397_v2  ;;  %v4039_v49 = vld [vmem:[%s5700_s10 + $0x94] sm:$0xf]  ;;  %2445 = vmatpush.bf16.msra.mxu1 %v3632_v21  ;;  %2502 = vmatpush.bf16.msra.mxu0 %v3700_v41 }
 0x1df   : > { %2465 = vmatpush.bf16.msrb.mxu2 %v3688_v54  ;;  %v3692_v56 = vor.u32 %v4039_v49, %v3689_v15  ;;  %v3823_v54 = vld [vmem:[%s5700_s10 + $0x260] sm:$0xf]  ;;  %v4113_v49 = vld [vmem:[%s5700_s10 + $0x2e4] sm:$0xf] }
 0x1e0   : > { %v1896_v6 = vpack.c.bf16 %v1890_v46, %v1889_v19  ;;  %v1891_v39 = vmax.f32 %v5220_v4, 0.0  ;;  %v3628_v19 = vor.u32 %v4023_v29, %v3625_v30  ;;  %v3624_v46 = vor.u32 %v4024_v48, %v3623_v43  ;;  %v4097_v29 = vld [vmem:[%s5700_s10 + $0x264] sm:$0xf]  ;;  %v3825_v30 = vld [vmem:[%s5700_s10 + $0x268] sm:$0xf0] }
 0x1e1   : > { %v1388_v13 = vpop.f32.mrf.mxu2  ;;  %v5197_v14 = vpop.f32.mrf.mxu3  ;;  %v4098_v48 = vld [vmem:[%s5700_s10 + $0x264] sm:$0xf0] }
 0x1e2   : > { %v1905_v22 = vunpack.c.l.b16 %v1896_v6  ;;  %v1906_v23 = vunpack.c.h.b16 %v1896_v6  ;;  %v1398_v63 = vadd.f32 %v1388_v13, %v1254_v5  ;;  %v4037_v5 = vld [vmem:[%s5700_s10 + $0x84] sm:$0xf]  ;;  %v3681_v6 = vld [vmem:[%s5700_s10 + $0x88] sm:$0xf0]  ;;  %v4099_v13 = vld [vmem:[%s5700_s10 + $0x274] sm:$0xf]  ;;  %2484 = vmatpush.bf16.msrb.mxu3 %v3628_v19  ;;  %2446 = vmatpush.bf16.msra.mxu1 %v3624_v46 }
 0x1e3   : > { %v1371_v34 = vpop.f32.mrf.mxu1  ;;  %v5222_v35 = vpop.f32.mrf.mxu0  ;;  %2503 = vmatpush.bf16.msra.mxu0 %v3692_v56  ;;  %2466 = vmatpush.bf16.msrb.mxu2 %v3680_v20  ;;  %v3836_v36 = vor.u32 %v4099_v13, %v3833_v16  ;;  %v4112_v46 = vld [vmem:[%s5700_s10 + $0x2d4] sm:$0xf0]  ;;  %v3824_v20 = vor.u32 %v4098_v48, %v3823_v54  ;;  %v3863_v54 = vld [vmem:[%s5700_s10 + $0x2b0] sm:$0xf] }
 0x1e4   : > { %v1412_v38 = vadd.f32 %v5069_v59, %v1398_v63  ;;  %v5225_v42 = vpack.c.b16 %v1905_v22, %v1903_v10  ;;  %v5227_v24 = vpack.c.b16 %v1906_v23, %v1904_v18  ;;  %v1399_v50 = vadd.f32 %v1371_v34, %v1237_v53  ;;  %v4115_v22 = vld [vmem:[%s5700_s10 + $0x2f4] sm:$0xf]  ;;  %v3897_v23 = vld [vmem:[%s5700_s10 + $0x2f8] sm:$0xf0]  ;;  %v4114_v53 = vld [vmem:[%s5700_s10 + $0x2e4] sm:$0xf0] }
 0x1e5   : > { %v3896_v10 = vor.u32 %v4116_v26, %v3895_v58  ;;  %v3620_v18 = vor.u32 %v4021_v60, %v3617_v61  ;;  %v3684_v34 = vor.u32 %v4037_v5, %v3681_v6  ;;  %v3900_v21 = vor.u32 %v4115_v22, %v3897_v23  ;;  %v3817_v58 = vld [vmem:[%s5700_s10 + $0x258] sm:$0xf0]  ;;  %v4096_v13 = vld [vmem:[%s5700_s10 + $0x254] sm:$0xf0]  ;;  %v4093_v22 = vld [vmem:[%s5700_s10 + $0x244] sm:$0xf] }
 0x1e6   : > { %2212 = vmatmul.bf16.vlgmr.msrb.gmra.mxu1 %v5225_v42  ;;  %2231 = vmatmul.bf16.vlgmr.msra.gmra.mxu2 %v5227_v24  ;;  %v1892_v55 = vmax.f32 %v1412_v38, 0.0  ;;  %v1413_v7 = vadd.f32 %v5065_v40, %v1399_v50  ;;  %v4100_v40 = vld [vmem:[%s5700_s10 + $0x274] sm:$0xf0]  ;;  %v3888_v41 = vor.u32 %v4114_v53, %v3887_v33  ;;  %v3889_v50 = vld [vmem:[%s5700_s10 + $0x2e8] sm:$0xf0]  ;;  %v1916_v56 = vshrl.u32 %v5225_v42, 16 }
 0x1e7   : > { %2250 = vmatmul.bf16.vlgmr.msra.gmra.mxu3 %v5225_v42  ;;  %2269 = vmatmul.bf16.vlgmr.msrb.gmra.mxu0 %v5227_v24  ;;  %v3892_v1 = vor.u32 %v4113_v49, %v3889_v50  ;;  %v3809_v23 = vld [vmem:[%s5700_s10 + $0x248] sm:$0xf0]  ;;  %v1919_v33 = vshll.u32 %v5225_v42, 16  ;;  %v1926_v53 = vshll.u32 %v5227_v24, 16  ;;  %v4108_v49 = vld [vmem:[%s5700_s10 + $0x2b4] sm:$0xf0] }
 0x1e8   : > { %v1897_v4 = vpack.c.bf16 %v1892_v55, %v1891_v39  ;;  %2728 = vmatpush.bf16.msra.mxu2 %v3896_v10  ;;  %2485 = vmatpush.bf16.msrb.mxu3 %v3620_v18  ;;  %v3828_v39 = vor.u32 %v4097_v29, %v3825_v30  ;;  %v3879_v55 = vld [vmem:[%s5700_s10 + $0x2d0] sm:$0xf]  ;;  %v3871_v18 = vld [vmem:[%s5700_s10 + $0x2c0] sm:$0xf]  ;;  %v3812_v29 = vor.u32 %v4093_v22, %v3809_v23  ;;  %v4109_v30 = vld [vmem:[%s5700_s10 + $0x2c4] sm:$0xf] }
 0x1e9   : > { %v1390_v0 = vpop.f32.mrf.mxu2  ;;  %v5275_v2 = vpop.f32.mrf.mxu3  ;;  %2447 = vmatpush.bf16.msra.mxu1 %v3616_v32  ;;  %2504 = vmatpush.bf16.msra.mxu0 %v3684_v34  ;;  %v3815_v10 = vld [vmem:[%s5700_s10 + $0x250] sm:$0xf]  ;;  %v3880_v16 = vor.u32 %v4112_v46, %v3879_v55  ;;  %v4091_v50 = vld [vmem:[%s5700_s10 + $0x234] sm:$0xf]  ;;  %v4092_v46 = vld [vmem:[%s5700_s10 + $0x234] sm:$0xf0] }
 0x1ea   : > { %v1400_v8 = vadd.f32 %v1390_v0, %v1256_v62  ;;  %v1907_v15 = vunpack.c.l.b16 %v1897_v4  ;;  %v1908_v60 = vunpack.c.h.b16 %v1897_v4  ;;  %v3816_v4 = vor.u32 %v4096_v13, %v3815_v10  ;;  %v3793_v10 = vld [vmem:[%s5700_s10 + $0x228] sm:$0xf0] }
 0x1eb   : > { %v5296_v25 = vpop.f32.mrf.mxu0  ;;  %v1701_v31 = vpop.f32.mrf.mxu1 }
 0x1ec   : > { %v1414_v63 = vadd.f32 %v5069_v59, %v1400_v8  ;;  %v5309_v12 = vadd.f32 %v1701_v31, %v5136_v28  ;;  %v1893_v59 = vmax.f32 %v1413_v7, 0.0  ;;  %v3832_v28 = vor.u32 %v4100_v40, %v3831_v17  ;;  %2747 = vmatpush.bf16.msra.mxu3 %v3836_v36  ;;  %2729 = vmatpush.bf16.msra.mxu2 %v3888_v41  ;;  %v3881_v31 = vld [vmem:[%s5700_s10 + $0x2d8] sm:$0xf0]  ;;  %v4110_v40 = vld [vmem:[%s5700_s10 + $0x2c4] sm:$0xf0] }
 0x1ed   : > { %2766 = vmatpush.bf16.msrb.mxu0 %v3900_v21  ;;  %v3820_v17 = vor.u32 %v4095_v57, %v3817_v58  ;;  %v3807_v36 = vld [vmem:[%s5700_s10 + $0x240] sm:$0xf]  ;;  %v3872_v21 = vor.u32 %v4110_v40, %v3871_v18  ;;  %v3873_v41 = vld [vmem:[%s5700_s10 + $0x2c8] sm:$0xf0]  ;;  %v3864_v57 = vor.u32 %v4108_v49, %v3863_v54  ;;  %v4090_v18 = vld [vmem:[%s5700_s10 + $0x224] sm:$0xf0] }
 0x1ee   : > { %v1894_v38 = vmax.f32 %v1414_v63, 0.0  ;;  %2709 = vmatpush.bf16.msrb.mxu1 %v3832_v28  ;;  %v5391_v63 = vrot.slane %v1916_v56, 7 }
 0x1f0   : > { %v1898_v43 = vpack.c.bf16 %v1894_v38, %v1893_v59  ;;  %2748 = vmatpush.bf16.msra.mxu3 %v3828_v39  ;;  %v4094_v59 = vld [vmem:[%s5700_s10 + $0x244] sm:$0xf0]  ;;  %2730 = vmatpush.bf16.msra.mxu2 %v3880_v16 }
 0x1f1   : > { %v5335_v52 = vpop.f32.mrf.mxu3  ;;  %v1720_v27 = vpop.f32.mrf.mxu2  ;;  %2767 = vmatpush.bf16.msrb.mxu0 %v3892_v1  ;;  %v3808_v55 = vor.u32 %v4094_v59, %v3807_v36  ;;  %v4089_v1 = vld [vmem:[%s5700_s10 + $0x224] sm:$0xf]  ;;  %v3847_v36 = vld [vmem:[%s5700_s10 + $0x290] sm:$0xf] }
 0x1f2   : > { %v1909_v61 = vunpack.c.l.b16 %v1898_v43  ;;  %v1910_v62 = vunpack.c.h.b16 %v1898_v43  ;;  %v1721_v19 = vadd.f32 %v1720_v27, %v5080_v44  ;;  %v1923_v44 = vshrl.u32 %v5227_v24, 16  ;;  %2710 = vmatpush.bf16.msrb.mxu1 %v3824_v20  ;;  %v4106_v20 = vld [vmem:[%s5700_s10 + $0x2a4] sm:$0xf0] }
 0x1f3   : > { %v1703_v26 = vpop.f32.mrf.mxu1  ;;  %v1855_v0 = vpop.f32.mrf.mxu0 }
 0x1f4   : > { %v5353_v5 = vadd.f32 %v1703_v26, %v5197_v14  ;;  %v5355_v6 = vadd.f32 %v1855_v0, %v1721_v19  ;;  %v5357_v7 = vpack.c.b16 %v1909_v61, %v1907_v15  ;;  %v5359_v8 = vpack.c.b16 %v1910_v62, %v1908_v60  ;;  %v4111_v14 = vld [vmem:[%s5700_s10 + $0x2d4] sm:$0xf]  ;;  %2749 = vmatpush.bf16.msra.mxu3 %v3820_v17  ;;  %v3801_v15 = vld [vmem:[%s5700_s10 + $0x238] sm:$0xf0]  ;;  %v3799_v19 = vld [vmem:[%s5700_s10 + $0x230] sm:$0xf] }
 0x1f5   : > { %v5395_v32 = vrot.slane %v1923_v44, 7  ;;  %v3884_v34 = vor.u32 %v4111_v14, %v3881_v31  ;;  %v3876_v62 = vor.u32 %v4109_v30, %v3873_v41  ;;  %2731 = vmatpush.bf16.msra.mxu2 %v3872_v21  ;;  %v3804_v58 = vor.u32 %v4091_v50, %v3801_v15  ;;  %v3865_v26 = vld [vmem:[%s5700_s10 + $0x2b8] sm:$0xf0]  ;;  %v3855_v0 = vld [vmem:[%s5700_s10 + $0x2a0] sm:$0xf] }
 0x1f6   : > { %2217 = vmatmul.bf16.gmra.mxu1 %v5357_v7  ;;  %2236 = vmatmul.bf16.gmra.mxu2 %v5359_v8  ;;  %v3800_v17 = vor.u32 %v4092_v46, %v3799_v19  ;;  %v3791_v31 = vld [vmem:[%s5700_s10 + $0x220] sm:$0xf]  ;;  %v3856_v23 = vor.u32 %v4106_v20, %v3855_v0  ;;  %v4087_v21 = vld [vmem:[%s5700_s10 + $0x214] sm:$0xf]  ;;  %v3783_v15 = vld [vmem:[%s5700_s10 + $0x210] sm:$0xf] }
 0x1f7   : > { %2255 = vmatmul.bf16.gmra.mxu3 %v5357_v7  ;;  %2274 = vmatmul.bf16.gmra.mxu0 %v5359_v8  ;;  %v3792_v49 = vor.u32 %v4090_v18, %v3791_v31  ;;  %v4085_v19 = vld [vmem:[%s5700_s10 + $0x204] sm:$0xf]  ;;  %v3777_v46 = vld [vmem:[%s5700_s10 + $0x208] sm:$0xf0]  ;;  %v1933_v31 = vshll.u32 %v5357_v7, 16  ;;  %v1941_v18 = vshll.u32 %v5359_v8, 16 }
 0x1f8   : > { %2711 = vmatpush.bf16.msrb.mxu1 %v3816_v4  ;;  %2768 = vmatpush.bf16.msrb.mxu0 %v3884_v34  ;;  %v3796_v4 = vor.u32 %v4089_v1, %v3793_v10  ;;  %v3857_v34 = vld [vmem:[%s5700_s10 + $0x2a8] sm:$0xf0]  ;;  %v3780_v20 = vor.u32 %v4085_v19, %v3777_v46  ;;  %v4086_v1 = vld [vmem:[%s5700_s10 + $0x204] sm:$0xf0]  ;;  %v4101_v10 = vld [vmem:[%s5700_s10 + $0x284] sm:$0xf] }
 0x1f9   : > { %v1722_v38 = vpop.f32.mrf.mxu2  ;;  %v1836_v28 = vpop.f32.mrf.mxu3  ;;  %2750 = vmatpush.bf16.msra.mxu3 %v3812_v29  ;;  %2732 = vmatpush.bf16.msra.mxu2 %v3864_v57  ;;  %v3785_v29 = vld [vmem:[%s5700_s10 + $0x218] sm:$0xf0]  ;;  %v3860_v50 = vor.u32 %v4105_v37, %v3857_v34 }
 0x1fa   : > { %v1723_v43 = vadd.f32 %v1722_v38, %v5154_v47  ;;  %v5416_v48 = vadd.f32 %v1836_v28, %v5309_v12  ;;  %v1921_v47 = vor.u32 %v1919_v33, %v5391_v63  ;;  %v1928_v12 = vor.u32 %v1926_v53, %v5395_v32  ;;  %v4104_v28 = vld [vmem:[%s5700_s10 + $0x294] sm:$0xf0] }
 0x1fb   : > { %v1706_v27 = vpop.f32.mrf.mxu1  ;;  %v1857_v39 = vpop.f32.mrf.mxu0  ;;  %v3848_v45 = vor.u32 %v4104_v28, %v3847_v36  ;;  %v1955_v28 = vrot.slane %v1926_v53, 1 }
 0x1fc   : > { %v5434_v60 = vadd.f32 %v1706_v27, %v5275_v2  ;;  %v5436_v61 = vadd.f32 %v1857_v39, %v1723_v43  ;;  %v4107_v2 = vld [vmem:[%s5700_s10 + $0x2b4] sm:$0xf]  ;;  %v1949_v13 = vsel %vm4344_vm9, 0, %v1921_v47  ;;  %v1950_v16 = vsel %vm4344_vm9, 0, %v1928_v12  ;;  %2712 = vmatpush.bf16.msrb.mxu1 %v3808_v55  ;;  %2769 = vmatpush.bf16.msrb.mxu0 %v3876_v62  ;;  %v4088_v27 = vld [vmem:[%s5700_s10 + $0x214] sm:$0xf0] }
 0x1fd   : > { %v3868_v14 = vor.u32 %v4107_v2, %v3865_v26  ;;  %2751 = vmatpush.bf16.msra.mxu3 %v3804_v58  ;;  %v1967_v41 = vsel %vm4365_vm12, 0, %v1949_v13  ;;  %v1938_v43 = vshrl.u32 %v5359_v8, 16  ;;  %2733 = vmatpush.bf16.msra.mxu2 %v3856_v23  ;;  %v3788_v39 = vor.u32 %v4087_v21, %v3785_v29  ;;  %v4103_v47 = vld [vmem:[%s5700_s10 + $0x294] sm:$0xf]  ;;  %v3849_v12 = vld [vmem:[%s5700_s10 + $0x298] sm:$0xf0] }
 0x1fe   : > { %v3839_v55 = vld [vmem:[%s5700_s10 + $0x280] sm:$0xf]  ;;  %v4102_v62 = vld [vmem:[%s5700_s10 + $0x284] sm:$0xf0]  ;;  %v3784_v57 = vor.u32 %v4088_v27, %v3783_v15  ;;  %v3852_v58 = vor.u32 %v4103_v47, %v3849_v12  ;;  %v3841_v13 = vld [vmem:[%s5700_s10 + $0x288] sm:$0xf0]  ;;  %v1956_v29 = vor.u32 %v1955_v28, %v1923_v44 }
 0x1ff   : > { %v3775_v2 = vld [vmem:[%s5700_s10 + $0x200] sm:$0xf]  ;;  %v3840_v0 = vor.u32 %v4102_v62, %v3839_v55  ;;  %v1953_v21 = vrot.slane %v1933_v31, 1 }
 0x200   : > { %2713 = vmatpush.bf16.msrb.mxu1 %v3800_v17  ;;  %2770 = vmatpush.bf16.msrb.mxu0 %v3868_v14  ;;  %v1940_v14 = vrot.slane %v1938_v43, 7  ;;  %v2793_v28 = vld [vmem:[%s5701_s11] sm:$0x3] }
 0x201   : > { %v1725_v40 = vpop.f32.mrf.mxu2  ;;  %v1838_v22 = vpop.f32.mrf.mxu3  ;;  %2752 = vmatpush.bf16.msra.mxu3 %v3796_v4  ;;  %2734 = vmatpush.bf16.msra.mxu2 %v3848_v45 }
 0x202   : > { %v1726_v59 = vadd.f32 %v1725_v40, %v5222_v35  ;;  %v5483_v38 = vadd.f32 %v1838_v22, %v5353_v5  ;;  %v1968_v35 = vsel %vm4365_vm12, 0, %v1950_v16  ;;  %v1930_v5 = vshrl.u32 %v5357_v7, 16 }
 0x203   : > { %v1860_v30 = vpop.f32.mrf.mxu0  ;;  %v3776_v40 = vor.u32 %v4086_v1, %v3775_v2  ;;  %v3844_v22 = vor.u32 %v4101_v10, %v3841_v13  ;;  %v1943_v4 = vor.u32 %v1941_v18, %v1940_v14  ;;  %v5581_v7 = vpop.f32.mrf.mxu1 }
 0x204   : > { %v5499_v54 = vadd.f32 %v1860_v30, %v1726_v59  ;;  %2714 = vmatpush.bf16.msrb.mxu1 %v3792_v49  ;;  %2771 = vmatpush.bf16.msrb.mxu0 %v3860_v50  ;;  %v1932_v17 = vrot.slane %v1930_v5, 7  ;;  %v1951_v59 = vrot.slane %v1919_v33, 1  ;;  %v1959_v42 = vor.u32 %v1953_v21, %v1930_v5 }
 0x205   : > { %2753 = vmatpush.bf16.msra.mxu3 %v3788_v39  ;;  %2735 = vmatpush.bf16.msra.mxu2 %v3840_v0  ;;  %v1944_v37 = vsel %vm644_vm5, %v5395_v32, %v1943_v4 }
 0x206   : > { %2448 = vmatmul.bf16.vlgmr.msra.gmra.mxu1 %v1967_v41  ;;  %2467 = vmatmul.bf16.vlgmr.msrb.gmra.mxu2 %v1968_v35  ;;  %v1935_v23 = vor.u32 %v1933_v31, %v1932_v17  ;;  %v1970_v36 = vsel %vm4407_vm6, 0, %v1944_v37  ;;  %v1952_v32 = vor.u32 %v1951_v59, %v1916_v56  ;;  %v1965_v56 = vsel %vm4416_vm15, %v1959_v42, 0 }
 0x207   : > { %2486 = vmatmul.bf16.vlgmr.msrb.gmra.mxu3 %v1967_v41  ;;  %2505 = vmatmul.bf16.vlgmr.msra.gmra.mxu0 %v1968_v35  ;;  %v1973_v51 = vsel %vm4426_vm2, 0, %v1965_v56 }
 0x208   : > { %2715 = vmatpush.bf16.msrb.mxu1 %v3784_v57  ;;  %2772 = vmatpush.bf16.msrb.mxu0 %v3852_v58  ;;  %v1954_v3 = vsel %vm665_vm13, %v1952_v32, %v1953_v21 }
 0x209   : > { %v1841_v26 = vpop.f32.mrf.mxu3  ;;  %2754 = vmatpush.bf16.msra.mxu3 %v3780_v20  ;;  %v1971_v41 = vsel %vm4381_vm1, 0, %v1954_v3  ;;  %v5585_v35 = vpop.f32.mrf.mxu2 }
 0x20a   : > { %v5539_v16 = vadd.f32 %v1841_v26, %v5434_v60  ;;  %v1936_v60 = vsel %vm644_vm5, %v5391_v63, %v1935_v23  ;;  %v1957_v63 = vrot.slane %v1941_v18, 1 }
 0x20b   : > { %v1969_v34 = vsel %vm4407_vm6, 0, %v1936_v60  ;;  %v5583_v8 = vpop.f32.mrf.mxu0 }
 0x20c   : > { %2716 = vmatpush.bf16.msrb.mxu1 %v3776_v40  ;;  %2773 = vmatpush.bf16.msrb.mxu0 %v3844_v22  ;;  %v1958_v30 = vsel %vm665_vm13, %v1956_v29, %v1957_v63  ;;  %v1960_v24 = vor.u32 %v1957_v63, %v1938_v43  ;;  %v1873_v63 = vld [vmem:[%s5699_s9] sm:$0x3] }
 0x20d   : > { %v1972_v33 = vsel %vm4381_vm1, 0, %v1958_v30  ;;  %v5623_v29 = vperm.slane %v1873_v63, 0  ;;  %v5627_v42 = vperm.slane %v1873_v63, 1 }
 0x20e   : > { %v1966_v44 = vsel %vm4416_vm15, %v1960_v24, 0 }
 0x20f   : > { %v1974_v53 = vsel %vm4426_vm2, 0, %v1966_v44  ;;  %v5629_v44 = vperm.slane %v2793_v28, 1 }
 0x211   : > { %v5587_v5 = vpop.f32.mrf.mxu3 }
 0x216   : > { %2453 = vmatmul.bf16.gmra.mxu1 %v1969_v34  ;;  %2472 = vmatmul.bf16.gmra.mxu2 %v1970_v36 }
 0x217   : > { %2491 = vmatmul.bf16.gmra.mxu3 %v1969_v34  ;;  %2510 = vmatmul.bf16.gmra.mxu0 %v1970_v36 }
 0x226   : > { %2717 = vmatmul.bf16.vlgmr.msrb.gmra.mxu1 %v1971_v41  ;;  %2736 = vmatmul.bf16.vlgmr.msra.gmra.mxu2 %v1972_v33 }
 0x227   : > { %2755 = vmatmul.bf16.vlgmr.msra.gmra.mxu3 %v1971_v41  ;;  %2774 = vmatmul.bf16.vlgmr.msrb.gmra.mxu0 %v1972_v33  ;;  %v5625_v41 = vperm.slane %v2793_v28, 0 }
 0x236   : > { %2722 = vmatmul.bf16.gmra.mxu1 %v1973_v51  ;;  %2741 = vmatmul.bf16.gmra.mxu2 %v1974_v53 }
 0x237   : > { %2760 = vmatmul.bf16.gmra.mxu3 %v1973_v51  ;;  %2779 = vmatmul.bf16.gmra.mxu0 %v1974_v53 }
 0x263   : > { %v2213_v9 = vpop.f32.mrf.mxu1 }
 0x264   : > { %v2270_v43 = vpop.f32.mrf.mxu0 }
 0x269   : > { %v2232_v49 = vpop.f32.mrf.mxu2 }
 0x26a   : > { %v2251_v50 = vpop.f32.mrf.mxu3  ;;  %v2233_v36 = vadd.f32 %v2232_v49, %v2213_v9  ;;  %v1879_v49 = vadd.f32 %v5623_v29, %v5416_v48 }
 0x26b   : > { %v2215_v15 = vpop.f32.mrf.mxu1  ;;  %v2271_v34 = vadd.f32 %v2270_v43, %v2251_v50 }
 0x26c   : > { %v2272_v27 = vpop.f32.mrf.mxu0 }
 0x271   : > { %v2234_v11 = vpop.f32.mrf.mxu2 }
 0x272   : > { %v2253_v45 = vpop.f32.mrf.mxu3  ;;  %v2235_v50 = vadd.f32 %v2234_v11, %v2215_v15 }
 0x273   : > { %v5589_v39 = vpop.f32.mrf.mxu1  ;;  %v2273_v53 = vadd.f32 %v2272_v27, %v2253_v45 }
 0x274   : > { %v5591_v47 = vpop.f32.mrf.mxu0 }
 0x279   : > { %v5593_v12 = vpop.f32.mrf.mxu2 }
 0x27a   : > { %v5595_v55 = vpop.f32.mrf.mxu3 }
 0x27b   : > { %v5597_v62 = vpop.f32.mrf.mxu1  ;;  %v2276_v63 = vadd.f32 %v5591_v47, %v5595_v55 }
 0x27c   : > { %v5599_v19 = vpop.f32.mrf.mxu0 }
 0x281   : > { %v5601_v46 = vpop.f32.mrf.mxu2 }
 0x282   : > { %v5603_v57 = vpop.f32.mrf.mxu3 }
 0x283   : > { %v2449_v58 = vpop.f32.mrf.mxu1 }
 0x284   : > { %v2506_v2 = vpop.f32.mrf.mxu0  ;;  %v2450_v21 = vadd.f32 %v2449_v58, %v2233_v36 }
 0x289   : > { %v2468_v26 = vpop.f32.mrf.mxu2 }
 0x28a   : > { %v2487_v0 = vpop.f32.mrf.mxu3  ;;  %v2469_v3 = vadd.f32 %v2468_v26, %v2450_v21 }
 0x28b   : > { %v2451_v20 = vpop.f32.mrf.mxu1  ;;  %v2488_v59 = vadd.f32 %v2487_v0, %v2271_v34 }
 0x28c   : > { %v2508_v1 = vpop.f32.mrf.mxu0  ;;  %v2452_v0 = vadd.f32 %v2451_v20, %v2235_v50  ;;  %v2238_v20 = vadd.f32 %v5593_v12, %v5589_v39 }
 0x28d   : > { %v2507_v24 = vadd.f32 %v2506_v2, %v2488_v59  ;;  %v1880_v2 = vadd.f32 %v5627_v42, %v5355_v6 }
 0x291   : > { %v2470_v10 = vpop.f32.mrf.mxu2 }
 0x292   : > { %v2489_v13 = vpop.f32.mrf.mxu3  ;;  %v2471_v11 = vadd.f32 %v2470_v10, %v2452_v0 }
 0x293   : > { %v2454_v17 = vpop.f32.mrf.mxu1  ;;  %v2490_v27 = vadd.f32 %v2489_v13, %v2273_v53  ;;  %v1881_v13 = vadd.f32 %v5623_v29, %v5483_v38 }
 0x294   : > { %v5605_v14 = vpop.f32.mrf.mxu0 }
 0x295   : > { %v2509_v36 = vadd.f32 %v2508_v1, %v2490_v27  ;;  %v1882_v1 = vadd.f32 %v5627_v42, %v5436_v61  ;;  %v2278_v61 = vadd.f32 %v5599_v19, %v5603_v57  ;;  %v1709_v57 = vadd.f32 %v5581_v7, %v5335_v52 }
 0x299   : > { %v5607_v31 = vpop.f32.mrf.mxu2 }
 0x29a   : > { %v2492_v18 = vpop.f32.mrf.mxu3 }
 0x29b   : > { %v5609_v40 = vpop.f32.mrf.mxu1  ;;  %v2493_v21 = vadd.f32 %v2492_v18, %v2276_v63 }
 0x29c   : > { %v5611_v22 = vpop.f32.mrf.mxu0 }
 0x29d   : > { %v2512_v12 = vadd.f32 %v5605_v14, %v2493_v21  ;;  %v1728_v14 = vadd.f32 %v5585_v35, %v5296_v25 }
 0x2a1   : > { %v5613_v23 = vpop.f32.mrf.mxu2 }
 0x2a2   : > { %v5615_v4 = vpop.f32.mrf.mxu3 }
 0x2a3   : > { %v2718_v60 = vpop.f32.mrf.mxu1 }
 0x2a4   : > { %v2775_v37 = vpop.f32.mrf.mxu0 }
 0x2a9   : > { %v2737_v32 = vpop.f32.mrf.mxu2 }
 0x2aa   : > { %v2738_v30 = vadd.f32 %v2737_v32, %v2718_v60  ;;  %v2756_v33 = vpop.f32.mrf.mxu3 }
 0x2ab   : > { %v2776_v56 = vadd.f32 %v2775_v37, %v2756_v33  ;;  %v2720_v43 = vpop.f32.mrf.mxu1 }
 0x2ac   : > { %v2785_v51 = vadd.f32 %v2738_v30, %v2469_v3  ;;  %v2777_v26 = vpop.f32.mrf.mxu0  ;;  %v2455_v30 = vadd.f32 %v2454_v17, %v2238_v20  ;;  %v1883_v17 = vadd.f32 %v5623_v29, %v5539_v16 }
 0x2ad   : > { %v2786_v9 = vadd.f32 %v2776_v56, %v2507_v24 }
 0x2ae   : > { %v2799_v58 = vadd.f32 %v5625_v41, %v2785_v51  ;;  %v2474_v38 = vadd.f32 %v5607_v31, %v2455_v30 }
 0x2af   : > { %v2800_v45 = vadd.f32 %v5629_v44, %v2786_v9  ;;  %v2240_v9 = vadd.f32 %v5601_v46, %v5597_v62 }
 0x2b0   : > { %v2807_v60 = vadd.f32 %v2799_v58, %v1879_v49  ;;  %v2495_v49 = vadd.f32 %v5615_v4, %v2278_v61 }
 0x2b1   : > { %v2808_v48 = vadd.f32 %v2800_v45, %v1880_v2  ;;  %v2739_v15 = vpop.f32.mrf.mxu2  ;;  %v2457_v16 = vadd.f32 %v5609_v40, %v2240_v9  ;;  %v1872_v2 = vadd.f32 %v5583_v8, %v1728_v14 }
 0x2b2   : > { %2815 = vst [vmem:[%s5638_s22] sm:$0xff] %v2807_v60  ;;  %v2740_v37 = vadd.f32 %v2739_v15, %v2720_v43  ;;  %v2758_v34 = vpop.f32.mrf.mxu3  ;;  %v1884_v43 = vadd.f32 %v5627_v42, %v5499_v54  ;;  %v2514_v52 = vadd.f32 %v5611_v22, %v2495_v49 }
 0x2b3   : > { %2816 = vst [vmem:[%s5638_s22 + $0x8] sm:$0xff] %v2808_v48  ;;  %v2778_v59 = vadd.f32 %v2777_v26, %v2758_v34  ;;  %v2723_v3 = vpop.f32.mrf.mxu1  ;;  %v1871_v26 = vadd.f32 %v5587_v5, %v1709_v57  ;;  %v2476_v54 = vadd.f32 %v5613_v23, %v2457_v16  ;;  %v1886_v23 = vadd.f32 %v5627_v42, %v1872_v2 }
 0x2b4   : > { %v2787_v28 = vadd.f32 %v2740_v37, %v2471_v11  ;;  %v2780_v47 = vpop.f32.mrf.mxu0 }
 0x2b5   : > { %v2788_v6 = vadd.f32 %v2778_v59, %v2509_v36  ;;  %v1885_v45 = vadd.f32 %v5623_v29, %v1871_v26 }
 0x2b6   : > { %v2801_v10 = vadd.f32 %v5625_v41, %v2787_v28 }
 0x2b7   : > { %v2802_v32 = vadd.f32 %v5629_v44, %v2788_v6 }
 0x2b8   : > { %v2809_v33 = vadd.f32 %v2801_v10, %v1881_v13 }
 0x2b9   : > { %v2810_v55 = vadd.f32 %v2802_v32, %v1882_v1  ;;  %v2742_v24 = vpop.f32.mrf.mxu2 }
 0x2ba   : > { %2817 = vst [vmem:[%s5638_s22 + $0x10] sm:$0xff] %v2809_v33  ;;  %v2743_v56 = vadd.f32 %v2742_v24, %v2723_v3  ;;  %v2761_v39 = vpop.f32.mrf.mxu3 }
 0x2bb   : > { %2818 = vst [vmem:[%s5638_s22 + $0x18] sm:$0xff] %v2810_v55  ;;  %v2781_v51 = vadd.f32 %v2780_v47, %v2761_v39  ;;  %v2725_v46 = vpop.f32.mrf.mxu1 }
 0x2bc   : > { %v2789_v53 = vadd.f32 %v2743_v56, %v2474_v38  ;;  %v2782_v25 = vpop.f32.mrf.mxu0 }
 0x2bd   : > { %v2790_v18 = vadd.f32 %v2781_v51, %v2512_v12 }
 0x2be   : > { %v2803_v31 = vadd.f32 %v5625_v41, %v2789_v53 }
 0x2bf   : > { %v2804_v19 = vadd.f32 %v5629_v44, %v2790_v18 }
 0x2c0   : > { %v2811_v50 = vadd.f32 %v2803_v31, %v1883_v17 }
 0x2c1   : > { %v2812_v62 = vadd.f32 %v2804_v19, %v1884_v43  ;;  %v2744_v58 = vpop.f32.mrf.mxu2 }
 0x2c2   : > { %2819 = vst [vmem:[%s5638_s22 + $0x20] sm:$0xff] %v2811_v50  ;;  %v2745_v35 = vadd.f32 %v2744_v58, %v2725_v46  ;;  %v2763_v4 = vpop.f32.mrf.mxu3 }
 0x2c3   : > { %2820 = vst [vmem:[%s5638_s22 + $0x28] sm:$0xff] %v2812_v62  ;;  %v2783_v7 = vadd.f32 %v2782_v25, %v2763_v4 }
 0x2c4   : > { %v2791_v40 = vadd.f32 %v2745_v35, %v2476_v54 }
 0x2c5   : > { %v2792_v27 = vadd.f32 %v2783_v7, %v2514_v52 }
 0x2c6   : > { %v2805_v5 = vadd.f32 %v5625_v41, %v2791_v40 }
 0x2c7   : > { %v2806_v0 = vadd.f32 %v5629_v44, %v2792_v27 }
 0x2c8   : > { %v2813_v60 = vadd.f32 %v2805_v5, %v1885_v45 }
 0x2c9   : > { %v2814_v48 = vadd.f32 %v2806_v0, %v1886_v23 }
 0x2ca   : > { %2821 = vst [vmem:[%s5638_s22 + $0x30] sm:$0xff] %v2813_v60 }
 0x2cb   : > { %2822 = vst [vmem:[%s5638_s22 + $0x38] sm:$0xff] %v2814_v48 }
 0x2cc PF: > { %s23_s21 = sadd.s32 1, %s4182_s21  }
 0x2cd   : > { %p20_p8 = scmp.ge.s32.totalorder %s23_s21, 4  }
 0x2cf   :  { %22 = sbr.rel (!%p20_p8) target bundleno = 1 (0x1), region = 114 }
 0x2d4   :  { %2847 = vsyncpa [#allocation3], 1 }
 0x2d5   :  { %2849 = vsyncpa [#allocation3 + $0x1], 1 }

</bundles_post_ra>
